<compile_context>
chip_gen: v7x
topology: tpu7x:2x2x1
jax: 0.10.0
libtpu: 0.0.40
codegen_flags: <defaults>
</compile_context>

<pallas_src>
import math
from functools import partial

import jax
import jax.numpy as jnp
from jax.experimental import pallas as pl
from jax.experimental.pallas import tpu as pltpu

# ----------------------------- model config ---------------------------------
D_MODEL = 32
N_HEADS = 4
D_K = D_MODEL // N_HEADS
D_FF = 64
N_LAYERS = 2
VOCAB = 50
EPS = 1e-6
NEG_INF = -1e9          # safe in f32
INV_SQRT_DK = 1.0 / math.sqrt(D_K)

_VMEM = pl.BlockSpec(memory_space=pltpu.MemorySpace.VMEM)

# Packed small-vector slab row layout (per layer), encoder / decoder.
ER_BO, ER_B2, ER_LN1G, ER_LN1B, ER_LN2G, ER_LN2B = range(6)
ER_PER_LAYER = 6
(DR_SBO, DR_CBQ, DR_CBO, DR_B2, DR_LN1G, DR_LN1B,
 DR_LN2G, DR_LN2B, DR_LN3G, DR_LN3B) = range(10)
DR_PER_LAYER = 10


# ----------------- in-kernel building blocks (traced inside the body) --------
def _row(slab, idx):
    # Static row slice of the packed (rows, D_MODEL) parameter slab -> (1, D).
    return slab[idx:idx + 1, :]


def _layer_norm(x2d, g, b):
    # Annotated-transformer LayerNorm: g*(x-mean)/(std+eps)+b, unbiased std (ddof=1).
    mean = jnp.mean(x2d, axis=-1, keepdims=True)
    c = x2d - mean
    var = jnp.sum(c * c, axis=-1, keepdims=True) * (1.0 / (D_MODEL - 1))
    inv = pl.reciprocal(jnp.sqrt(var) + EPS, approx=True)   # EUP slot, ~free
    return g * (c * inv) + b


def _mha(q2d, k2d, v2d, bias, hmask, wo, bo, B, Lq, Lk):
    """Head-batched multi-head attention with no per-head lane slicing.

    q2d: (B*Lq, D); k2d/v2d: (B*Lk, D); bias: (B, 1 or Lq, Lk) additive (0 / -1e9);
    hmask: (H*B, 1, D) 0/1 selecting head (z // B)'s lanes; wo: (D, D); bo: (1, D).
    Returns the projected attention output, shape (B*Lq, D).
    """
    H = N_HEADS
    q3 = q2d.reshape(B, Lq, D_MODEL)
    k3 = k2d.reshape(B, Lk, D_MODEL)
    v3 = v2d.reshape(B, Lk, D_MODEL)

    # Fold heads into the batch axis: z = h*B + b (leading-axis concat is layout-free).
    qz = jnp.concatenate([q3] * H, axis=0)                       # (H*B, Lq, D)
    kz = jnp.concatenate([k3] * H, axis=0) * hmask               # zero non-head lanes
    vz = jnp.concatenate([v3] * H, axis=0) * hmask
    bz = jnp.concatenate([bias] * H, axis=0)                     # (H*B, 1|Lq, Lk)

    # One batched score matmul: masked-K full-D contraction == per-head contraction.
    s = jnp.einsum("zqd,zkd->zqk", qz, kz,
                   preferred_element_type=jnp.float32) * INV_SQRT_DK + bz
    s = s - jnp.max(s, axis=-1, keepdims=True)
    p = jnp.exp(s)
    p = p * pl.reciprocal(jnp.sum(p, axis=-1, keepdims=True), approx=True)

    # One batched P.V matmul; row z is nonzero only on head (z//B)'s lanes,
    # so summing the head blocks reproduces concat(heads) exactly.
    a = jnp.einsum("zqk,zkd->zqd", p, vz, preferred_element_type=jnp.float32)
    acat = a[0:B]
    for h in range(1, H):
        acat = acat + a[h * B:(h + 1) * B]                       # (B, Lq, D)

    # Single output projection against the full Wo.
    return jnp.dot(acat.reshape(B * Lq, D_MODEL), wo,
                   preferred_element_type=jnp.float32) + bo


def _ffn(x2d, w1, b1, w2, b2):
    h = jnp.dot(x2d, w1, preferred_element_type=jnp.float32) + b1
    h = jnp.maximum(h, 0.0)                                      # ReLU
    return jnp.dot(h, w2, preferred_element_type=jnp.float32) + b2


# -------------------------- single fused kernel -------------------------------
def _transformer_kernel(src_ref, tgt_ref, sbias_ref, tbias_ref, hmask_ref,
                        e_wqkv, e_wo, e_w1, e_w2, e_bqkv, e_b1, e_vec,
                        d_swqkv, d_swo, d_cwq, d_cwkv, d_cwo, d_w1, d_w2,
                        d_sbqkv, d_cbkv, d_b1, d_vec,
                        o_ref, *, B, S, T):
    # TODO(synk): dropout inside SublayerConnection is identity (inference / p=0);
    #             `generator` is not applied by Transformer.forward, so not here either.
    hmask = hmask_ref[...]              # (H*B, 1, D) head-lane selector (0/1)
    src_bias = sbias_ref[...]           # (B, 1, S)  additive source mask bias
    tgt_bias = tbias_ref[...]           # (B, T, T)  additive causal/self mask bias
    ev = e_vec[...]                     # packed encoder small-vector slab
    dv = d_vec[...]                     # packed decoder small-vector slab

    # ------------------------------- encoder ---------------------------------
    x = src_ref[...]                    # (B*S, D) embedded source, VMEM resident
    for l in range(N_LAYERS):           # static unroll over layers
        r = l * ER_PER_LAYER
        # --- self-attention sublayer ---
        y = _layer_norm(x, _row(ev, r + ER_LN1G), _row(ev, r + ER_LN1B))
        qkv = jnp.dot(y, e_wqkv[l], preferred_element_type=jnp.float32) + e_bqkv[l]
        x = x + _mha(qkv[:, :D_MODEL], qkv[:, D_MODEL:2 * D_MODEL], qkv[:, 2 * D_MODEL:],
                     src_bias, hmask, e_wo[l], _row(ev, r + ER_BO), B, S, S)
        # --- feed-forward sublayer ---
        y = _layer_norm(x, _row(ev, r + ER_LN2G), _row(ev, r + ER_LN2B))
        x = x + _ffn(y, e_w1[l], e_b1[l], e_w2[l], _row(ev, r + ER_B2))
    rf = N_LAYERS * ER_PER_LAYER
    memory = _layer_norm(x, _row(ev, rf), _row(ev, rf + 1))   # (B*S, D), stays on-chip

    # ------------------------------- decoder ---------------------------------
    x = tgt_ref[...]                    # (B*T, D) embedded target
    for l in range(N_LAYERS):
        r = l * DR_PER_LAYER
        # --- masked self-attention ---
        y = _layer_norm(x, _row(dv, r + DR_LN1G), _row(dv, r + DR_LN1B))
        qkv = jnp.dot(y, d_swqkv[l], preferred_element_type=jnp.float32) + d_sbqkv[l]
        x = x + _mha(qkv[:, :D_MODEL], qkv[:, D_MODEL:2 * D_MODEL], qkv[:, 2 * D_MODEL:],
                     tgt_bias, hmask, d_swo[l], _row(dv, r + DR_SBO), B, T, T)
        # --- encoder-decoder (cross) attention ---
        y = _layer_norm(x, _row(dv, r + DR_LN2G), _row(dv, r + DR_LN2B))
        q = jnp.dot(y, d_cwq[l], preferred_element_type=jnp.float32) + _row(dv, r + DR_CBQ)
        kv = jnp.dot(memory, d_cwkv[l], preferred_element_type=jnp.float32) + d_cbkv[l]
        x = x + _mha(q, kv[:, :D_MODEL], kv[:, D_MODEL:],
                     src_bias, hmask, d_cwo[l], _row(dv, r + DR_CBO), B, T, S)
        # --- feed-forward ---
        y = _layer_norm(x, _row(dv, r + DR_LN3G), _row(dv, r + DR_LN3B))
        x = x + _ffn(y, d_w1[l], d_b1[l], d_w2[l], _row(dv, r + DR_B2))
    rf = N_LAYERS * DR_PER_LAYER
    o_ref[...] = _layer_norm(x, _row(dv, rf), _row(dv, rf + 1))


# ------------------------------ wrappers --------------------------------------
def embed(table, ids, pe):
    # Embedding gather + positional encoding (glue, plain JAX — data-dependent gather)
    x = table[ids] * math.sqrt(D_MODEL)
    return x + pe[None, : ids.shape[1], :]


def _head_lane_mask(B):
    # (N_HEADS*B, 1, D_MODEL): 1.0 on lanes of head (z // B), else 0.0
    h_of_z = jnp.arange(N_HEADS * B, dtype=jnp.int32) // B
    d_head = jnp.arange(D_MODEL, dtype=jnp.int32) // D_K
    m = (h_of_z[:, None] == d_head[None, :]).astype(jnp.float32)
    return m[:, None, :]


def transformer_forward(params, src, tgt, src_mask, tgt_mask):
    B, S = src.shape
    T = tgt.shape[1]

    src_x = embed(params["src_emb"], src, params["pe"]).reshape(B * S, D_MODEL)
    tgt_x = embed(params["tgt_emb"], tgt, params["pe"]).reshape(B * T, D_MODEL)

    # Compact per-batch additive mask biases (0 keep / -1e9 masked).  Broadcast over
    # heads and (for the source mask) over the query axis happens inside the kernel.
    src_bias = jnp.where(src_mask == 0, NEG_INF, 0.0).astype(jnp.float32)   # (B,1,S)
    tgt_bias = jnp.where(tgt_mask == 0, NEG_INF, 0.0).astype(jnp.float32)   # (B,T,T)
    hmask = _head_lane_mask(B)

    p = params
    out = pl.pallas_call(
        partial(_transformer_kernel, B=B, S=S, T=T),
        out_shape=jax.ShapeDtypeStruct((B * T, D_MODEL), jnp.float32),
        in_specs=[_VMEM] * 23,
        out_specs=_VMEM,
    )(src_x, tgt_x, src_bias, tgt_bias, hmask,
      p["e_wqkv"], p["e_wo"], p["e_w1"], p["e_w2"], p["e_bqkv"], p["e_b1"], p["e_vec"],
      p["d_swqkv"], p["d_swo"], p["d_cwq"], p["d_cwkv"], p["d_cwo"], p["d_w1"], p["d_w2"],
      p["d_sbqkv"], p["d_cbkv"], p["d_b1"], p["d_vec"])
    return out.reshape(B, T, D_MODEL)
    # NOTE: `generator` (Linear + log_softmax) exists in __init__ but is not applied
    # by Transformer.forward, so it is not applied here either.


# ------------------------------ param init -----------------------------------
def positional_encoding(max_len, d_model):
    pos = jnp.arange(max_len, dtype=jnp.float32)[:, None]
    div = jnp.exp(jnp.arange(0, d_model, 2, dtype=jnp.float32)
                  * (-math.log(10000.0) / d_model))
    pe = jnp.zeros((max_len, d_model), jnp.float32)
    pe = pe.at[:, 0::2].set(jnp.sin(pos * div))
    pe = pe.at[:, 1::2].set(jnp.cos(pos * div))
    return pe


def init_params(key, max_len=64):
    k_src, k_tgt, k_enc, k_dec = jax.random.split(key, 4)

    def rand(k, shape):
        return 0.02 * jax.random.normal(k, shape, jnp.float32)

    zvec = jnp.zeros((D_MODEL,), jnp.float32)
    ovec = jnp.ones((D_MODEL,), jnp.float32)

    params = {
        "src_emb": 0.1 * jax.random.normal(k_src, (VOCAB, D_MODEL), jnp.float32),
        "tgt_emb": 0.1 * jax.random.normal(k_tgt, (VOCAB, D_MODEL), jnp.float32),
        "pe": positional_encoding(max_len, D_MODEL),
    }

    # ---- encoder: layer-stacked weights + one packed small-vector slab ----
    wqkv, wo, w1, w2 = [], [], [], []
    for lk in jax.random.split(k_enc, N_LAYERS):
        k1, k2, k3, k4 = jax.random.split(lk, 4)
        wqkv.append(rand(k1, (D_MODEL, 3 * D_MODEL)))   # fused Q|K|V weight
        wo.append(rand(k2, (D_MODEL, D_MODEL)))
        w1.append(rand(k3, (D_MODEL, D_FF)))
        w2.append(rand(k4, (D_FF, D_MODEL)))
    params["e_wqkv"] = jnp.stack(wqkv)
    params["e_wo"] = jnp.stack(wo)
    params["e_w1"] = jnp.stack(w1)
    params["e_w2"] = jnp.stack(w2)
    params["e_bqkv"] = jnp.zeros((N_LAYERS, 1, 3 * D_MODEL), jnp.float32)
    params["e_b1"] = jnp.zeros((N_LAYERS, 1, D_FF), jnp.float32)
    # rows per layer: [bo, b2, ln1_g, ln1_b, ln2_g, ln2_b]; final rows: [norm_g, norm_b]
    per = jnp.stack([zvec, zvec, ovec, zvec, ovec, zvec])
    params["e_vec"] = jnp.concatenate([per] * N_LAYERS + [jnp.stack([ovec, zvec])], axis=0)

    # ---- decoder ----
    swqkv, swo, cwq, cwkv, cwo, dw1, dw2 = [], [], [], [], [], [], []
    for lk in jax.random.split(k_dec, N_LAYERS):
        k1, k2, k3, k4, k5, k6, k7 = jax.random.split(lk, 7)
        swqkv.append(rand(k1, (D_MODEL, 3 * D_MODEL)))   # fused self Q|K|V
        swo.append(rand(k2, (D_MODEL, D_MODEL)))
        cwq.append(rand(k3, (D_MODEL, D_MODEL)))         # cross Q
        cwkv.append(rand(k4, (D_MODEL, 2 * D_MODEL)))    # fused cross K|V
        cwo.append(rand(k5, (D_MODEL, D_MODEL)))
        dw1.append(rand(k6, (D_MODEL, D_FF)))
        dw2.append(rand(k7, (D_FF, D_MODEL)))
    params["d_swqkv"] = jnp.stack(swqkv)
    params["d_swo"] = jnp.stack(swo)
    params["d_cwq"] = jnp.stack(cwq)
    params["d_cwkv"] = jnp.stack(cwkv)
    params["d_cwo"] = jnp.stack(cwo)
    params["d_w1"] = jnp.stack(dw1)
    params["d_w2"] = jnp.stack(dw2)
    params["d_sbqkv"] = jnp.zeros((N_LAYERS, 1, 3 * D_MODEL), jnp.float32)
    params["d_cbkv"] = jnp.zeros((N_LAYERS, 1, 2 * D_MODEL), jnp.float32)
    params["d_b1"] = jnp.zeros((N_LAYERS, 1, D_FF), jnp.float32)
    # rows per layer: [sbo, cbq, cbo, b2, ln1g, ln1b, ln2g, ln2b, ln3g, ln3b]; final [g, b]
    per = jnp.stack([zvec, zvec, zvec, zvec, ovec, zvec, ovec, zvec, ovec, zvec])
    params["d_vec"] = jnp.concatenate([per] * N_LAYERS + [jnp.stack([ovec, zvec])], axis=0)
    return params


# --------------------------------- main ---------------------------------------
if __name__ == "__main__":
    B, S, T = 2, 8, 8
    root = jax.random.PRNGKey(0)
    kp, ks, kt = jax.random.split(root, 3)

    params = init_params(kp)

    src = jax.random.randint(ks, (B, S), 0, VOCAB, dtype=jnp.int32)
    tgt = jax.random.randint(kt, (B, T), 0, VOCAB, dtype=jnp.int32)

    # src_mask: (B, 1, S) all-valid; tgt_mask: (B, T, T) causal (subsequent mask)
    src_mask = jnp.ones((B, 1, S), jnp.float32)
    tgt_mask = jnp.broadcast_to(
        jnp.tril(jnp.ones((T, T), jnp.float32))[None, :, :], (B, T, T)
    )

    fwd = jax.jit(transformer_forward)
    out = jax.block_until_ready(fwd(params, src, tgt, src_mask, tgt_mask))

    assert out.shape == (B, T, D_MODEL), out.shape
    assert bool(jnp.all(jnp.isfinite(out)))
    print("KERNEL_OK")
</pallas_src>

<mosaic_0001>
module attributes {stable_mosaic.version = 11 : i64} {
  func.func @_transformer_kernel(%arg0: memref<16x32xf32, #tpu.memory_space<vmem>>, %arg1: memref<16x32xf32, #tpu.memory_space<vmem>>, %arg2: memref<2x1x8xf32, #tpu.memory_space<vmem>>, %arg3: memref<2x8x8xf32, #tpu.memory_space<vmem>>, %arg4: memref<8x1x32xf32, #tpu.memory_space<vmem>>, %arg5: memref<2x32x96xf32, #tpu.memory_space<vmem>>, %arg6: memref<2x32x32xf32, #tpu.memory_space<vmem>>, %arg7: memref<2x32x64xf32, #tpu.memory_space<vmem>>, %arg8: memref<2x64x32xf32, #tpu.memory_space<vmem>>, %arg9: memref<2x1x96xf32, #tpu.memory_space<vmem>>, %arg10: memref<2x1x64xf32, #tpu.memory_space<vmem>>, %arg11: memref<14x32xf32, #tpu.memory_space<vmem>>, %arg12: memref<2x32x96xf32, #tpu.memory_space<vmem>>, %arg13: memref<2x32x32xf32, #tpu.memory_space<vmem>>, %arg14: memref<2x32x32xf32, #tpu.memory_space<vmem>>, %arg15: memref<2x32x64xf32, #tpu.memory_space<vmem>>, %arg16: memref<2x32x32xf32, #tpu.memory_space<vmem>>, %arg17: memref<2x32x64xf32, #tpu.memory_space<vmem>>, %arg18: memref<2x64x32xf32, #tpu.memory_space<vmem>>, %arg19: memref<2x1x96xf32, #tpu.memory_space<vmem>>, %arg20: memref<2x1x64xf32, #tpu.memory_space<vmem>>, %arg21: memref<2x1x64xf32, #tpu.memory_space<vmem>>, %arg22: memref<22x32xf32, #tpu.memory_space<vmem>>, %arg23: memref<16x32xf32, #tpu.memory_space<vmem>>) attributes {dimension_semantics = [], scalar_prefetch = 0 : i64, scratch_operands = 0 : i64, tpu.core_type = #tpu.core_type<tc>} {
    %c0 = arith.constant 0 : index
    %c0_0 = arith.constant 0 : index
    %c0_1 = arith.constant 0 : index
    %0 = vector.load %arg4[%c0, %c0_0, %c0_1] : memref<8x1x32xf32, #tpu.memory_space<vmem>>, vector<8x1x32xf32>
    %c0_2 = arith.constant 0 : index
    %c0_3 = arith.constant 0 : index
    %c0_4 = arith.constant 0 : index
    %1 = vector.load %arg2[%c0_2, %c0_3, %c0_4] : memref<2x1x8xf32, #tpu.memory_space<vmem>>, vector<2x1x8xf32>
    %c0_5 = arith.constant 0 : index
    %c0_6 = arith.constant 0 : index
    %c0_7 = arith.constant 0 : index
    %2 = vector.load %arg3[%c0_5, %c0_6, %c0_7] : memref<2x8x8xf32, #tpu.memory_space<vmem>>, vector<2x8x8xf32>
    %c0_8 = arith.constant 0 : index
    %c0_9 = arith.constant 0 : index
    %3 = vector.load %arg11[%c0_8, %c0_9] : memref<14x32xf32, #tpu.memory_space<vmem>>, vector<14x32xf32>
    %c0_10 = arith.constant 0 : index
    %c0_11 = arith.constant 0 : index
    %4 = vector.load %arg22[%c0_10, %c0_11] : memref<22x32xf32, #tpu.memory_space<vmem>>, vector<22x32xf32>
    %c0_12 = arith.constant 0 : index
    %c0_13 = arith.constant 0 : index
    %5 = vector.load %arg0[%c0_12, %c0_13] : memref<16x32xf32, #tpu.memory_space<vmem>>, vector<16x32xf32>
    %6 = vector.extract_strided_slice %3 {offsets = [2, 0], sizes = [1, 32], strides = [1, 1]} : vector<14x32xf32> to vector<1x32xf32>
    %7 = vector.extract_strided_slice %3 {offsets = [3, 0], sizes = [1, 32], strides = [1, 1]} : vector<14x32xf32> to vector<1x32xf32>
    %cst = arith.constant dense<0.000000e+00> : vector<16xf32>
    %8 = vector.multi_reduction <add>, %5, %cst [1] : vector<16x32xf32> to vector<16xf32>
    %9 = vector.shape_cast %8 : vector<16xf32> to vector<16x1xf32>
    %cst_14 = arith.constant 3.200000e+01 : f32
    %10 = vector.broadcast %cst_14 : f32 to vector<16x1xf32>
    %11 = arith.divf %9, %10 : vector<16x1xf32>
    %12 = vector.broadcast %11 : vector<16x1xf32> to vector<16x32xf32>
    %13 = arith.subf %5, %12 : vector<16x32xf32>
    %14 = arith.mulf %13, %13 : vector<16x32xf32>
    %cst_15 = arith.constant dense<0.000000e+00> : vector<16xf32>
    %15 = vector.multi_reduction <add>, %14, %cst_15 [1] : vector<16x32xf32> to vector<16xf32>
    %16 = vector.shape_cast %15 : vector<16xf32> to vector<16x1xf32>
    %cst_16 = arith.constant 0.0322580636 : f32
    %17 = vector.broadcast %cst_16 : f32 to vector<16x1xf32>
    %18 = arith.mulf %16, %17 : vector<16x1xf32>
    %19 = math.sqrt %18 : vector<16x1xf32>
    %cst_17 = arith.constant 9.99999997E-7 : f32
    %20 = vector.broadcast %cst_17 : f32 to vector<16x1xf32>
    %21 = arith.addf %19, %20 : vector<16x1xf32>
    %22 = tpu.reciprocal %21 {approx = true} : vector<16x1xf32> -> vector<16x1xf32>
    %23 = vector.broadcast %22 : vector<16x1xf32> to vector<16x32xf32>
    %24 = arith.mulf %13, %23 : vector<16x32xf32>
    %25 = vector.broadcast %6 : vector<1x32xf32> to vector<16x32xf32>
    %26 = arith.mulf %25, %24 : vector<16x32xf32>
    %27 = vector.broadcast %7 : vector<1x32xf32> to vector<16x32xf32>
    %28 = arith.addf %26, %27 : vector<16x32xf32>
    %c0_18 = arith.constant 0 : index
    %c0_19 = arith.constant 0 : index
    %c0_20 = arith.constant 0 : index
    %29 = vector.load %arg5[%c0_18, %c0_19, %c0_20] : memref<2x32x96xf32, #tpu.memory_space<vmem>>, vector<1x32x96xf32>
    %30 = vector.shape_cast %29 : vector<1x32x96xf32> to vector<32x96xf32>
    %cst_21 = arith.constant dense<0.000000e+00> : vector<16x96xf32>
    %31 = tpu.matmul %28, %30, %cst_21 {dimension_numbers = #tpu.dot_dimension_numbers<[1], [0], [0], [1], [0, 0, 1, 1], [], []>} : vector<16x32xf32>, vector<32x96xf32>, vector<16x96xf32> -> vector<16x96xf32>
    %c0_22 = arith.constant 0 : index
    %c0_23 = arith.constant 0 : index
    %c0_24 = arith.constant 0 : index
    %32 = vector.load %arg9[%c0_22, %c0_23, %c0_24] : memref<2x1x96xf32, #tpu.memory_space<vmem>>, vector<1x1x96xf32>
    %33 = vector.shape_cast %32 : vector<1x1x96xf32> to vector<1x96xf32>
    %34 = vector.broadcast %33 : vector<1x96xf32> to vector<16x96xf32>
    %35 = arith.addf %31, %34 : vector<16x96xf32>
    %36 = vector.extract_strided_slice %35 {offsets = [0, 0], sizes = [16, 32], strides = [1, 1]} : vector<16x96xf32> to vector<16x32xf32>
    %37 = vector.extract_strided_slice %35 {offsets = [0, 32], sizes = [16, 32], strides = [1, 1]} : vector<16x96xf32> to vector<16x32xf32>
    %38 = vector.extract_strided_slice %35 {offsets = [0, 64], sizes = [16, 32], strides = [1, 1]} : vector<16x96xf32> to vector<16x32xf32>
    %c0_25 = arith.constant 0 : index
    %c0_26 = arith.constant 0 : index
    %c0_27 = arith.constant 0 : index
    %39 = vector.load %arg6[%c0_25, %c0_26, %c0_27] : memref<2x32x32xf32, #tpu.memory_space<vmem>>, vector<1x32x32xf32>
    %40 = vector.shape_cast %39 : vector<1x32x32xf32> to vector<32x32xf32>
    %41 = vector.extract_strided_slice %3 {offsets = [0, 0], sizes = [1, 32], strides = [1, 1]} : vector<14x32xf32> to vector<1x32xf32>
    %42 = vector.shape_cast %36 : vector<16x32xf32> to vector<2x8x32xf32>
    %43 = vector.shape_cast %37 : vector<16x32xf32> to vector<2x8x32xf32>
    %44 = vector.shape_cast %38 : vector<16x32xf32> to vector<2x8x32xf32>
    %45 = tpu.concatenate %42, %42, %42, %42 in 0 : vector<2x8x32xf32>, vector<2x8x32xf32>, vector<2x8x32xf32>, vector<2x8x32xf32> -> vector<8x8x32xf32>
    %46 = tpu.concatenate %43, %43, %43, %43 in 0 : vector<2x8x32xf32>, vector<2x8x32xf32>, vector<2x8x32xf32>, vector<2x8x32xf32> -> vector<8x8x32xf32>
    %47 = vector.broadcast %0 : vector<8x1x32xf32> to vector<8x8x32xf32>
    %48 = arith.mulf %46, %47 : vector<8x8x32xf32>
    %49 = tpu.concatenate %44, %44, %44, %44 in 0 : vector<2x8x32xf32>, vector<2x8x32xf32>, vector<2x8x32xf32>, vector<2x8x32xf32> -> vector<8x8x32xf32>
    %50 = vector.broadcast %0 : vector<8x1x32xf32> to vector<8x8x32xf32>
    %51 = arith.mulf %49, %50 : vector<8x8x32xf32>
    %52 = tpu.concatenate %1, %1, %1, %1 in 0 : vector<2x1x8xf32>, vector<2x1x8xf32>, vector<2x1x8xf32>, vector<2x1x8xf32> -> vector<8x1x8xf32>
    "tpu.trace_start"() <{level = 10 : i32, message = "zqd,zkd->zqk"}> : () -> ()
    %cst_28 = arith.constant dense<0.000000e+00> : vector<8x8x8xf32>
    %53 = tpu.matmul %45, %48, %cst_28 {dimension_numbers = #tpu.dot_dimension_numbers<[2], [2], [1], [1], [0, 0, 0, 1, 1, 1], [0], [0]>} : vector<8x8x32xf32>, vector<8x8x32xf32>, vector<8x8x8xf32> -> vector<8x8x8xf32>
    "tpu.trace_stop"() : () -> ()
    %cst_29 = arith.constant 0.353553385 : f32
    %54 = vector.broadcast %cst_29 : f32 to vector<8x8x8xf32>
    %55 = arith.mulf %53, %54 : vector<8x8x8xf32>
    %56 = vector.broadcast %52 : vector<8x1x8xf32> to vector<8x8x8xf32>
    %57 = arith.addf %55, %56 : vector<8x8x8xf32>
    %cst_30 = arith.constant dense<0xFF800000> : vector<8x8xf32>
    %58 = vector.multi_reduction <maximumf>, %57, %cst_30 [2] : vector<8x8x8xf32> to vector<8x8xf32>
    %59 = vector.shape_cast %58 : vector<8x8xf32> to vector<8x8x1xf32>
    %60 = vector.broadcast %59 : vector<8x8x1xf32> to vector<8x8x8xf32>
    %61 = arith.subf %57, %60 : vector<8x8x8xf32>
    %62 = math.exp %61 : vector<8x8x8xf32>
    %cst_31 = arith.constant dense<0.000000e+00> : vector<8x8xf32>
    %63 = vector.multi_reduction <add>, %62, %cst_31 [2] : vector<8x8x8xf32> to vector<8x8xf32>
    %64 = vector.shape_cast %63 : vector<8x8xf32> to vector<8x8x1xf32>
    %65 = tpu.reciprocal %64 {approx = true} : vector<8x8x1xf32> -> vector<8x8x1xf32>
    %66 = vector.broadcast %65 : vector<8x8x1xf32> to vector<8x8x8xf32>
    %67 = arith.mulf %62, %66 : vector<8x8x8xf32>
    "tpu.trace_start"() <{level = 10 : i32, message = "zqk,zkd->zqd"}> : () -> ()
    %cst_32 = arith.constant dense<0.000000e+00> : vector<8x8x32xf32>
    %68 = tpu.matmul %67, %51, %cst_32 {dimension_numbers = #tpu.dot_dimension_numbers<[2], [1], [1], [2], [0, 0, 0, 1, 1, 2], [0], [0]>} : vector<8x8x8xf32>, vector<8x8x32xf32>, vector<8x8x32xf32> -> vector<8x8x32xf32>
    "tpu.trace_stop"() : () -> ()
    %69 = vector.extract_strided_slice %68 {offsets = [0, 0, 0], sizes = [2, 8, 32], strides = [1, 1, 1]} : vector<8x8x32xf32> to vector<2x8x32xf32>
    %70 = vector.extract_strided_slice %68 {offsets = [2, 0, 0], sizes = [2, 8, 32], strides = [1, 1, 1]} : vector<8x8x32xf32> to vector<2x8x32xf32>
    %71 = arith.addf %69, %70 : vector<2x8x32xf32>
    %72 = vector.extract_strided_slice %68 {offsets = [4, 0, 0], sizes = [2, 8, 32], strides = [1, 1, 1]} : vector<8x8x32xf32> to vector<2x8x32xf32>
    %73 = arith.addf %71, %72 : vector<2x8x32xf32>
    %74 = vector.extract_strided_slice %68 {offsets = [6, 0, 0], sizes = [2, 8, 32], strides = [1, 1, 1]} : vector<8x8x32xf32> to vector<2x8x32xf32>
    %75 = arith.addf %73, %74 : vector<2x8x32xf32>
    %76 = vector.shape_cast %75 : vector<2x8x32xf32> to vector<16x32xf32>
    %cst_33 = arith.constant dense<0.000000e+00> : vector<16x32xf32>
    %77 = tpu.matmul %76, %40, %cst_33 {dimension_numbers = #tpu.dot_dimension_numbers<[1], [0], [0], [1], [0, 0, 1, 1], [], []>} : vector<16x32xf32>, vector<32x32xf32>, vector<16x32xf32> -> vector<16x32xf32>
    %78 = vector.broadcast %41 : vector<1x32xf32> to vector<16x32xf32>
    %79 = arith.addf %77, %78 : vector<16x32xf32>
    %80 = arith.addf %5, %79 : vector<16x32xf32>
    %81 = vector.extract_strided_slice %3 {offsets = [4, 0], sizes = [1, 32], strides = [1, 1]} : vector<14x32xf32> to vector<1x32xf32>
    %82 = vector.extract_strided_slice %3 {offsets = [5, 0], sizes = [1, 32], strides = [1, 1]} : vector<14x32xf32> to vector<1x32xf32>
    %cst_34 = arith.constant dense<0.000000e+00> : vector<16xf32>
    %83 = vector.multi_reduction <add>, %80, %cst_34 [1] : vector<16x32xf32> to vector<16xf32>
    %84 = vector.shape_cast %83 : vector<16xf32> to vector<16x1xf32>
    %cst_35 = arith.constant 3.200000e+01 : f32
    %85 = vector.broadcast %cst_35 : f32 to vector<16x1xf32>
    %86 = arith.divf %84, %85 : vector<16x1xf32>
    %87 = vector.broadcast %86 : vector<16x1xf32> to vector<16x32xf32>
    %88 = arith.subf %80, %87 : vector<16x32xf32>
    %89 = arith.mulf %88, %88 : vector<16x32xf32>
    %cst_36 = arith.constant dense<0.000000e+00> : vector<16xf32>
    %90 = vector.multi_reduction <add>, %89, %cst_36 [1] : vector<16x32xf32> to vector<16xf32>
    %91 = vector.shape_cast %90 : vector<16xf32> to vector<16x1xf32>
    %cst_37 = arith.constant 0.0322580636 : f32
    %92 = vector.broadcast %cst_37 : f32 to vector<16x1xf32>
    %93 = arith.mulf %91, %92 : vector<16x1xf32>
    %94 = math.sqrt %93 : vector<16x1xf32>
    %cst_38 = arith.constant 9.99999997E-7 : f32
    %95 = vector.broadcast %cst_38 : f32 to vector<16x1xf32>
    %96 = arith.addf %94, %95 : vector<16x1xf32>
    %97 = tpu.reciprocal %96 {approx = true} : vector<16x1xf32> -> vector<16x1xf32>
    %98 = vector.broadcast %97 : vector<16x1xf32> to vector<16x32xf32>
    %99 = arith.mulf %88, %98 : vector<16x32xf32>
    %100 = vector.broadcast %81 : vector<1x32xf32> to vector<16x32xf32>
    %101 = arith.mulf %100, %99 : vector<16x32xf32>
    %102 = vector.broadcast %82 : vector<1x32xf32> to vector<16x32xf32>
    %103 = arith.addf %101, %102 : vector<16x32xf32>
    %c0_39 = arith.constant 0 : index
    %c0_40 = arith.constant 0 : index
    %c0_41 = arith.constant 0 : index
    %104 = vector.load %arg7[%c0_39, %c0_40, %c0_41] : memref<2x32x64xf32, #tpu.memory_space<vmem>>, vector<1x32x64xf32>
    %105 = vector.shape_cast %104 : vector<1x32x64xf32> to vector<32x64xf32>
    %c0_42 = arith.constant 0 : index
    %c0_43 = arith.constant 0 : index
    %c0_44 = arith.constant 0 : index
    %106 = vector.load %arg10[%c0_42, %c0_43, %c0_44] : memref<2x1x64xf32, #tpu.memory_space<vmem>>, vector<1x1x64xf32>
    %107 = vector.shape_cast %106 : vector<1x1x64xf32> to vector<1x64xf32>
    %c0_45 = arith.constant 0 : index
    %c0_46 = arith.constant 0 : index
    %c0_47 = arith.constant 0 : index
    %108 = vector.load %arg8[%c0_45, %c0_46, %c0_47] : memref<2x64x32xf32, #tpu.memory_space<vmem>>, vector<1x64x32xf32>
    %109 = vector.shape_cast %108 : vector<1x64x32xf32> to vector<64x32xf32>
    %110 = vector.extract_strided_slice %3 {offsets = [1, 0], sizes = [1, 32], strides = [1, 1]} : vector<14x32xf32> to vector<1x32xf32>
    %cst_48 = arith.constant dense<0.000000e+00> : vector<16x64xf32>
    %111 = tpu.matmul %103, %105, %cst_48 {dimension_numbers = #tpu.dot_dimension_numbers<[1], [0], [0], [1], [0, 0, 1, 1], [], []>} : vector<16x32xf32>, vector<32x64xf32>, vector<16x64xf32> -> vector<16x64xf32>
    %112 = vector.broadcast %107 : vector<1x64xf32> to vector<16x64xf32>
    %113 = arith.addf %111, %112 : vector<16x64xf32>
    %cst_49 = arith.constant 0.000000e+00 : f32
    %114 = vector.broadcast %cst_49 : f32 to vector<16x64xf32>
    %115 = arith.maximumf %113, %114 : vector<16x64xf32>
    %cst_50 = arith.constant dense<0.000000e+00> : vector<16x32xf32>
    %116 = tpu.matmul %115, %109, %cst_50 {dimension_numbers = #tpu.dot_dimension_numbers<[1], [0], [0], [1], [0, 0, 1, 1], [], []>} : vector<16x64xf32>, vector<64x32xf32>, vector<16x32xf32> -> vector<16x32xf32>
    %117 = vector.broadcast %110 : vector<1x32xf32> to vector<16x32xf32>
    %118 = arith.addf %116, %117 : vector<16x32xf32>
    %119 = arith.addf %80, %118 : vector<16x32xf32>
    %120 = vector.extract_strided_slice %3 {offsets = [8, 0], sizes = [1, 32], strides = [1, 1]} : vector<14x32xf32> to vector<1x32xf32>
    %121 = vector.extract_strided_slice %3 {offsets = [9, 0], sizes = [1, 32], strides = [1, 1]} : vector<14x32xf32> to vector<1x32xf32>
    %cst_51 = arith.constant dense<0.000000e+00> : vector<16xf32>
    %122 = vector.multi_reduction <add>, %119, %cst_51 [1] : vector<16x32xf32> to vector<16xf32>
    %123 = vector.shape_cast %122 : vector<16xf32> to vector<16x1xf32>
    %cst_52 = arith.constant 3.200000e+01 : f32
    %124 = vector.broadcast %cst_52 : f32 to vector<16x1xf32>
    %125 = arith.divf %123, %124 : vector<16x1xf32>
    %126 = vector.broadcast %125 : vector<16x1xf32> to vector<16x32xf32>
    %127 = arith.subf %119, %126 : vector<16x32xf32>
    %128 = arith.mulf %127, %127 : vector<16x32xf32>
    %cst_53 = arith.constant dense<0.000000e+00> : vector<16xf32>
    %129 = vector.multi_reduction <add>, %128, %cst_53 [1] : vector<16x32xf32> to vector<16xf32>
    %130 = vector.shape_cast %129 : vector<16xf32> to vector<16x1xf32>
    %cst_54 = arith.constant 0.0322580636 : f32
    %131 = vector.broadcast %cst_54 : f32 to vector<16x1xf32>
    %132 = arith.mulf %130, %131 : vector<16x1xf32>
    %133 = math.sqrt %132 : vector<16x1xf32>
    %cst_55 = arith.constant 9.99999997E-7 : f32
    %134 = vector.broadcast %cst_55 : f32 to vector<16x1xf32>
    %135 = arith.addf %133, %134 : vector<16x1xf32>
    %136 = tpu.reciprocal %135 {approx = true} : vector<16x1xf32> -> vector<16x1xf32>
    %137 = vector.broadcast %136 : vector<16x1xf32> to vector<16x32xf32>
    %138 = arith.mulf %127, %137 : vector<16x32xf32>
    %139 = vector.broadcast %120 : vector<1x32xf32> to vector<16x32xf32>
    %140 = arith.mulf %139, %138 : vector<16x32xf32>
    %141 = vector.broadcast %121 : vector<1x32xf32> to vector<16x32xf32>
    %142 = arith.addf %140, %141 : vector<16x32xf32>
    %c1 = arith.constant 1 : index
    %c0_56 = arith.constant 0 : index
    %c0_57 = arith.constant 0 : index
    %143 = vector.load %arg5[%c1, %c0_56, %c0_57] : memref<2x32x96xf32, #tpu.memory_space<vmem>>, vector<1x32x96xf32>
    %144 = vector.shape_cast %143 : vector<1x32x96xf32> to vector<32x96xf32>
    %cst_58 = arith.constant dense<0.000000e+00> : vector<16x96xf32>
    %145 = tpu.matmul %142, %144, %cst_58 {dimension_numbers = #tpu.dot_dimension_numbers<[1], [0], [0], [1], [0, 0, 1, 1], [], []>} : vector<16x32xf32>, vector<32x96xf32>, vector<16x96xf32> -> vector<16x96xf32>
    %c1_59 = arith.constant 1 : index
    %c0_60 = arith.constant 0 : index
    %c0_61 = arith.constant 0 : index
    %146 = vector.load %arg9[%c1_59, %c0_60, %c0_61] : memref<2x1x96xf32, #tpu.memory_space<vmem>>, vector<1x1x96xf32>
    %147 = vector.shape_cast %146 : vector<1x1x96xf32> to vector<1x96xf32>
    %148 = vector.broadcast %147 : vector<1x96xf32> to vector<16x96xf32>
    %149 = arith.addf %145, %148 : vector<16x96xf32>
    %150 = vector.extract_strided_slice %149 {offsets = [0, 0], sizes = [16, 32], strides = [1, 1]} : vector<16x96xf32> to vector<16x32xf32>
    %151 = vector.extract_strided_slice %149 {offsets = [0, 32], sizes = [16, 32], strides = [1, 1]} : vector<16x96xf32> to vector<16x32xf32>
    %152 = vector.extract_strided_slice %149 {offsets = [0, 64], sizes = [16, 32], strides = [1, 1]} : vector<16x96xf32> to vector<16x32xf32>
    %c1_62 = arith.constant 1 : index
    %c0_63 = arith.constant 0 : index
    %c0_64 = arith.constant 0 : index
    %153 = vector.load %arg6[%c1_62, %c0_63, %c0_64] : memref<2x32x32xf32, #tpu.memory_space<vmem>>, vector<1x32x32xf32>
    %154 = vector.shape_cast %153 : vector<1x32x32xf32> to vector<32x32xf32>
    %155 = vector.extract_strided_slice %3 {offsets = [6, 0], sizes = [1, 32], strides = [1, 1]} : vector<14x32xf32> to vector<1x32xf32>
    %156 = vector.shape_cast %150 : vector<16x32xf32> to vector<2x8x32xf32>
    %157 = vector.shape_cast %151 : vector<16x32xf32> to vector<2x8x32xf32>
    %158 = vector.shape_cast %152 : vector<16x32xf32> to vector<2x8x32xf32>
    %159 = tpu.concatenate %156, %156, %156, %156 in 0 : vector<2x8x32xf32>, vector<2x8x32xf32>, vector<2x8x32xf32>, vector<2x8x32xf32> -> vector<8x8x32xf32>
    %160 = tpu.concatenate %157, %157, %157, %157 in 0 : vector<2x8x32xf32>, vector<2x8x32xf32>, vector<2x8x32xf32>, vector<2x8x32xf32> -> vector<8x8x32xf32>
    %161 = vector.broadcast %0 : vector<8x1x32xf32> to vector<8x8x32xf32>
    %162 = arith.mulf %160, %161 : vector<8x8x32xf32>
    %163 = tpu.concatenate %158, %158, %158, %158 in 0 : vector<2x8x32xf32>, vector<2x8x32xf32>, vector<2x8x32xf32>, vector<2x8x32xf32> -> vector<8x8x32xf32>
    %164 = vector.broadcast %0 : vector<8x1x32xf32> to vector<8x8x32xf32>
    %165 = arith.mulf %163, %164 : vector<8x8x32xf32>
    %166 = tpu.concatenate %1, %1, %1, %1 in 0 : vector<2x1x8xf32>, vector<2x1x8xf32>, vector<2x1x8xf32>, vector<2x1x8xf32> -> vector<8x1x8xf32>
    "tpu.trace_start"() <{level = 10 : i32, message = "zqd,zkd->zqk"}> : () -> ()
    %cst_65 = arith.constant dense<0.000000e+00> : vector<8x8x8xf32>
    %167 = tpu.matmul %159, %162, %cst_65 {dimension_numbers = #tpu.dot_dimension_numbers<[2], [2], [1], [1], [0, 0, 0, 1, 1, 1], [0], [0]>} : vector<8x8x32xf32>, vector<8x8x32xf32>, vector<8x8x8xf32> -> vector<8x8x8xf32>
    "tpu.trace_stop"() : () -> ()
    %cst_66 = arith.constant 0.353553385 : f32
    %168 = vector.broadcast %cst_66 : f32 to vector<8x8x8xf32>
    %169 = arith.mulf %167, %168 : vector<8x8x8xf32>
    %170 = vector.broadcast %166 : vector<8x1x8xf32> to vector<8x8x8xf32>
    %171 = arith.addf %169, %170 : vector<8x8x8xf32>
    %cst_67 = arith.constant dense<0xFF800000> : vector<8x8xf32>
    %172 = vector.multi_reduction <maximumf>, %171, %cst_67 [2] : vector<8x8x8xf32> to vector<8x8xf32>
    %173 = vector.shape_cast %172 : vector<8x8xf32> to vector<8x8x1xf32>
    %174 = vector.broadcast %173 : vector<8x8x1xf32> to vector<8x8x8xf32>
    %175 = arith.subf %171, %174 : vector<8x8x8xf32>
    %176 = math.exp %175 : vector<8x8x8xf32>
    %cst_68 = arith.constant dense<0.000000e+00> : vector<8x8xf32>
    %177 = vector.multi_reduction <add>, %176, %cst_68 [2] : vector<8x8x8xf32> to vector<8x8xf32>
    %178 = vector.shape_cast %177 : vector<8x8xf32> to vector<8x8x1xf32>
    %179 = tpu.reciprocal %178 {approx = true} : vector<8x8x1xf32> -> vector<8x8x1xf32>
    %180 = vector.broadcast %179 : vector<8x8x1xf32> to vector<8x8x8xf32>
    %181 = arith.mulf %176, %180 : vector<8x8x8xf32>
    "tpu.trace_start"() <{level = 10 : i32, message = "zqk,zkd->zqd"}> : () -> ()
    %cst_69 = arith.constant dense<0.000000e+00> : vector<8x8x32xf32>
    %182 = tpu.matmul %181, %165, %cst_69 {dimension_numbers = #tpu.dot_dimension_numbers<[2], [1], [1], [2], [0, 0, 0, 1, 1, 2], [0], [0]>} : vector<8x8x8xf32>, vector<8x8x32xf32>, vector<8x8x32xf32> -> vector<8x8x32xf32>
    "tpu.trace_stop"() : () -> ()
    %183 = vector.extract_strided_slice %182 {offsets = [0, 0, 0], sizes = [2, 8, 32], strides = [1, 1, 1]} : vector<8x8x32xf32> to vector<2x8x32xf32>
    %184 = vector.extract_strided_slice %182 {offsets = [2, 0, 0], sizes = [2, 8, 32], strides = [1, 1, 1]} : vector<8x8x32xf32> to vector<2x8x32xf32>
    %185 = arith.addf %183, %184 : vector<2x8x32xf32>
    %186 = vector.extract_strided_slice %182 {offsets = [4, 0, 0], sizes = [2, 8, 32], strides = [1, 1, 1]} : vector<8x8x32xf32> to vector<2x8x32xf32>
    %187 = arith.addf %185, %186 : vector<2x8x32xf32>
    %188 = vector.extract_strided_slice %182 {offsets = [6, 0, 0], sizes = [2, 8, 32], strides = [1, 1, 1]} : vector<8x8x32xf32> to vector<2x8x32xf32>
    %189 = arith.addf %187, %188 : vector<2x8x32xf32>
    %190 = vector.shape_cast %189 : vector<2x8x32xf32> to vector<16x32xf32>
    %cst_70 = arith.constant dense<0.000000e+00> : vector<16x32xf32>
    %191 = tpu.matmul %190, %154, %cst_70 {dimension_numbers = #tpu.dot_dimension_numbers<[1], [0], [0], [1], [0, 0, 1, 1], [], []>} : vector<16x32xf32>, vector<32x32xf32>, vector<16x32xf32> -> vector<16x32xf32>
    %192 = vector.broadcast %155 : vector<1x32xf32> to vector<16x32xf32>
    %193 = arith.addf %191, %192 : vector<16x32xf32>
    %194 = arith.addf %119, %193 : vector<16x32xf32>
    %195 = vector.extract_strided_slice %3 {offsets = [10, 0], sizes = [1, 32], strides = [1, 1]} : vector<14x32xf32> to vector<1x32xf32>
    %196 = vector.extract_strided_slice %3 {offsets = [11, 0], sizes = [1, 32], strides = [1, 1]} : vector<14x32xf32> to vector<1x32xf32>
    %cst_71 = arith.constant dense<0.000000e+00> : vector<16xf32>
    %197 = vector.multi_reduction <add>, %194, %cst_71 [1] : vector<16x32xf32> to vector<16xf32>
    %198 = vector.shape_cast %197 : vector<16xf32> to vector<16x1xf32>
    %cst_72 = arith.constant 3.200000e+01 : f32
    %199 = vector.broadcast %cst_72 : f32 to vector<16x1xf32>
    %200 = arith.divf %198, %199 : vector<16x1xf32>
    %201 = vector.broadcast %200 : vector<16x1xf32> to vector<16x32xf32>
    %202 = arith.subf %194, %201 : vector<16x32xf32>
    %203 = arith.mulf %202, %202 : vector<16x32xf32>
    %cst_73 = arith.constant dense<0.000000e+00> : vector<16xf32>
    %204 = vector.multi_reduction <add>, %203, %cst_73 [1] : vector<16x32xf32> to vector<16xf32>
    %205 = vector.shape_cast %204 : vector<16xf32> to vector<16x1xf32>
    %cst_74 = arith.constant 0.0322580636 : f32
    %206 = vector.broadcast %cst_74 : f32 to vector<16x1xf32>
    %207 = arith.mulf %205, %206 : vector<16x1xf32>
    %208 = math.sqrt %207 : vector<16x1xf32>
    %cst_75 = arith.constant 9.99999997E-7 : f32
    %209 = vector.broadcast %cst_75 : f32 to vector<16x1xf32>
    %210 = arith.addf %208, %209 : vector<16x1xf32>
    %211 = tpu.reciprocal %210 {approx = true} : vector<16x1xf32> -> vector<16x1xf32>
    %212 = vector.broadcast %211 : vector<16x1xf32> to vector<16x32xf32>
    %213 = arith.mulf %202, %212 : vector<16x32xf32>
    %214 = vector.broadcast %195 : vector<1x32xf32> to vector<16x32xf32>
    %215 = arith.mulf %214, %213 : vector<16x32xf32>
    %216 = vector.broadcast %196 : vector<1x32xf32> to vector<16x32xf32>
    %217 = arith.addf %215, %216 : vector<16x32xf32>
    %c1_76 = arith.constant 1 : index
    %c0_77 = arith.constant 0 : index
    %c0_78 = arith.constant 0 : index
    %218 = vector.load %arg7[%c1_76, %c0_77, %c0_78] : memref<2x32x64xf32, #tpu.memory_space<vmem>>, vector<1x32x64xf32>
    %219 = vector.shape_cast %218 : vector<1x32x64xf32> to vector<32x64xf32>
    %c1_79 = arith.constant 1 : index
    %c0_80 = arith.constant 0 : index
    %c0_81 = arith.constant 0 : index
    %220 = vector.load %arg10[%c1_79, %c0_80, %c0_81] : memref<2x1x64xf32, #tpu.memory_space<vmem>>, vector<1x1x64xf32>
    %221 = vector.shape_cast %220 : vector<1x1x64xf32> to vector<1x64xf32>
    %c1_82 = arith.constant 1 : index
    %c0_83 = arith.constant 0 : index
    %c0_84 = arith.constant 0 : index
    %222 = vector.load %arg8[%c1_82, %c0_83, %c0_84] : memref<2x64x32xf32, #tpu.memory_space<vmem>>, vector<1x64x32xf32>
    %223 = vector.shape_cast %222 : vector<1x64x32xf32> to vector<64x32xf32>
    %224 = vector.extract_strided_slice %3 {offsets = [7, 0], sizes = [1, 32], strides = [1, 1]} : vector<14x32xf32> to vector<1x32xf32>
    %cst_85 = arith.constant dense<0.000000e+00> : vector<16x64xf32>
    %225 = tpu.matmul %217, %219, %cst_85 {dimension_numbers = #tpu.dot_dimension_numbers<[1], [0], [0], [1], [0, 0, 1, 1], [], []>} : vector<16x32xf32>, vector<32x64xf32>, vector<16x64xf32> -> vector<16x64xf32>
    %226 = vector.broadcast %221 : vector<1x64xf32> to vector<16x64xf32>
    %227 = arith.addf %225, %226 : vector<16x64xf32>
    %cst_86 = arith.constant 0.000000e+00 : f32
    %228 = vector.broadcast %cst_86 : f32 to vector<16x64xf32>
    %229 = arith.maximumf %227, %228 : vector<16x64xf32>
    %cst_87 = arith.constant dense<0.000000e+00> : vector<16x32xf32>
    %230 = tpu.matmul %229, %223, %cst_87 {dimension_numbers = #tpu.dot_dimension_numbers<[1], [0], [0], [1], [0, 0, 1, 1], [], []>} : vector<16x64xf32>, vector<64x32xf32>, vector<16x32xf32> -> vector<16x32xf32>
    %231 = vector.broadcast %224 : vector<1x32xf32> to vector<16x32xf32>
    %232 = arith.addf %230, %231 : vector<16x32xf32>
    %233 = arith.addf %194, %232 : vector<16x32xf32>
    %234 = vector.extract_strided_slice %3 {offsets = [12, 0], sizes = [1, 32], strides = [1, 1]} : vector<14x32xf32> to vector<1x32xf32>
    %235 = vector.extract_strided_slice %3 {offsets = [13, 0], sizes = [1, 32], strides = [1, 1]} : vector<14x32xf32> to vector<1x32xf32>
    %cst_88 = arith.constant dense<0.000000e+00> : vector<16xf32>
    %236 = vector.multi_reduction <add>, %233, %cst_88 [1] : vector<16x32xf32> to vector<16xf32>
    %237 = vector.shape_cast %236 : vector<16xf32> to vector<16x1xf32>
    %cst_89 = arith.constant 3.200000e+01 : f32
    %238 = vector.broadcast %cst_89 : f32 to vector<16x1xf32>
    %239 = arith.divf %237, %238 : vector<16x1xf32>
    %240 = vector.broadcast %239 : vector<16x1xf32> to vector<16x32xf32>
    %241 = arith.subf %233, %240 : vector<16x32xf32>
    %242 = arith.mulf %241, %241 : vector<16x32xf32>
    %cst_90 = arith.constant dense<0.000000e+00> : vector<16xf32>
    %243 = vector.multi_reduction <add>, %242, %cst_90 [1] : vector<16x32xf32> to vector<16xf32>
    %244 = vector.shape_cast %243 : vector<16xf32> to vector<16x1xf32>
    %cst_91 = arith.constant 0.0322580636 : f32
    %245 = vector.broadcast %cst_91 : f32 to vector<16x1xf32>
    %246 = arith.mulf %244, %245 : vector<16x1xf32>
    %247 = math.sqrt %246 : vector<16x1xf32>
    %cst_92 = arith.constant 9.99999997E-7 : f32
    %248 = vector.broadcast %cst_92 : f32 to vector<16x1xf32>
    %249 = arith.addf %247, %248 : vector<16x1xf32>
    %250 = tpu.reciprocal %249 {approx = true} : vector<16x1xf32> -> vector<16x1xf32>
    %251 = vector.broadcast %250 : vector<16x1xf32> to vector<16x32xf32>
    %252 = arith.mulf %241, %251 : vector<16x32xf32>
    %253 = vector.broadcast %234 : vector<1x32xf32> to vector<16x32xf32>
    %254 = arith.mulf %253, %252 : vector<16x32xf32>
    %255 = vector.broadcast %235 : vector<1x32xf32> to vector<16x32xf32>
    %256 = arith.addf %254, %255 : vector<16x32xf32>
    %c0_93 = arith.constant 0 : index
    %c0_94 = arith.constant 0 : index
    %257 = vector.load %arg1[%c0_93, %c0_94] : memref<16x32xf32, #tpu.memory_space<vmem>>, vector<16x32xf32>
    %258 = vector.extract_strided_slice %4 {offsets = [4, 0], sizes = [1, 32], strides = [1, 1]} : vector<22x32xf32> to vector<1x32xf32>
    %259 = vector.extract_strided_slice %4 {offsets = [5, 0], sizes = [1, 32], strides = [1, 1]} : vector<22x32xf32> to vector<1x32xf32>
    %cst_95 = arith.constant dense<0.000000e+00> : vector<16xf32>
    %260 = vector.multi_reduction <add>, %257, %cst_95 [1] : vector<16x32xf32> to vector<16xf32>
    %261 = vector.shape_cast %260 : vector<16xf32> to vector<16x1xf32>
    %cst_96 = arith.constant 3.200000e+01 : f32
    %262 = vector.broadcast %cst_96 : f32 to vector<16x1xf32>
    %263 = arith.divf %261, %262 : vector<16x1xf32>
    %264 = vector.broadcast %263 : vector<16x1xf32> to vector<16x32xf32>
    %265 = arith.subf %257, %264 : vector<16x32xf32>
    %266 = arith.mulf %265, %265 : vector<16x32xf32>
    %cst_97 = arith.constant dense<0.000000e+00> : vector<16xf32>
    %267 = vector.multi_reduction <add>, %266, %cst_97 [1] : vector<16x32xf32> to vector<16xf32>
    %268 = vector.shape_cast %267 : vector<16xf32> to vector<16x1xf32>
    %cst_98 = arith.constant 0.0322580636 : f32
    %269 = vector.broadcast %cst_98 : f32 to vector<16x1xf32>
    %270 = arith.mulf %268, %269 : vector<16x1xf32>
    %271 = math.sqrt %270 : vector<16x1xf32>
    %cst_99 = arith.constant 9.99999997E-7 : f32
    %272 = vector.broadcast %cst_99 : f32 to vector<16x1xf32>
    %273 = arith.addf %271, %272 : vector<16x1xf32>
    %274 = tpu.reciprocal %273 {approx = true} : vector<16x1xf32> -> vector<16x1xf32>
    %275 = vector.broadcast %274 : vector<16x1xf32> to vector<16x32xf32>
    %276 = arith.mulf %265, %275 : vector<16x32xf32>
    %277 = vector.broadcast %258 : vector<1x32xf32> to vector<16x32xf32>
    %278 = arith.mulf %277, %276 : vector<16x32xf32>
    %279 = vector.broadcast %259 : vector<1x32xf32> to vector<16x32xf32>
    %280 = arith.addf %278, %279 : vector<16x32xf32>
    %c0_100 = arith.constant 0 : index
    %c0_101 = arith.constant 0 : index
    %c0_102 = arith.constant 0 : index
    %281 = vector.load %arg12[%c0_100, %c0_101, %c0_102] : memref<2x32x96xf32, #tpu.memory_space<vmem>>, vector<1x32x96xf32>
    %282 = vector.shape_cast %281 : vector<1x32x96xf32> to vector<32x96xf32>
    %cst_103 = arith.constant dense<0.000000e+00> : vector<16x96xf32>
    %283 = tpu.matmul %280, %282, %cst_103 {dimension_numbers = #tpu.dot_dimension_numbers<[1], [0], [0], [1], [0, 0, 1, 1], [], []>} : vector<16x32xf32>, vector<32x96xf32>, vector<16x96xf32> -> vector<16x96xf32>
    %c0_104 = arith.constant 0 : index
    %c0_105 = arith.constant 0 : index
    %c0_106 = arith.constant 0 : index
    %284 = vector.load %arg19[%c0_104, %c0_105, %c0_106] : memref<2x1x96xf32, #tpu.memory_space<vmem>>, vector<1x1x96xf32>
    %285 = vector.shape_cast %284 : vector<1x1x96xf32> to vector<1x96xf32>
    %286 = vector.broadcast %285 : vector<1x96xf32> to vector<16x96xf32>
    %287 = arith.addf %283, %286 : vector<16x96xf32>
    %288 = vector.extract_strided_slice %287 {offsets = [0, 0], sizes = [16, 32], strides = [1, 1]} : vector<16x96xf32> to vector<16x32xf32>
    %289 = vector.extract_strided_slice %287 {offsets = [0, 32], sizes = [16, 32], strides = [1, 1]} : vector<16x96xf32> to vector<16x32xf32>
    %290 = vector.extract_strided_slice %287 {offsets = [0, 64], sizes = [16, 32], strides = [1, 1]} : vector<16x96xf32> to vector<16x32xf32>
    %c0_107 = arith.constant 0 : index
    %c0_108 = arith.constant 0 : index
    %c0_109 = arith.constant 0 : index
    %291 = vector.load %arg13[%c0_107, %c0_108, %c0_109] : memref<2x32x32xf32, #tpu.memory_space<vmem>>, vector<1x32x32xf32>
    %292 = vector.shape_cast %291 : vector<1x32x32xf32> to vector<32x32xf32>
    %293 = vector.extract_strided_slice %4 {offsets = [0, 0], sizes = [1, 32], strides = [1, 1]} : vector<22x32xf32> to vector<1x32xf32>
    %294 = vector.shape_cast %288 : vector<16x32xf32> to vector<2x8x32xf32>
    %295 = vector.shape_cast %289 : vector<16x32xf32> to vector<2x8x32xf32>
    %296 = vector.shape_cast %290 : vector<16x32xf32> to vector<2x8x32xf32>
    %297 = tpu.concatenate %294, %294, %294, %294 in 0 : vector<2x8x32xf32>, vector<2x8x32xf32>, vector<2x8x32xf32>, vector<2x8x32xf32> -> vector<8x8x32xf32>
    %298 = tpu.concatenate %295, %295, %295, %295 in 0 : vector<2x8x32xf32>, vector<2x8x32xf32>, vector<2x8x32xf32>, vector<2x8x32xf32> -> vector<8x8x32xf32>
    %299 = vector.broadcast %0 : vector<8x1x32xf32> to vector<8x8x32xf32>
    %300 = arith.mulf %298, %299 : vector<8x8x32xf32>
    %301 = tpu.concatenate %296, %296, %296, %296 in 0 : vector<2x8x32xf32>, vector<2x8x32xf32>, vector<2x8x32xf32>, vector<2x8x32xf32> -> vector<8x8x32xf32>
    %302 = vector.broadcast %0 : vector<8x1x32xf32> to vector<8x8x32xf32>
    %303 = arith.mulf %301, %302 : vector<8x8x32xf32>
    %304 = tpu.concatenate %2, %2, %2, %2 in 0 : vector<2x8x8xf32>, vector<2x8x8xf32>, vector<2x8x8xf32>, vector<2x8x8xf32> -> vector<8x8x8xf32>
    "tpu.trace_start"() <{level = 10 : i32, message = "zqd,zkd->zqk"}> : () -> ()
    %cst_110 = arith.constant dense<0.000000e+00> : vector<8x8x8xf32>
    %305 = tpu.matmul %297, %300, %cst_110 {dimension_numbers = #tpu.dot_dimension_numbers<[2], [2], [1], [1], [0, 0, 0, 1, 1, 1], [0], [0]>} : vector<8x8x32xf32>, vector<8x8x32xf32>, vector<8x8x8xf32> -> vector<8x8x8xf32>
    "tpu.trace_stop"() : () -> ()
    %cst_111 = arith.constant 0.353553385 : f32
    %306 = vector.broadcast %cst_111 : f32 to vector<8x8x8xf32>
    %307 = arith.mulf %305, %306 : vector<8x8x8xf32>
    %308 = arith.addf %307, %304 : vector<8x8x8xf32>
    %cst_112 = arith.constant dense<0xFF800000> : vector<8x8xf32>
    %309 = vector.multi_reduction <maximumf>, %308, %cst_112 [2] : vector<8x8x8xf32> to vector<8x8xf32>
    %310 = vector.shape_cast %309 : vector<8x8xf32> to vector<8x8x1xf32>
    %311 = vector.broadcast %310 : vector<8x8x1xf32> to vector<8x8x8xf32>
    %312 = arith.subf %308, %311 : vector<8x8x8xf32>
    %313 = math.exp %312 : vector<8x8x8xf32>
    %cst_113 = arith.constant dense<0.000000e+00> : vector<8x8xf32>
    %314 = vector.multi_reduction <add>, %313, %cst_113 [2] : vector<8x8x8xf32> to vector<8x8xf32>
    %315 = vector.shape_cast %314 : vector<8x8xf32> to vector<8x8x1xf32>
    %316 = tpu.reciprocal %315 {approx = true} : vector<8x8x1xf32> -> vector<8x8x1xf32>
    %317 = vector.broadcast %316 : vector<8x8x1xf32> to vector<8x8x8xf32>
    %318 = arith.mulf %313, %317 : vector<8x8x8xf32>
    "tpu.trace_start"() <{level = 10 : i32, message = "zqk,zkd->zqd"}> : () -> ()
    %cst_114 = arith.constant dense<0.000000e+00> : vector<8x8x32xf32>
    %319 = tpu.matmul %318, %303, %cst_114 {dimension_numbers = #tpu.dot_dimension_numbers<[2], [1], [1], [2], [0, 0, 0, 1, 1, 2], [0], [0]>} : vector<8x8x8xf32>, vector<8x8x32xf32>, vector<8x8x32xf32> -> vector<8x8x32xf32>
    "tpu.trace_stop"() : () -> ()
    %320 = vector.extract_strided_slice %319 {offsets = [0, 0, 0], sizes = [2, 8, 32], strides = [1, 1, 1]} : vector<8x8x32xf32> to vector<2x8x32xf32>
    %321 = vector.extract_strided_slice %319 {offsets = [2, 0, 0], sizes = [2, 8, 32], strides = [1, 1, 1]} : vector<8x8x32xf32> to vector<2x8x32xf32>
    %322 = arith.addf %320, %321 : vector<2x8x32xf32>
    %323 = vector.extract_strided_slice %319 {offsets = [4, 0, 0], sizes = [2, 8, 32], strides = [1, 1, 1]} : vector<8x8x32xf32> to vector<2x8x32xf32>
    %324 = arith.addf %322, %323 : vector<2x8x32xf32>
    %325 = vector.extract_strided_slice %319 {offsets = [6, 0, 0], sizes = [2, 8, 32], strides = [1, 1, 1]} : vector<8x8x32xf32> to vector<2x8x32xf32>
    %326 = arith.addf %324, %325 : vector<2x8x32xf32>
    %327 = vector.shape_cast %326 : vector<2x8x32xf32> to vector<16x32xf32>
    %cst_115 = arith.constant dense<0.000000e+00> : vector<16x32xf32>
    %328 = tpu.matmul %327, %292, %cst_115 {dimension_numbers = #tpu.dot_dimension_numbers<[1], [0], [0], [1], [0, 0, 1, 1], [], []>} : vector<16x32xf32>, vector<32x32xf32>, vector<16x32xf32> -> vector<16x32xf32>
    %329 = vector.broadcast %293 : vector<1x32xf32> to vector<16x32xf32>
    %330 = arith.addf %328, %329 : vector<16x32xf32>
    %331 = arith.addf %257, %330 : vector<16x32xf32>
    %332 = vector.extract_strided_slice %4 {offsets = [6, 0], sizes = [1, 32], strides = [1, 1]} : vector<22x32xf32> to vector<1x32xf32>
    %333 = vector.extract_strided_slice %4 {offsets = [7, 0], sizes = [1, 32], strides = [1, 1]} : vector<22x32xf32> to vector<1x32xf32>
    %cst_116 = arith.constant dense<0.000000e+00> : vector<16xf32>
    %334 = vector.multi_reduction <add>, %331, %cst_116 [1] : vector<16x32xf32> to vector<16xf32>
    %335 = vector.shape_cast %334 : vector<16xf32> to vector<16x1xf32>
    %cst_117 = arith.constant 3.200000e+01 : f32
    %336 = vector.broadcast %cst_117 : f32 to vector<16x1xf32>
    %337 = arith.divf %335, %336 : vector<16x1xf32>
    %338 = vector.broadcast %337 : vector<16x1xf32> to vector<16x32xf32>
    %339 = arith.subf %331, %338 : vector<16x32xf32>
    %340 = arith.mulf %339, %339 : vector<16x32xf32>
    %cst_118 = arith.constant dense<0.000000e+00> : vector<16xf32>
    %341 = vector.multi_reduction <add>, %340, %cst_118 [1] : vector<16x32xf32> to vector<16xf32>
    %342 = vector.shape_cast %341 : vector<16xf32> to vector<16x1xf32>
    %cst_119 = arith.constant 0.0322580636 : f32
    %343 = vector.broadcast %cst_119 : f32 to vector<16x1xf32>
    %344 = arith.mulf %342, %343 : vector<16x1xf32>
    %345 = math.sqrt %344 : vector<16x1xf32>
    %cst_120 = arith.constant 9.99999997E-7 : f32
    %346 = vector.broadcast %cst_120 : f32 to vector<16x1xf32>
    %347 = arith.addf %345, %346 : vector<16x1xf32>
    %348 = tpu.reciprocal %347 {approx = true} : vector<16x1xf32> -> vector<16x1xf32>
    %349 = vector.broadcast %348 : vector<16x1xf32> to vector<16x32xf32>
    %350 = arith.mulf %339, %349 : vector<16x32xf32>
    %351 = vector.broadcast %332 : vector<1x32xf32> to vector<16x32xf32>
    %352 = arith.mulf %351, %350 : vector<16x32xf32>
    %353 = vector.broadcast %333 : vector<1x32xf32> to vector<16x32xf32>
    %354 = arith.addf %352, %353 : vector<16x32xf32>
    %c0_121 = arith.constant 0 : index
    %c0_122 = arith.constant 0 : index
    %c0_123 = arith.constant 0 : index
    %355 = vector.load %arg14[%c0_121, %c0_122, %c0_123] : memref<2x32x32xf32, #tpu.memory_space<vmem>>, vector<1x32x32xf32>
    %356 = vector.shape_cast %355 : vector<1x32x32xf32> to vector<32x32xf32>
    %cst_124 = arith.constant dense<0.000000e+00> : vector<16x32xf32>
    %357 = tpu.matmul %354, %356, %cst_124 {dimension_numbers = #tpu.dot_dimension_numbers<[1], [0], [0], [1], [0, 0, 1, 1], [], []>} : vector<16x32xf32>, vector<32x32xf32>, vector<16x32xf32> -> vector<16x32xf32>
    %358 = vector.extract_strided_slice %4 {offsets = [1, 0], sizes = [1, 32], strides = [1, 1]} : vector<22x32xf32> to vector<1x32xf32>
    %359 = vector.broadcast %358 : vector<1x32xf32> to vector<16x32xf32>
    %360 = arith.addf %357, %359 : vector<16x32xf32>
    %c0_125 = arith.constant 0 : index
    %c0_126 = arith.constant 0 : index
    %c0_127 = arith.constant 0 : index
    %361 = vector.load %arg15[%c0_125, %c0_126, %c0_127] : memref<2x32x64xf32, #tpu.memory_space<vmem>>, vector<1x32x64xf32>
    %362 = vector.shape_cast %361 : vector<1x32x64xf32> to vector<32x64xf32>
    %cst_128 = arith.constant dense<0.000000e+00> : vector<16x64xf32>
    %363 = tpu.matmul %256, %362, %cst_128 {dimension_numbers = #tpu.dot_dimension_numbers<[1], [0], [0], [1], [0, 0, 1, 1], [], []>} : vector<16x32xf32>, vector<32x64xf32>, vector<16x64xf32> -> vector<16x64xf32>
    %c0_129 = arith.constant 0 : index
    %c0_130 = arith.constant 0 : index
    %c0_131 = arith.constant 0 : index
    %364 = vector.load %arg20[%c0_129, %c0_130, %c0_131] : memref<2x1x64xf32, #tpu.memory_space<vmem>>, vector<1x1x64xf32>
    %365 = vector.shape_cast %364 : vector<1x1x64xf32> to vector<1x64xf32>
    %366 = vector.broadcast %365 : vector<1x64xf32> to vector<16x64xf32>
    %367 = arith.addf %363, %366 : vector<16x64xf32>
    %368 = vector.extract_strided_slice %367 {offsets = [0, 0], sizes = [16, 32], strides = [1, 1]} : vector<16x64xf32> to vector<16x32xf32>
    %369 = vector.extract_strided_slice %367 {offsets = [0, 32], sizes = [16, 32], strides = [1, 1]} : vector<16x64xf32> to vector<16x32xf32>
    %c0_132 = arith.constant 0 : index
    %c0_133 = arith.constant 0 : index
    %c0_134 = arith.constant 0 : index
    %370 = vector.load %arg16[%c0_132, %c0_133, %c0_134] : memref<2x32x32xf32, #tpu.memory_space<vmem>>, vector<1x32x32xf32>
    %371 = vector.shape_cast %370 : vector<1x32x32xf32> to vector<32x32xf32>
    %372 = vector.extract_strided_slice %4 {offsets = [2, 0], sizes = [1, 32], strides = [1, 1]} : vector<22x32xf32> to vector<1x32xf32>
    %373 = vector.shape_cast %360 : vector<16x32xf32> to vector<2x8x32xf32>
    %374 = vector.shape_cast %368 : vector<16x32xf32> to vector<2x8x32xf32>
    %375 = vector.shape_cast %369 : vector<16x32xf32> to vector<2x8x32xf32>
    %376 = tpu.concatenate %373, %373, %373, %373 in 0 : vector<2x8x32xf32>, vector<2x8x32xf32>, vector<2x8x32xf32>, vector<2x8x32xf32> -> vector<8x8x32xf32>
    %377 = tpu.concatenate %374, %374, %374, %374 in 0 : vector<2x8x32xf32>, vector<2x8x32xf32>, vector<2x8x32xf32>, vector<2x8x32xf32> -> vector<8x8x32xf32>
    %378 = vector.broadcast %0 : vector<8x1x32xf32> to vector<8x8x32xf32>
    %379 = arith.mulf %377, %378 : vector<8x8x32xf32>
    %380 = tpu.concatenate %375, %375, %375, %375 in 0 : vector<2x8x32xf32>, vector<2x8x32xf32>, vector<2x8x32xf32>, vector<2x8x32xf32> -> vector<8x8x32xf32>
    %381 = vector.broadcast %0 : vector<8x1x32xf32> to vector<8x8x32xf32>
    %382 = arith.mulf %380, %381 : vector<8x8x32xf32>
    %383 = tpu.concatenate %1, %1, %1, %1 in 0 : vector<2x1x8xf32>, vector<2x1x8xf32>, vector<2x1x8xf32>, vector<2x1x8xf32> -> vector<8x1x8xf32>
    "tpu.trace_start"() <{level = 10 : i32, message = "zqd,zkd->zqk"}> : () -> ()
    %cst_135 = arith.constant dense<0.000000e+00> : vector<8x8x8xf32>
    %384 = tpu.matmul %376, %379, %cst_135 {dimension_numbers = #tpu.dot_dimension_numbers<[2], [2], [1], [1], [0, 0, 0, 1, 1, 1], [0], [0]>} : vector<8x8x32xf32>, vector<8x8x32xf32>, vector<8x8x8xf32> -> vector<8x8x8xf32>
    "tpu.trace_stop"() : () -> ()
    %cst_136 = arith.constant 0.353553385 : f32
    %385 = vector.broadcast %cst_136 : f32 to vector<8x8x8xf32>
    %386 = arith.mulf %384, %385 : vector<8x8x8xf32>
    %387 = vector.broadcast %383 : vector<8x1x8xf32> to vector<8x8x8xf32>
    %388 = arith.addf %386, %387 : vector<8x8x8xf32>
    %cst_137 = arith.constant dense<0xFF800000> : vector<8x8xf32>
    %389 = vector.multi_reduction <maximumf>, %388, %cst_137 [2] : vector<8x8x8xf32> to vector<8x8xf32>
    %390 = vector.shape_cast %389 : vector<8x8xf32> to vector<8x8x1xf32>
    %391 = vector.broadcast %390 : vector<8x8x1xf32> to vector<8x8x8xf32>
    %392 = arith.subf %388, %391 : vector<8x8x8xf32>
    %393 = math.exp %392 : vector<8x8x8xf32>
    %cst_138 = arith.constant dense<0.000000e+00> : vector<8x8xf32>
    %394 = vector.multi_reduction <add>, %393, %cst_138 [2] : vector<8x8x8xf32> to vector<8x8xf32>
    %395 = vector.shape_cast %394 : vector<8x8xf32> to vector<8x8x1xf32>
    %396 = tpu.reciprocal %395 {approx = true} : vector<8x8x1xf32> -> vector<8x8x1xf32>
    %397 = vector.broadcast %396 : vector<8x8x1xf32> to vector<8x8x8xf32>
    %398 = arith.mulf %393, %397 : vector<8x8x8xf32>
    "tpu.trace_start"() <{level = 10 : i32, message = "zqk,zkd->zqd"}> : () -> ()
    %cst_139 = arith.constant dense<0.000000e+00> : vector<8x8x32xf32>
    %399 = tpu.matmul %398, %382, %cst_139 {dimension_numbers = #tpu.dot_dimension_numbers<[2], [1], [1], [2], [0, 0, 0, 1, 1, 2], [0], [0]>} : vector<8x8x8xf32>, vector<8x8x32xf32>, vector<8x8x32xf32> -> vector<8x8x32xf32>
    "tpu.trace_stop"() : () -> ()
    %400 = vector.extract_strided_slice %399 {offsets = [0, 0, 0], sizes = [2, 8, 32], strides = [1, 1, 1]} : vector<8x8x32xf32> to vector<2x8x32xf32>
    %401 = vector.extract_strided_slice %399 {offsets = [2, 0, 0], sizes = [2, 8, 32], strides = [1, 1, 1]} : vector<8x8x32xf32> to vector<2x8x32xf32>
    %402 = arith.addf %400, %401 : vector<2x8x32xf32>
    %403 = vector.extract_strided_slice %399 {offsets = [4, 0, 0], sizes = [2, 8, 32], strides = [1, 1, 1]} : vector<8x8x32xf32> to vector<2x8x32xf32>
    %404 = arith.addf %402, %403 : vector<2x8x32xf32>
    %405 = vector.extract_strided_slice %399 {offsets = [6, 0, 0], sizes = [2, 8, 32], strides = [1, 1, 1]} : vector<8x8x32xf32> to vector<2x8x32xf32>
    %406 = arith.addf %404, %405 : vector<2x8x32xf32>
    %407 = vector.shape_cast %406 : vector<2x8x32xf32> to vector<16x32xf32>
    %cst_140 = arith.constant dense<0.000000e+00> : vector<16x32xf32>
    %408 = tpu.matmul %407, %371, %cst_140 {dimension_numbers = #tpu.dot_dimension_numbers<[1], [0], [0], [1], [0, 0, 1, 1], [], []>} : vector<16x32xf32>, vector<32x32xf32>, vector<16x32xf32> -> vector<16x32xf32>
    %409 = vector.broadcast %372 : vector<1x32xf32> to vector<16x32xf32>
    %410 = arith.addf %408, %409 : vector<16x32xf32>
    %411 = arith.addf %331, %410 : vector<16x32xf32>
    %412 = vector.extract_strided_slice %4 {offsets = [8, 0], sizes = [1, 32], strides = [1, 1]} : vector<22x32xf32> to vector<1x32xf32>
    %413 = vector.extract_strided_slice %4 {offsets = [9, 0], sizes = [1, 32], strides = [1, 1]} : vector<22x32xf32> to vector<1x32xf32>
    %cst_141 = arith.constant dense<0.000000e+00> : vector<16xf32>
    %414 = vector.multi_reduction <add>, %411, %cst_141 [1] : vector<16x32xf32> to vector<16xf32>
    %415 = vector.shape_cast %414 : vector<16xf32> to vector<16x1xf32>
    %cst_142 = arith.constant 3.200000e+01 : f32
    %416 = vector.broadcast %cst_142 : f32 to vector<16x1xf32>
    %417 = arith.divf %415, %416 : vector<16x1xf32>
    %418 = vector.broadcast %417 : vector<16x1xf32> to vector<16x32xf32>
    %419 = arith.subf %411, %418 : vector<16x32xf32>
    %420 = arith.mulf %419, %419 : vector<16x32xf32>
    %cst_143 = arith.constant dense<0.000000e+00> : vector<16xf32>
    %421 = vector.multi_reduction <add>, %420, %cst_143 [1] : vector<16x32xf32> to vector<16xf32>
    %422 = vector.shape_cast %421 : vector<16xf32> to vector<16x1xf32>
    %cst_144 = arith.constant 0.0322580636 : f32
    %423 = vector.broadcast %cst_144 : f32 to vector<16x1xf32>
    %424 = arith.mulf %422, %423 : vector<16x1xf32>
    %425 = math.sqrt %424 : vector<16x1xf32>
    %cst_145 = arith.constant 9.99999997E-7 : f32
    %426 = vector.broadcast %cst_145 : f32 to vector<16x1xf32>
    %427 = arith.addf %425, %426 : vector<16x1xf32>
    %428 = tpu.reciprocal %427 {approx = true} : vector<16x1xf32> -> vector<16x1xf32>
    %429 = vector.broadcast %428 : vector<16x1xf32> to vector<16x32xf32>
    %430 = arith.mulf %419, %429 : vector<16x32xf32>
    %431 = vector.broadcast %412 : vector<1x32xf32> to vector<16x32xf32>
    %432 = arith.mulf %431, %430 : vector<16x32xf32>
    %433 = vector.broadcast %413 : vector<1x32xf32> to vector<16x32xf32>
    %434 = arith.addf %432, %433 : vector<16x32xf32>
    %c0_146 = arith.constant 0 : index
    %c0_147 = arith.constant 0 : index
    %c0_148 = arith.constant 0 : index
    %435 = vector.load %arg17[%c0_146, %c0_147, %c0_148] : memref<2x32x64xf32, #tpu.memory_space<vmem>>, vector<1x32x64xf32>
    %436 = vector.shape_cast %435 : vector<1x32x64xf32> to vector<32x64xf32>
    %c0_149 = arith.constant 0 : index
    %c0_150 = arith.constant 0 : index
    %c0_151 = arith.constant 0 : index
    %437 = vector.load %arg21[%c0_149, %c0_150, %c0_151] : memref<2x1x64xf32, #tpu.memory_space<vmem>>, vector<1x1x64xf32>
    %438 = vector.shape_cast %437 : vector<1x1x64xf32> to vector<1x64xf32>
    %c0_152 = arith.constant 0 : index
    %c0_153 = arith.constant 0 : index
    %c0_154 = arith.constant 0 : index
    %439 = vector.load %arg18[%c0_152, %c0_153, %c0_154] : memref<2x64x32xf32, #tpu.memory_space<vmem>>, vector<1x64x32xf32>
    %440 = vector.shape_cast %439 : vector<1x64x32xf32> to vector<64x32xf32>
    %441 = vector.extract_strided_slice %4 {offsets = [3, 0], sizes = [1, 32], strides = [1, 1]} : vector<22x32xf32> to vector<1x32xf32>
    %cst_155 = arith.constant dense<0.000000e+00> : vector<16x64xf32>
    %442 = tpu.matmul %434, %436, %cst_155 {dimension_numbers = #tpu.dot_dimension_numbers<[1], [0], [0], [1], [0, 0, 1, 1], [], []>} : vector<16x32xf32>, vector<32x64xf32>, vector<16x64xf32> -> vector<16x64xf32>
    %443 = vector.broadcast %438 : vector<1x64xf32> to vector<16x64xf32>
    %444 = arith.addf %442, %443 : vector<16x64xf32>
    %cst_156 = arith.constant 0.000000e+00 : f32
    %445 = vector.broadcast %cst_156 : f32 to vector<16x64xf32>
    %446 = arith.maximumf %444, %445 : vector<16x64xf32>
    %cst_157 = arith.constant dense<0.000000e+00> : vector<16x32xf32>
    %447 = tpu.matmul %446, %440, %cst_157 {dimension_numbers = #tpu.dot_dimension_numbers<[1], [0], [0], [1], [0, 0, 1, 1], [], []>} : vector<16x64xf32>, vector<64x32xf32>, vector<16x32xf32> -> vector<16x32xf32>
    %448 = vector.broadcast %441 : vector<1x32xf32> to vector<16x32xf32>
    %449 = arith.addf %447, %448 : vector<16x32xf32>
    %450 = arith.addf %411, %449 : vector<16x32xf32>
    %451 = vector.extract_strided_slice %4 {offsets = [14, 0], sizes = [1, 32], strides = [1, 1]} : vector<22x32xf32> to vector<1x32xf32>
    %452 = vector.extract_strided_slice %4 {offsets = [15, 0], sizes = [1, 32], strides = [1, 1]} : vector<22x32xf32> to vector<1x32xf32>
    %cst_158 = arith.constant dense<0.000000e+00> : vector<16xf32>
    %453 = vector.multi_reduction <add>, %450, %cst_158 [1] : vector<16x32xf32> to vector<16xf32>
    %454 = vector.shape_cast %453 : vector<16xf32> to vector<16x1xf32>
    %cst_159 = arith.constant 3.200000e+01 : f32
    %455 = vector.broadcast %cst_159 : f32 to vector<16x1xf32>
    %456 = arith.divf %454, %455 : vector<16x1xf32>
    %457 = vector.broadcast %456 : vector<16x1xf32> to vector<16x32xf32>
    %458 = arith.subf %450, %457 : vector<16x32xf32>
    %459 = arith.mulf %458, %458 : vector<16x32xf32>
    %cst_160 = arith.constant dense<0.000000e+00> : vector<16xf32>
    %460 = vector.multi_reduction <add>, %459, %cst_160 [1] : vector<16x32xf32> to vector<16xf32>
    %461 = vector.shape_cast %460 : vector<16xf32> to vector<16x1xf32>
    %cst_161 = arith.constant 0.0322580636 : f32
    %462 = vector.broadcast %cst_161 : f32 to vector<16x1xf32>
    %463 = arith.mulf %461, %462 : vector<16x1xf32>
    %464 = math.sqrt %463 : vector<16x1xf32>
    %cst_162 = arith.constant 9.99999997E-7 : f32
    %465 = vector.broadcast %cst_162 : f32 to vector<16x1xf32>
    %466 = arith.addf %464, %465 : vector<16x1xf32>
    %467 = tpu.reciprocal %466 {approx = true} : vector<16x1xf32> -> vector<16x1xf32>
    %468 = vector.broadcast %467 : vector<16x1xf32> to vector<16x32xf32>
    %469 = arith.mulf %458, %468 : vector<16x32xf32>
    %470 = vector.broadcast %451 : vector<1x32xf32> to vector<16x32xf32>
    %471 = arith.mulf %470, %469 : vector<16x32xf32>
    %472 = vector.broadcast %452 : vector<1x32xf32> to vector<16x32xf32>
    %473 = arith.addf %471, %472 : vector<16x32xf32>
    %c1_163 = arith.constant 1 : index
    %c0_164 = arith.constant 0 : index
    %c0_165 = arith.constant 0 : index
    %474 = vector.load %arg12[%c1_163, %c0_164, %c0_165] : memref<2x32x96xf32, #tpu.memory_space<vmem>>, vector<1x32x96xf32>
    %475 = vector.shape_cast %474 : vector<1x32x96xf32> to vector<32x96xf32>
    %cst_166 = arith.constant dense<0.000000e+00> : vector<16x96xf32>
    %476 = tpu.matmul %473, %475, %cst_166 {dimension_numbers = #tpu.dot_dimension_numbers<[1], [0], [0], [1], [0, 0, 1, 1], [], []>} : vector<16x32xf32>, vector<32x96xf32>, vector<16x96xf32> -> vector<16x96xf32>
    %c1_167 = arith.constant 1 : index
    %c0_168 = arith.constant 0 : index
    %c0_169 = arith.constant 0 : index
    %477 = vector.load %arg19[%c1_167, %c0_168, %c0_169] : memref<2x1x96xf32, #tpu.memory_space<vmem>>, vector<1x1x96xf32>
    %478 = vector.shape_cast %477 : vector<1x1x96xf32> to vector<1x96xf32>
    %479 = vector.broadcast %478 : vector<1x96xf32> to vector<16x96xf32>
    %480 = arith.addf %476, %479 : vector<16x96xf32>
    %481 = vector.extract_strided_slice %480 {offsets = [0, 0], sizes = [16, 32], strides = [1, 1]} : vector<16x96xf32> to vector<16x32xf32>
    %482 = vector.extract_strided_slice %480 {offsets = [0, 32], sizes = [16, 32], strides = [1, 1]} : vector<16x96xf32> to vector<16x32xf32>
    %483 = vector.extract_strided_slice %480 {offsets = [0, 64], sizes = [16, 32], strides = [1, 1]} : vector<16x96xf32> to vector<16x32xf32>
    %c1_170 = arith.constant 1 : index
    %c0_171 = arith.constant 0 : index
    %c0_172 = arith.constant 0 : index
    %484 = vector.load %arg13[%c1_170, %c0_171, %c0_172] : memref<2x32x32xf32, #tpu.memory_space<vmem>>, vector<1x32x32xf32>
    %485 = vector.shape_cast %484 : vector<1x32x32xf32> to vector<32x32xf32>
    %486 = vector.extract_strided_slice %4 {offsets = [10, 0], sizes = [1, 32], strides = [1, 1]} : vector<22x32xf32> to vector<1x32xf32>
    %487 = vector.shape_cast %481 : vector<16x32xf32> to vector<2x8x32xf32>
    %488 = vector.shape_cast %482 : vector<16x32xf32> to vector<2x8x32xf32>
    %489 = vector.shape_cast %483 : vector<16x32xf32> to vector<2x8x32xf32>
    %490 = tpu.concatenate %487, %487, %487, %487 in 0 : vector<2x8x32xf32>, vector<2x8x32xf32>, vector<2x8x32xf32>, vector<2x8x32xf32> -> vector<8x8x32xf32>
    %491 = tpu.concatenate %488, %488, %488, %488 in 0 : vector<2x8x32xf32>, vector<2x8x32xf32>, vector<2x8x32xf32>, vector<2x8x32xf32> -> vector<8x8x32xf32>
    %492 = vector.broadcast %0 : vector<8x1x32xf32> to vector<8x8x32xf32>
    %493 = arith.mulf %491, %492 : vector<8x8x32xf32>
    %494 = tpu.concatenate %489, %489, %489, %489 in 0 : vector<2x8x32xf32>, vector<2x8x32xf32>, vector<2x8x32xf32>, vector<2x8x32xf32> -> vector<8x8x32xf32>
    %495 = vector.broadcast %0 : vector<8x1x32xf32> to vector<8x8x32xf32>
    %496 = arith.mulf %494, %495 : vector<8x8x32xf32>
    %497 = tpu.concatenate %2, %2, %2, %2 in 0 : vector<2x8x8xf32>, vector<2x8x8xf32>, vector<2x8x8xf32>, vector<2x8x8xf32> -> vector<8x8x8xf32>
    "tpu.trace_start"() <{level = 10 : i32, message = "zqd,zkd->zqk"}> : () -> ()
    %cst_173 = arith.constant dense<0.000000e+00> : vector<8x8x8xf32>
    %498 = tpu.matmul %490, %493, %cst_173 {dimension_numbers = #tpu.dot_dimension_numbers<[2], [2], [1], [1], [0, 0, 0, 1, 1, 1], [0], [0]>} : vector<8x8x32xf32>, vector<8x8x32xf32>, vector<8x8x8xf32> -> vector<8x8x8xf32>
    "tpu.trace_stop"() : () -> ()
    %cst_174 = arith.constant 0.353553385 : f32
    %499 = vector.broadcast %cst_174 : f32 to vector<8x8x8xf32>
    %500 = arith.mulf %498, %499 : vector<8x8x8xf32>
    %501 = arith.addf %500, %497 : vector<8x8x8xf32>
    %cst_175 = arith.constant dense<0xFF800000> : vector<8x8xf32>
    %502 = vector.multi_reduction <maximumf>, %501, %cst_175 [2] : vector<8x8x8xf32> to vector<8x8xf32>
    %503 = vector.shape_cast %502 : vector<8x8xf32> to vector<8x8x1xf32>
    %504 = vector.broadcast %503 : vector<8x8x1xf32> to vector<8x8x8xf32>
    %505 = arith.subf %501, %504 : vector<8x8x8xf32>
    %506 = math.exp %505 : vector<8x8x8xf32>
    %cst_176 = arith.constant dense<0.000000e+00> : vector<8x8xf32>
    %507 = vector.multi_reduction <add>, %506, %cst_176 [2] : vector<8x8x8xf32> to vector<8x8xf32>
    %508 = vector.shape_cast %507 : vector<8x8xf32> to vector<8x8x1xf32>
    %509 = tpu.reciprocal %508 {approx = true} : vector<8x8x1xf32> -> vector<8x8x1xf32>
    %510 = vector.broadcast %509 : vector<8x8x1xf32> to vector<8x8x8xf32>
    %511 = arith.mulf %506, %510 : vector<8x8x8xf32>
    "tpu.trace_start"() <{level = 10 : i32, message = "zqk,zkd->zqd"}> : () -> ()
    %cst_177 = arith.constant dense<0.000000e+00> : vector<8x8x32xf32>
    %512 = tpu.matmul %511, %496, %cst_177 {dimension_numbers = #tpu.dot_dimension_numbers<[2], [1], [1], [2], [0, 0, 0, 1, 1, 2], [0], [0]>} : vector<8x8x8xf32>, vector<8x8x32xf32>, vector<8x8x32xf32> -> vector<8x8x32xf32>
    "tpu.trace_stop"() : () -> ()
    %513 = vector.extract_strided_slice %512 {offsets = [0, 0, 0], sizes = [2, 8, 32], strides = [1, 1, 1]} : vector<8x8x32xf32> to vector<2x8x32xf32>
    %514 = vector.extract_strided_slice %512 {offsets = [2, 0, 0], sizes = [2, 8, 32], strides = [1, 1, 1]} : vector<8x8x32xf32> to vector<2x8x32xf32>
    %515 = arith.addf %513, %514 : vector<2x8x32xf32>
    %516 = vector.extract_strided_slice %512 {offsets = [4, 0, 0], sizes = [2, 8, 32], strides = [1, 1, 1]} : vector<8x8x32xf32> to vector<2x8x32xf32>
    %517 = arith.addf %515, %516 : vector<2x8x32xf32>
    %518 = vector.extract_strided_slice %512 {offsets = [6, 0, 0], sizes = [2, 8, 32], strides = [1, 1, 1]} : vector<8x8x32xf32> to vector<2x8x32xf32>
    %519 = arith.addf %517, %518 : vector<2x8x32xf32>
    %520 = vector.shape_cast %519 : vector<2x8x32xf32> to vector<16x32xf32>
    %cst_178 = arith.constant dense<0.000000e+00> : vector<16x32xf32>
    %521 = tpu.matmul %520, %485, %cst_178 {dimension_numbers = #tpu.dot_dimension_numbers<[1], [0], [0], [1], [0, 0, 1, 1], [], []>} : vector<16x32xf32>, vector<32x32xf32>, vector<16x32xf32> -> vector<16x32xf32>
    %522 = vector.broadcast %486 : vector<1x32xf32> to vector<16x32xf32>
    %523 = arith.addf %521, %522 : vector<16x32xf32>
    %524 = arith.addf %450, %523 : vector<16x32xf32>
    %525 = vector.extract_strided_slice %4 {offsets = [16, 0], sizes = [1, 32], strides = [1, 1]} : vector<22x32xf32> to vector<1x32xf32>
    %526 = vector.extract_strided_slice %4 {offsets = [17, 0], sizes = [1, 32], strides = [1, 1]} : vector<22x32xf32> to vector<1x32xf32>
    %cst_179 = arith.constant dense<0.000000e+00> : vector<16xf32>
    %527 = vector.multi_reduction <add>, %524, %cst_179 [1] : vector<16x32xf32> to vector<16xf32>
    %528 = vector.shape_cast %527 : vector<16xf32> to vector<16x1xf32>
    %cst_180 = arith.constant 3.200000e+01 : f32
    %529 = vector.broadcast %cst_180 : f32 to vector<16x1xf32>
    %530 = arith.divf %528, %529 : vector<16x1xf32>
    %531 = vector.broadcast %530 : vector<16x1xf32> to vector<16x32xf32>
    %532 = arith.subf %524, %531 : vector<16x32xf32>
    %533 = arith.mulf %532, %532 : vector<16x32xf32>
    %cst_181 = arith.constant dense<0.000000e+00> : vector<16xf32>
    %534 = vector.multi_reduction <add>, %533, %cst_181 [1] : vector<16x32xf32> to vector<16xf32>
    %535 = vector.shape_cast %534 : vector<16xf32> to vector<16x1xf32>
    %cst_182 = arith.constant 0.0322580636 : f32
    %536 = vector.broadcast %cst_182 : f32 to vector<16x1xf32>
    %537 = arith.mulf %535, %536 : vector<16x1xf32>
    %538 = math.sqrt %537 : vector<16x1xf32>
    %cst_183 = arith.constant 9.99999997E-7 : f32
    %539 = vector.broadcast %cst_183 : f32 to vector<16x1xf32>
    %540 = arith.addf %538, %539 : vector<16x1xf32>
    %541 = tpu.reciprocal %540 {approx = true} : vector<16x1xf32> -> vector<16x1xf32>
    %542 = vector.broadcast %541 : vector<16x1xf32> to vector<16x32xf32>
    %543 = arith.mulf %532, %542 : vector<16x32xf32>
    %544 = vector.broadcast %525 : vector<1x32xf32> to vector<16x32xf32>
    %545 = arith.mulf %544, %543 : vector<16x32xf32>
    %546 = vector.broadcast %526 : vector<1x32xf32> to vector<16x32xf32>
    %547 = arith.addf %545, %546 : vector<16x32xf32>
    %c1_184 = arith.constant 1 : index
    %c0_185 = arith.constant 0 : index
    %c0_186 = arith.constant 0 : index
    %548 = vector.load %arg14[%c1_184, %c0_185, %c0_186] : memref<2x32x32xf32, #tpu.memory_space<vmem>>, vector<1x32x32xf32>
    %549 = vector.shape_cast %548 : vector<1x32x32xf32> to vector<32x32xf32>
    %cst_187 = arith.constant dense<0.000000e+00> : vector<16x32xf32>
    %550 = tpu.matmul %547, %549, %cst_187 {dimension_numbers = #tpu.dot_dimension_numbers<[1], [0], [0], [1], [0, 0, 1, 1], [], []>} : vector<16x32xf32>, vector<32x32xf32>, vector<16x32xf32> -> vector<16x32xf32>
    %551 = vector.extract_strided_slice %4 {offsets = [11, 0], sizes = [1, 32], strides = [1, 1]} : vector<22x32xf32> to vector<1x32xf32>
    %552 = vector.broadcast %551 : vector<1x32xf32> to vector<16x32xf32>
    %553 = arith.addf %550, %552 : vector<16x32xf32>
    %c1_188 = arith.constant 1 : index
    %c0_189 = arith.constant 0 : index
    %c0_190 = arith.constant 0 : index
    %554 = vector.load %arg15[%c1_188, %c0_189, %c0_190] : memref<2x32x64xf32, #tpu.memory_space<vmem>>, vector<1x32x64xf32>
    %555 = vector.shape_cast %554 : vector<1x32x64xf32> to vector<32x64xf32>
    %cst_191 = arith.constant dense<0.000000e+00> : vector<16x64xf32>
    %556 = tpu.matmul %256, %555, %cst_191 {dimension_numbers = #tpu.dot_dimension_numbers<[1], [0], [0], [1], [0, 0, 1, 1], [], []>} : vector<16x32xf32>, vector<32x64xf32>, vector<16x64xf32> -> vector<16x64xf32>
    %c1_192 = arith.constant 1 : index
    %c0_193 = arith.constant 0 : index
    %c0_194 = arith.constant 0 : index
    %557 = vector.load %arg20[%c1_192, %c0_193, %c0_194] : memref<2x1x64xf32, #tpu.memory_space<vmem>>, vector<1x1x64xf32>
    %558 = vector.shape_cast %557 : vector<1x1x64xf32> to vector<1x64xf32>
    %559 = vector.broadcast %558 : vector<1x64xf32> to vector<16x64xf32>
    %560 = arith.addf %556, %559 : vector<16x64xf32>
    %561 = vector.extract_strided_slice %560 {offsets = [0, 0], sizes = [16, 32], strides = [1, 1]} : vector<16x64xf32> to vector<16x32xf32>
    %562 = vector.extract_strided_slice %560 {offsets = [0, 32], sizes = [16, 32], strides = [1, 1]} : vector<16x64xf32> to vector<16x32xf32>
    %c1_195 = arith.constant 1 : index
    %c0_196 = arith.constant 0 : index
    %c0_197 = arith.constant 0 : index
    %563 = vector.load %arg16[%c1_195, %c0_196, %c0_197] : memref<2x32x32xf32, #tpu.memory_space<vmem>>, vector<1x32x32xf32>
    %564 = vector.shape_cast %563 : vector<1x32x32xf32> to vector<32x32xf32>
    %565 = vector.extract_strided_slice %4 {offsets = [12, 0], sizes = [1, 32], strides = [1, 1]} : vector<22x32xf32> to vector<1x32xf32>
    %566 = vector.shape_cast %553 : vector<16x32xf32> to vector<2x8x32xf32>
    %567 = vector.shape_cast %561 : vector<16x32xf32> to vector<2x8x32xf32>
    %568 = vector.shape_cast %562 : vector<16x32xf32> to vector<2x8x32xf32>
    %569 = tpu.concatenate %566, %566, %566, %566 in 0 : vector<2x8x32xf32>, vector<2x8x32xf32>, vector<2x8x32xf32>, vector<2x8x32xf32> -> vector<8x8x32xf32>
    %570 = tpu.concatenate %567, %567, %567, %567 in 0 : vector<2x8x32xf32>, vector<2x8x32xf32>, vector<2x8x32xf32>, vector<2x8x32xf32> -> vector<8x8x32xf32>
    %571 = vector.broadcast %0 : vector<8x1x32xf32> to vector<8x8x32xf32>
    %572 = arith.mulf %570, %571 : vector<8x8x32xf32>
    %573 = tpu.concatenate %568, %568, %568, %568 in 0 : vector<2x8x32xf32>, vector<2x8x32xf32>, vector<2x8x32xf32>, vector<2x8x32xf32> -> vector<8x8x32xf32>
    %574 = vector.broadcast %0 : vector<8x1x32xf32> to vector<8x8x32xf32>
    %575 = arith.mulf %573, %574 : vector<8x8x32xf32>
    %576 = tpu.concatenate %1, %1, %1, %1 in 0 : vector<2x1x8xf32>, vector<2x1x8xf32>, vector<2x1x8xf32>, vector<2x1x8xf32> -> vector<8x1x8xf32>
    "tpu.trace_start"() <{level = 10 : i32, message = "zqd,zkd->zqk"}> : () -> ()
    %cst_198 = arith.constant dense<0.000000e+00> : vector<8x8x8xf32>
    %577 = tpu.matmul %569, %572, %cst_198 {dimension_numbers = #tpu.dot_dimension_numbers<[2], [2], [1], [1], [0, 0, 0, 1, 1, 1], [0], [0]>} : vector<8x8x32xf32>, vector<8x8x32xf32>, vector<8x8x8xf32> -> vector<8x8x8xf32>
    "tpu.trace_stop"() : () -> ()
    %cst_199 = arith.constant 0.353553385 : f32
    %578 = vector.broadcast %cst_199 : f32 to vector<8x8x8xf32>
    %579 = arith.mulf %577, %578 : vector<8x8x8xf32>
    %580 = vector.broadcast %576 : vector<8x1x8xf32> to vector<8x8x8xf32>
    %581 = arith.addf %579, %580 : vector<8x8x8xf32>
    %cst_200 = arith.constant dense<0xFF800000> : vector<8x8xf32>
    %582 = vector.multi_reduction <maximumf>, %581, %cst_200 [2] : vector<8x8x8xf32> to vector<8x8xf32>
    %583 = vector.shape_cast %582 : vector<8x8xf32> to vector<8x8x1xf32>
    %584 = vector.broadcast %583 : vector<8x8x1xf32> to vector<8x8x8xf32>
    %585 = arith.subf %581, %584 : vector<8x8x8xf32>
    %586 = math.exp %585 : vector<8x8x8xf32>
    %cst_201 = arith.constant dense<0.000000e+00> : vector<8x8xf32>
    %587 = vector.multi_reduction <add>, %586, %cst_201 [2] : vector<8x8x8xf32> to vector<8x8xf32>
    %588 = vector.shape_cast %587 : vector<8x8xf32> to vector<8x8x1xf32>
    %589 = tpu.reciprocal %588 {approx = true} : vector<8x8x1xf32> -> vector<8x8x1xf32>
    %590 = vector.broadcast %589 : vector<8x8x1xf32> to vector<8x8x8xf32>
    %591 = arith.mulf %586, %590 : vector<8x8x8xf32>
    "tpu.trace_start"() <{level = 10 : i32, message = "zqk,zkd->zqd"}> : () -> ()
    %cst_202 = arith.constant dense<0.000000e+00> : vector<8x8x32xf32>
    %592 = tpu.matmul %591, %575, %cst_202 {dimension_numbers = #tpu.dot_dimension_numbers<[2], [1], [1], [2], [0, 0, 0, 1, 1, 2], [0], [0]>} : vector<8x8x8xf32>, vector<8x8x32xf32>, vector<8x8x32xf32> -> vector<8x8x32xf32>
    "tpu.trace_stop"() : () -> ()
    %593 = vector.extract_strided_slice %592 {offsets = [0, 0, 0], sizes = [2, 8, 32], strides = [1, 1, 1]} : vector<8x8x32xf32> to vector<2x8x32xf32>
    %594 = vector.extract_strided_slice %592 {offsets = [2, 0, 0], sizes = [2, 8, 32], strides = [1, 1, 1]} : vector<8x8x32xf32> to vector<2x8x32xf32>
    %595 = arith.addf %593, %594 : vector<2x8x32xf32>
    %596 = vector.extract_strided_slice %592 {offsets = [4, 0, 0], sizes = [2, 8, 32], strides = [1, 1, 1]} : vector<8x8x32xf32> to vector<2x8x32xf32>
    %597 = arith.addf %595, %596 : vector<2x8x32xf32>
    %598 = vector.extract_strided_slice %592 {offsets = [6, 0, 0], sizes = [2, 8, 32], strides = [1, 1, 1]} : vector<8x8x32xf32> to vector<2x8x32xf32>
    %599 = arith.addf %597, %598 : vector<2x8x32xf32>
    %600 = vector.shape_cast %599 : vector<2x8x32xf32> to vector<16x32xf32>
    %cst_203 = arith.constant dense<0.000000e+00> : vector<16x32xf32>
    %601 = tpu.matmul %600, %564, %cst_203 {dimension_numbers = #tpu.dot_dimension_numbers<[1], [0], [0], [1], [0, 0, 1, 1], [], []>} : vector<16x32xf32>, vector<32x32xf32>, vector<16x32xf32> -> vector<16x32xf32>
    %602 = vector.broadcast %565 : vector<1x32xf32> to vector<16x32xf32>
    %603 = arith.addf %601, %602 : vector<16x32xf32>
    %604 = arith.addf %524, %603 : vector<16x32xf32>
    %605 = vector.extract_strided_slice %4 {offsets = [18, 0], sizes = [1, 32], strides = [1, 1]} : vector<22x32xf32> to vector<1x32xf32>
    %606 = vector.extract_strided_slice %4 {offsets = [19, 0], sizes = [1, 32], strides = [1, 1]} : vector<22x32xf32> to vector<1x32xf32>
    %cst_204 = arith.constant dense<0.000000e+00> : vector<16xf32>
    %607 = vector.multi_reduction <add>, %604, %cst_204 [1] : vector<16x32xf32> to vector<16xf32>
    %608 = vector.shape_cast %607 : vector<16xf32> to vector<16x1xf32>
    %cst_205 = arith.constant 3.200000e+01 : f32
    %609 = vector.broadcast %cst_205 : f32 to vector<16x1xf32>
    %610 = arith.divf %608, %609 : vector<16x1xf32>
    %611 = vector.broadcast %610 : vector<16x1xf32> to vector<16x32xf32>
    %612 = arith.subf %604, %611 : vector<16x32xf32>
    %613 = arith.mulf %612, %612 : vector<16x32xf32>
    %cst_206 = arith.constant dense<0.000000e+00> : vector<16xf32>
    %614 = vector.multi_reduction <add>, %613, %cst_206 [1] : vector<16x32xf32> to vector<16xf32>
    %615 = vector.shape_cast %614 : vector<16xf32> to vector<16x1xf32>
    %cst_207 = arith.constant 0.0322580636 : f32
    %616 = vector.broadcast %cst_207 : f32 to vector<16x1xf32>
    %617 = arith.mulf %615, %616 : vector<16x1xf32>
    %618 = math.sqrt %617 : vector<16x1xf32>
    %cst_208 = arith.constant 9.99999997E-7 : f32
    %619 = vector.broadcast %cst_208 : f32 to vector<16x1xf32>
    %620 = arith.addf %618, %619 : vector<16x1xf32>
    %621 = tpu.reciprocal %620 {approx = true} : vector<16x1xf32> -> vector<16x1xf32>
    %622 = vector.broadcast %621 : vector<16x1xf32> to vector<16x32xf32>
    %623 = arith.mulf %612, %622 : vector<16x32xf32>
    %624 = vector.broadcast %605 : vector<1x32xf32> to vector<16x32xf32>
    %625 = arith.mulf %624, %623 : vector<16x32xf32>
    %626 = vector.broadcast %606 : vector<1x32xf32> to vector<16x32xf32>
    %627 = arith.addf %625, %626 : vector<16x32xf32>
    %c1_209 = arith.constant 1 : index
    %c0_210 = arith.constant 0 : index
    %c0_211 = arith.constant 0 : index
    %628 = vector.load %arg17[%c1_209, %c0_210, %c0_211] : memref<2x32x64xf32, #tpu.memory_space<vmem>>, vector<1x32x64xf32>
    %629 = vector.shape_cast %628 : vector<1x32x64xf32> to vector<32x64xf32>
    %c1_212 = arith.constant 1 : index
    %c0_213 = arith.constant 0 : index
    %c0_214 = arith.constant 0 : index
    %630 = vector.load %arg21[%c1_212, %c0_213, %c0_214] : memref<2x1x64xf32, #tpu.memory_space<vmem>>, vector<1x1x64xf32>
    %631 = vector.shape_cast %630 : vector<1x1x64xf32> to vector<1x64xf32>
    %c1_215 = arith.constant 1 : index
    %c0_216 = arith.constant 0 : index
    %c0_217 = arith.constant 0 : index
    %632 = vector.load %arg18[%c1_215, %c0_216, %c0_217] : memref<2x64x32xf32, #tpu.memory_space<vmem>>, vector<1x64x32xf32>
    %633 = vector.shape_cast %632 : vector<1x64x32xf32> to vector<64x32xf32>
    %634 = vector.extract_strided_slice %4 {offsets = [13, 0], sizes = [1, 32], strides = [1, 1]} : vector<22x32xf32> to vector<1x32xf32>
    %cst_218 = arith.constant dense<0.000000e+00> : vector<16x64xf32>
    %635 = tpu.matmul %627, %629, %cst_218 {dimension_numbers = #tpu.dot_dimension_numbers<[1], [0], [0], [1], [0, 0, 1, 1], [], []>} : vector<16x32xf32>, vector<32x64xf32>, vector<16x64xf32> -> vector<16x64xf32>
    %636 = vector.broadcast %631 : vector<1x64xf32> to vector<16x64xf32>
    %637 = arith.addf %635, %636 : vector<16x64xf32>
    %cst_219 = arith.constant 0.000000e+00 : f32
    %638 = vector.broadcast %cst_219 : f32 to vector<16x64xf32>
    %639 = arith.maximumf %637, %638 : vector<16x64xf32>
    %cst_220 = arith.constant dense<0.000000e+00> : vector<16x32xf32>
    %640 = tpu.matmul %639, %633, %cst_220 {dimension_numbers = #tpu.dot_dimension_numbers<[1], [0], [0], [1], [0, 0, 1, 1], [], []>} : vector<16x64xf32>, vector<64x32xf32>, vector<16x32xf32> -> vector<16x32xf32>
    %641 = vector.broadcast %634 : vector<1x32xf32> to vector<16x32xf32>
    %642 = arith.addf %640, %641 : vector<16x32xf32>
    %643 = arith.addf %604, %642 : vector<16x32xf32>
    %644 = vector.extract_strided_slice %4 {offsets = [20, 0], sizes = [1, 32], strides = [1, 1]} : vector<22x32xf32> to vector<1x32xf32>
    %645 = vector.extract_strided_slice %4 {offsets = [21, 0], sizes = [1, 32], strides = [1, 1]} : vector<22x32xf32> to vector<1x32xf32>
    %cst_221 = arith.constant dense<0.000000e+00> : vector<16xf32>
    %646 = vector.multi_reduction <add>, %643, %cst_221 [1] : vector<16x32xf32> to vector<16xf32>
    %647 = vector.shape_cast %646 : vector<16xf32> to vector<16x1xf32>
    %cst_222 = arith.constant 3.200000e+01 : f32
    %648 = vector.broadcast %cst_222 : f32 to vector<16x1xf32>
    %649 = arith.divf %647, %648 : vector<16x1xf32>
    %650 = vector.broadcast %649 : vector<16x1xf32> to vector<16x32xf32>
    %651 = arith.subf %643, %650 : vector<16x32xf32>
    %652 = arith.mulf %651, %651 : vector<16x32xf32>
    %cst_223 = arith.constant dense<0.000000e+00> : vector<16xf32>
    %653 = vector.multi_reduction <add>, %652, %cst_223 [1] : vector<16x32xf32> to vector<16xf32>
    %654 = vector.shape_cast %653 : vector<16xf32> to vector<16x1xf32>
    %cst_224 = arith.constant 0.0322580636 : f32
    %655 = vector.broadcast %cst_224 : f32 to vector<16x1xf32>
    %656 = arith.mulf %654, %655 : vector<16x1xf32>
    %657 = math.sqrt %656 : vector<16x1xf32>
    %cst_225 = arith.constant 9.99999997E-7 : f32
    %658 = vector.broadcast %cst_225 : f32 to vector<16x1xf32>
    %659 = arith.addf %657, %658 : vector<16x1xf32>
    %660 = tpu.reciprocal %659 {approx = true} : vector<16x1xf32> -> vector<16x1xf32>
    %661 = vector.broadcast %660 : vector<16x1xf32> to vector<16x32xf32>
    %662 = arith.mulf %651, %661 : vector<16x32xf32>
    %663 = vector.broadcast %644 : vector<1x32xf32> to vector<16x32xf32>
    %664 = arith.mulf %663, %662 : vector<16x32xf32>
    %665 = vector.broadcast %645 : vector<1x32xf32> to vector<16x32xf32>
    %666 = arith.addf %664, %665 : vector<16x32xf32>
    %c0_226 = arith.constant 0 : index
    %c0_227 = arith.constant 0 : index
    %667 = vector.load %arg23[%c0_226, %c0_227] : memref<16x32xf32, #tpu.memory_space<vmem>>, vector<16x32xf32>
    tpu.vector_store %arg23[%c0_226, %c0_227], %666 {strides = array<i32>} : memref<16x32xf32, #tpu.memory_space<vmem>>, vector<16x32xf32>,
    return
  }
}

</mosaic_0001>

<bundles_post_ra>
// kernel: transformer_forward.1
= control target key start
LH: loop header
LB: loop body
LE: loop exit
PB: predicated region body
PF: predicated region fallthrough
CT: control target
= control target key end

     0   :  { %s15068_s0 = inlined_call_operand.vmem [shape: f32[16,32], index: 0, kind: input, shape index: {}]   ;;  %s15069_s1 = inlined_call_operand.vmem [shape: f32[16,32], index: 1, kind: input, shape index: {}]   ;;  %s15070_s2 = inlined_call_operand.vmem [shape: f32[2,1,8], index: 2, kind: input, shape index: {}]   ;;  %s15071_s3 = inlined_call_operand.vmem [shape: f32[2,8,8], index: 3, kind: input, shape index: {}]   ;;  %s15072_s4 = inlined_call_operand.vmem [shape: f32[8,1,32], index: 4, kind: input, shape index: {}]   ;;  %s15073_s5 = inlined_call_operand.vmem [shape: f32[2,32,96], index: 5, kind: input, shape index: {}]   ;;  %s15074_s6 = inlined_call_operand.vmem [shape: f32[2,32,32], index: 6, kind: input, shape index: {}]   ;;  %s15075_s7 = inlined_call_operand.vmem [shape: f32[2,32,64], index: 7, kind: input, shape index: {}]   ;;  %s15076_s8 = inlined_call_operand.vmem [shape: f32[2,64,32], index: 8, kind: input, shape index: {}]   ;;  %s15077_s9 = inlined_call_operand.vmem [shape: f32[2,1,96], index: 9, kind: input, shape index: {}]   ;;  %s15078_s10 = inlined_call_operand.vmem [shape: f32[2,1,64], index: 10, kind: input, shape index: {}]   ;;  %s15079_s11 = inlined_call_operand.vmem [shape: f32[14,32], index: 11, kind: input, shape index: {}]   ;;  %s15080_s12 = inlined_call_operand.vmem [shape: f32[2,32,96], index: 12, kind: input, shape index: {}]   ;;  %s15081_s13 = inlined_call_operand.vmem [shape: f32[2,32,32], index: 13, kind: input, shape index: {}]   ;;  %s15082_s14 = inlined_call_operand.vmem [shape: f32[2,32,32], index: 14, kind: input, shape index: {}]   ;;  %s15083_s15 = inlined_call_operand.vmem [shape: f32[2,32,64], index: 15, kind: input, shape index: {}]   ;;  %s15084_s16 = inlined_call_operand.vmem [shape: f32[2,32,32], index: 16, kind: input, shape index: {}]   ;;  %s15085_s17 = inlined_call_operand.vmem [shape: f32[2,32,64], index: 17, kind: input, shape index: {}]   ;;  %s15086_s18 = inlined_call_operand.vmem [shape: f32[2,64,32], index: 18, kind: input, shape index: {}]   ;;  %s15087_s19 = inlined_call_operand.vmem [shape: f32[2,1,96], index: 19, kind: input, shape index: {}]   ;;  %s15088_s20 = inlined_call_operand.vmem [shape: f32[2,1,64], index: 20, kind: input, shape index: {}]   ;;  %s15089_s21 = inlined_call_operand.vmem [shape: f32[2,1,64], index: 21, kind: input, shape index: {}]   ;;  %s15090_s22 = inlined_call_operand.vmem [shape: f32[22,32], index: 22, kind: input, shape index: {}]   ;;  %s15091_s23 = inlined_call_operand.hbm [shape: f32[16,32], index: 23, kind: output, shape index: {}]  }
   0x1   :  { %15104 = sst [smem:[#allocation5_spill]] %s15068_s0 }
   0x2   :  { %15105 = sst [smem:[#allocation6_spill]] %s15069_s1 }
   0x3   :  { %15106 = sst [smem:[#allocation7_spill]] %s15070_s2 }
   0x4   :  { %15107 = sst [smem:[#allocation8_spill]] %s15071_s3 }
   0x5   :  { %15108 = sst [smem:[#allocation9_spill]] %s15072_s4 }
   0x6   :  { %15109 = sst [smem:[#allocation10_spill]] %s15073_s5 }
   0x7   :  { %15110 = sst [smem:[#allocation11_spill]] %s15074_s6 }
   0x8   :  { %15111 = sst [smem:[#allocation12_spill]] %s15075_s7 }
   0x9   :  { %s15112_s24 = sld [smem:[#allocation5_spill]]  ;;  %vm94_vm0 = vcmask 261120  }
   0xf   :  { %v13064_v0 = vld [vmem:[%s15112_s24] sm:$0xff]  ;;  %v13069_v1 = vld [vmem:[%s15112_s24 + $0x8] sm:$0xff] }
  0x10   :  { %28 = vsyncpa [#allocation3], 0  ;;  %v95_v2 = vsel %vm94_vm0, %v13064_v0, 0.0  ;;  %v98_v3 = vsel %vm94_vm0, %v13069_v1, 0.0  ;;  %s15113_s2 = sld [smem:[#allocation10_spill]]  ;;  %s15114_s30 = sld [smem:[#allocation9_spill]]  ;;  %v136_v38 = vlaneseq }
  0x11   :  { %96 = vadd.xlane.f32.xlu0 %v95_v2  ;;  %s12933_s24 = smov 32   ;;  %v13155_v47 = vld [vmem:[%s15079_s11] sm:$0xff]  ;;  %v12934_v60 = vmov 0.0   ;;  %vm12935_vm5 = vmmov 0   ;;  %s15102_s27 = smov 96   ;;  %vm990_vm6 = vcmask 64512  }
  0x12   :  { %v13147_v44 = vshrl.u32 %v136_v38, 7  ;;  %11574 = vmatprep.subr.mxu0 %v12934_v60  ;;  %11576 = vmatprep.mubr.msk.f32.mxu0 %vm12935_vm5, %v12934_v60  ;;  %v10948_v62 = vld [vmem:[%s15077_s9] ss:$0 sm:$0xff]  ;;  %s15100_s7 = smov 64   ;;  %s15115_s3 = sld [smem:[#allocation7_spill]]  ;;  %vm1946_vm11 = vcmask 523264  }
  0x13   :  { %s15117_s5 = sld [smem:[#allocation12_spill]]  ;;  %s15118_s0 = smov 96  }
  0x14   :  { %v13150_v46 = vsub.s32 2, %v13147_v44  ;;  %v13158_v48 = vsub.s32 3, %v13147_v44  ;;  %s15120_s25 = sld [smem:[#allocation6_spill]] }
  0x15   :  { %99 = vadd.xlane.f32.xlu0 %v98_v3 }
  0x16   :  { %v148_v14 = vld [vmem:[%s15113_s2] sm:$0xff]  ;;  %v149_v15 = vld [vmem:[%s15113_s2 + $0x8] sm:$0xff]  ;;  %v150_v16 = vld [vmem:[%s15113_s2 + $0x10] sm:$0xff]  ;;  %v139_v49 = vrot.slane %v13155_v47, %v13150_v46  ;;  %v145_v52 = vrot.slane %v13155_v47, %v13158_v48 }
  0x17   :  { %v12307_v17 = vpack.c.bf16 %v149_v15, %v148_v14  ;;  %v151_v18 = vld [vmem:[%s15113_s2 + $0x18] sm:$0xff]  ;;  %v13102_v20 = vld [vmem:[%s15114_s30 + $0x1] ss:$0 sm:$0xff]  ;;  %v13108_v21 = vld [vmem:[%s15114_s30] ss:$0 sm:$0xff] }
  0x18   :  { %v12311_v19 = vpack.c.bf16 %v151_v18, %v150_v16  ;;  %v13113_v22 = vld [vmem:[%s15114_s30 + $0x2] ss:$0 sm:$0xff]  ;;  %v13119_v23 = vld [vmem:[%s15114_s30 + $0x4] ss:$0 sm:$0xff]  ;;  %v13125_v24 = vld [vmem:[%s15114_s30 + $0x3] ss:$0 sm:$0xff] }
  0x19   :  { %12308 = vmatprep.subr.bf16.mxu1 %v12307_v17  ;;  %v13131_v25 = vld [vmem:[%s15114_s30 + $0x6] ss:$0 sm:$0xff]  ;;  %v13137_v26 = vld [vmem:[%s15114_s30 + $0x5] ss:$0 sm:$0xff]  ;;  %v13144_v27 = vld [vmem:[%s15114_s30 + $0x7] ss:$0 sm:$0xff] }
  0x1a   :  { %12310 = vmatpush3.bf16.msra.mxu1 %v12307_v17 }
  0x1b   :  { %12312 = vmatprep.subr.bf16.mxu1 %v12311_v19 }
  0x1e   :  { %12314 = vmatpush3.bf16.msra.mxu1 %v12311_v19 }
  0x1f   :  { %11564 = vmatprep.subr.mxu1 %v12934_v60 }
  0x2b   :  { %292 = vrot.lane.b32.xlu0 %v13108_v21, %s12933_s24 }
  0x2f   :  { %300 = vrot.lane.b32.xlu0 %v13119_v23, %s12933_s24 }
  0x33   :  { %304 = vrot.lane.b32.xlu0 %v13131_v25, %s12933_s24 }
  0x9e   :  { %v97_v4 = vpop.xlane.xlu0 %96 }
  0x9f   :  { %v102_v5 = vmul.f32 0.03125, %v97_v4 }
  0xa1   :  { %v13076_v6 = vsub.f32 %v13064_v0, %v102_v5 }
  0xa2   :  { %v100_v7 = vpop.xlane.xlu0 %99 }
  0xa3   :  { %v103_v8 = vmul.f32 0.03125, %v100_v7  ;;  %v106_v9 = vmul.f32 %v13076_v6, %v13076_v6 }
  0xa5   :  { %v13081_v10 = vsub.f32 %v13069_v1, %v103_v8  ;;  %v108_v11 = vsel %vm94_vm0, %v106_v9, 0.0 }
  0xa6   :  { %109 = vadd.xlane.f32.xlu1 %v108_v11  ;;  %v13183_v3 = vpop.permute.xlu0 %292 }
  0xa7   :  { %v107_v12 = vmul.f32 %v13081_v10, %v13081_v10 }
  0xa9   :  { %v111_v13 = vsel %vm94_vm0, %v107_v12, 0.0 }
  0xaa   :  { %112 = vadd.xlane.f32.xlu1 %v111_v13 }
  0xbb   :  { %294 = vrot.lane.b32.xlu1 %v13102_v20, %s12933_s24 }
  0xbf   :  { %296 = vrot.lane.b32.xlu1 %v13113_v22, %s12933_s24 }
  0xc3   :  { %298 = vrot.lane.b32.xlu1 %v13125_v24, %s12933_s24 }
  0xc7   :  { %302 = vrot.lane.b32.xlu1 %v13137_v26, %s12933_s24 }
  0xcb   :  { %306 = vrot.lane.b32.xlu1 %v13144_v27, %s12933_s24  ;;  %s15116_s24 = sld [smem:[#allocation11_spill]] }
 0x133   :  { %v110_v28 = vpop.xlane.xlu1 %109 }
 0x134   :  { %v114_v29 = vmul.f32 0.032258064, %v110_v28  ;;  %v13288_v28 = vld [vmem:[%s15115_s3] ss:$0 sm:$0xff] }
 0x136   :  { %12595 = vrsqrt.f32 %v114_v29  ;;  %vm118_vm1 = vcmp.eq.f32.partialorder %v114_v29, inf  ;;  %v121_v34 = vand.u32 2147483648, %v114_v29  ;;  %vm120_vm2 = vcmp.eq.f32.partialorder %v114_v29, 0.0 }
 0x137   :  { %v113_v30 = vpop.xlane.xlu1 %112 }
 0x138   :  { %v115_v31 = vmul.f32 0.032258064, %v113_v30 }
 0x13a   :  { %12597 = vrsqrt.f32 %v115_v31  ;;  %vm125_vm3 = vcmp.eq.f32.partialorder %v115_v31, inf  ;;  %v128_v41 = vand.u32 2147483648, %v115_v31  ;;  %vm127_vm4 = vcmp.eq.f32.partialorder %v115_v31, 0.0 }
 0x13b   :  { %v13168_v59 = vpop.permute.xlu1 %294 }
 0x13f   :  { %v13172_v61 = vpop.permute.xlu1 %296 }
 0x140   :  { %v12596_v32 = vpop.eup %12595 }
 0x141   :  { %v117_v33 = vmul.f32 %v12596_v32, %v114_v29 }
 0x143   :  { %v119_v35 = vsel %vm118_vm1, %v114_v29, %v117_v33  ;;  %v13181_v63 = vpop.permute.xlu1 %298 }
 0x144   :  { %v12598_v36 = vpop.eup %12597  ;;  %v122_v37 = vsel %vm120_vm2, %v121_v34, %v119_v35  ;;  %v13296_v34 = vld [vmem:[%s15115_s3 + $0x1] ss:$0 sm:$0xff] }
 0x145   :  { %v124_v39 = vmul.f32 %v12598_v36, %v115_v31  ;;  %v130_v40 = vadd.f32 1e-06, %v122_v37 }
 0x147   :  { %v126_v42 = vsel %vm125_vm3, %v115_v31, %v124_v39  ;;  %12599 = vrcp.f32 %v130_v40  ;;  %v13194_v9 = vpop.permute.xlu1 %302 }
 0x148   :  { %v129_v43 = vsel %vm127_vm4, %v128_v41, %v126_v42 }
 0x149   :  { %v131_v45 = vadd.f32 1e-06, %v129_v43 }
 0x14b   :  { %12601 = vrcp.f32 %v131_v45  ;;  %v13207_v14 = vpop.permute.xlu1 %306 }
 0x151   :  { %v12600_v50 = vpop.eup %12599 }
 0x152   :  { %v134_v51 = vmul.f32 %v12600_v50, %v13076_v6 }
 0x154   :  { %v140_v53 = vmul.f32 %v139_v49, %v134_v51 }
 0x155   :  { %v12602_v54 = vpop.eup %12601 }
 0x156   :  { %v135_v55 = vmul.f32 %v12602_v54, %v13081_v10  ;;  %v146_v56 = vadd.f32 %v145_v52, %v140_v53  ;;  %v13197_v10 = vpop.permute.xlu0 %300 }
 0x158   :  { %v141_v57 = vmul.f32 %v139_v49, %v135_v55  ;;  %11561 = vmatprep.mubr.msk.f32.mxu1 %vm94_vm0, %v146_v56 }
 0x15a   :  { %v147_v58 = vadd.f32 %v145_v52, %v141_v57  ;;  %v13211_v16 = vpop.permute.xlu0 %304 }
 0x15c   :  { %11562 = vmatmul.mubr.msk.f32.vlgmr.msra.gmra.mrb[0].mxu1 %vm94_vm0, %v147_v58 }
 0x15d   :  { %11566 = vmatprep.mubr.msk.f32.mxu1 %vm12935_vm5, %v12934_v60 }
 0x22f   :  { %v11563_v2 = vpop.f32.mrb[0].mxu1 }
 0x230   :  { %v13185_v4 = vadd.f32 %v11563_v2, %v10948_v62  ;;  %v231_v5 = vpop.f32.mrb[1].mxu1 }
 0x231   :  { %v13187_v6 = vadd.f32 %v10948_v62, %v231_v5 }
 0x232   :  { %v317_v7 = vmul.f32 %v13168_v59, %v13185_v4  ;;  %v319_v11 = vmul.f32 %v13181_v63, %v13185_v4  ;;  %v321_v13 = vmul.f32 %v13194_v9, %v13185_v4  ;;  %v323_v17 = vmul.f32 %v13207_v14, %v13185_v4 }
 0x233   :  { %v316_v8 = vmul.f32 %v13183_v3, %v13187_v6  ;;  %v318_v12 = vmul.f32 %v13172_v61, %v13187_v6  ;;  %v320_v15 = vmul.f32 %v13197_v10, %v13187_v6  ;;  %v322_v18 = vmul.f32 %v13211_v16, %v13187_v6 }
 0x234   :  { %435 = vrot.lane.b32.xlu1 %v317_v7, %s15102_s27 }
 0x235   :  { %357 = vrot.lane.b32.xlu0 %v316_v8, %s15102_s27 }
 0x238   :  { %588 = vrot.lane.b32.xlu1 %v319_v11, %s15102_s27 }
 0x239   :  { %513 = vrot.lane.b32.xlu0 %v318_v12, %s15102_s27 }
 0x23c   :  { %738 = vrot.lane.b32.xlu1 %v321_v13, %s15102_s27 }
 0x23d   :  { %663 = vrot.lane.b32.xlu0 %v320_v15, %s15102_s27 }
 0x240   :  { %888 = vrot.lane.b32.xlu1 %v323_v17, %s15102_s27 }
 0x241   :  { %813 = vrot.lane.b32.xlu0 %v322_v18, %s15102_s27 }
 0x244   :  { %326 = vrot.lane.b32.xlu1 %v13102_v20, %s15100_s7 }
 0x245   :  { %324 = vrot.lane.b32.xlu0 %v13108_v21, %s15100_s7 }
 0x248   :  { %328 = vrot.lane.b32.xlu1 %v13113_v22, %s15100_s7 }
 0x249   :  { %332 = vrot.lane.b32.xlu0 %v13119_v23, %s15100_s7 }
 0x24c   :  { %330 = vrot.lane.b32.xlu1 %v13125_v24, %s15100_s7 }
 0x24d   :  { %336 = vrot.lane.b32.xlu0 %v13131_v25, %s15100_s7 }
 0x250   :  { %334 = vrot.lane.b32.xlu1 %v13137_v26, %s15100_s7 }
 0x254   :  { %338 = vrot.lane.b32.xlu1 %v13144_v27, %s15100_s7 }
 0x2a6   :  { %v436_v19 = vpop.permute.xlu1 %435 }
 0x2a7   :  { %v358_v20 = vpop.permute.xlu0 %357 }
 0x2a8   :  { %11565 = vmatpush3.xpose.msk.msra.mxu1 %vm94_vm0, %v358_v20 }
 0x2a9   :  { %11569 = vmatprep.subr.mxu1 %v12934_v60 }
 0x2aa   :  { %v589_v21 = vpop.permute.xlu1 %588 }
 0x2ab   :  { %11567 = vmatmul.mubr.msk.f32.vlgmr.msra.gmra.mrb[2].mxu1 %vm94_vm0, %v13187_v6  ;;  %v514_v22 = vpop.permute.xlu0 %513 }
 0x2ac   :  { %11570 = vmatpush3.xpose.msk.msra.mxu1 %vm94_vm0, %v436_v19  ;;  %11575 = vmatpush3.xpose.msk.msra.mxu0 %vm94_vm0, %v514_v22 }
 0x2ad   :  { %11571 = vmatprep.mubr.msk.f32.mxu1 %vm12935_vm5, %v12934_v60  ;;  %11579 = vmatprep.subr.mxu1 %v12934_v60 }
 0x2ae   :  { %11584 = vmatprep.subr.mxu0 %v12934_v60  ;;  %v739_v24 = vpop.permute.xlu1 %738 }
 0x2af   :  { %11572 = vmatmul.mubr.msk.f32.vlgmr.msra.gmra.mrb[4].mxu1 %vm94_vm0, %v13185_v4  ;;  %11577 = vmatmul.mubr.msk.f32.vlgmr.msra.gmra.mrb[0].mxu0 %vm94_vm0, %v13187_v6  ;;  %v664_v23 = vpop.permute.xlu0 %663 }
 0x2b0   :  { %11580 = vmatpush3.xpose.msk.msra.mxu1 %vm94_vm0, %v589_v21  ;;  %11585 = vmatpush3.xpose.msk.msra.mxu0 %vm94_vm0, %v664_v23 }
 0x2b1   :  { %11581 = vmatprep.mubr.msk.f32.mxu1 %vm12935_vm5, %v12934_v60  ;;  %11586 = vmatprep.mubr.msk.f32.mxu0 %vm12935_vm5, %v12934_v60 }
 0x2b2   :  { %11589 = vmatprep.subr.mxu1 %v12934_v60  ;;  %11594 = vmatprep.subr.mxu0 %v12934_v60  ;;  %v889_v26 = vpop.permute.xlu1 %888 }
 0x2b3   :  { %11582 = vmatmul.mubr.msk.f32.vlgmr.msra.gmra.mrb[6].mxu1 %vm94_vm0, %v13185_v4  ;;  %11587 = vmatmul.mubr.msk.f32.vlgmr.msra.gmra.mrb[2].mxu0 %vm94_vm0, %v13187_v6  ;;  %v814_v25 = vpop.permute.xlu0 %813 }
 0x2b4   :  { %11590 = vmatpush3.xpose.msk.msra.mxu1 %vm94_vm0, %v739_v24  ;;  %11595 = vmatpush3.xpose.msk.msra.mxu0 %vm94_vm0, %v814_v25 }
 0x2b5   :  { %11591 = vmatprep.mubr.msk.f32.mxu1 %vm12935_vm5, %v12934_v60  ;;  %11596 = vmatprep.mubr.msk.f32.mxu0 %vm12935_vm5, %v12934_v60 }
 0x2b6   :  { %11599 = vmatprep.subr.mxu1 %v12934_v60  ;;  %11604 = vmatprep.subr.mxu0 %v12934_v60  ;;  %v13311_v13 = vpop.permute.xlu1 %326 }
 0x2b7   :  { %11592 = vmatmul.mubr.msk.f32.vlgmr.msra.gmra.mrb[8].mxu1 %vm94_vm0, %v13185_v4  ;;  %11597 = vmatmul.mubr.msk.f32.vlgmr.msra.gmra.mrb[4].mxu0 %vm94_vm0, %v13187_v6  ;;  %v349_v17 = vmul.f32 %v13311_v13, %v13185_v4  ;;  %v13323_v20 = vpop.permute.xlu0 %324 }
 0x2b8   :  { %11600 = vmatpush3.xpose.msk.msra.mxu1 %vm94_vm0, %v889_v26  ;;  %11601 = vmatprep.mubr.msk.f32.mxu1 %vm12935_vm5, %v12934_v60  ;;  %v348_v21 = vmul.f32 %v13323_v20, %v13187_v6 }
 0x2b9   :  { %11609 = vmatprep.subr.mxu1 %v12934_v60  ;;  %11606 = vmatprep.mubr.msk.f32.mxu0 %vm12935_vm5, %v12934_v60 }
 0x2ba   :  { %v13317_v18 = vpop.permute.xlu1 %328 }
 0x2bb   :  { %11602 = vmatmul.mubr.msk.f32.vlgmr.msra.gmra.mrb[10].mxu1 %vm94_vm0, %v13185_v4  ;;  %v350_v19 = vmul.f32 %v13317_v18, %v13187_v6 }
 0x2bc   :  { %11611 = vmatprep.mubr.msk.f32.mxu1 %vm12935_vm5, %v12934_v60 }
 0x37e   :  { %v430_v27 = vpop.f32.mrb[2].mxu1 }
 0x37f   :  { %v962_v29 = vmul.f32 0.35355338, %v430_v27  ;;  %v11568_v30 = vpop.f32.mrb[3].mxu1 }
 0x381   :  { %v13291_v31 = vadd.f32 %v13288_v28, %v962_v29  ;;  %v13338_v29 = vpop.permute.xlu1 %330 }
 0x382   :  { %v508_v32 = vpop.f32.mrb[4].mxu1  ;;  %v583_v33 = vpop.f32.mrb[0].mxu0  ;;  %v351_v30 = vmul.f32 %v13338_v29, %v13185_v4 }
 0x383   :  { %v963_v35 = vmul.f32 0.35355338, %v508_v32  ;;  %v964_v36 = vmul.f32 0.35355338, %v583_v33  ;;  %v11573_v37 = vpop.f32.mrb[5].mxu1  ;;  %v11578_v38 = vpop.f32.mrb[1].mxu0 }
 0x384   :  { %v991_v39 = vsel %vm990_vm6, %v13291_v31, -inf  ;;  %v13343_v32 = vpop.permute.xlu0 %332 }
 0x385   :  { %992 = vmax.xlane.f32.xlu0 %v991_v39  ;;  %v983_v40 = vadd.f32 %v13296_v34, %v963_v35  ;;  %v984_v41 = vadd.f32 %v13288_v28, %v964_v36  ;;  %v13345_v33 = vpop.permute.xlu1 %334 }
 0x386   :  { %v658_v42 = vpop.f32.mrb[6].mxu1  ;;  %v733_v43 = vpop.f32.mrb[2].mxu0 }
 0x387   :  { %v966_v45 = vmul.f32 0.35355338, %v733_v43  ;;  %v11583_v49 = vpop.f32.mrb[7].mxu1  ;;  %v11588_v50 = vpop.f32.mrb[3].mxu0  ;;  %v965_v51 = vmul.f32 0.35355338, %v658_v42 }
 0x388   :  { %v994_v52 = vsel %vm990_vm6, %v983_v40, -inf  ;;  %v997_v53 = vsel %vm990_vm6, %v984_v41, -inf  ;;  %v13347_v35 = vpop.permute.xlu0 %336 }
 0x389   :  { %995 = vmax.xlane.f32.xlu1 %v994_v52  ;;  %998 = vmax.xlane.f32.xlu0 %v997_v53  ;;  %v986_v54 = vadd.f32 %v13288_v28, %v966_v45  ;;  %v985_v5 = vadd.f32 %v13296_v34, %v965_v51  ;;  %v13349_v36 = vpop.permute.xlu1 %338 }
 0x38a   :  { %v808_v55 = vpop.f32.mrb[8].mxu1  ;;  %v883_v56 = vpop.f32.mrb[4].mxu0 }
 0x38b   :  { %v11593_v57 = vpop.f32.mrb[9].mxu1  ;;  %v11598_v58 = vpop.f32.mrb[5].mxu0  ;;  %v968_v62 = vmul.f32 0.35355338, %v883_v56  ;;  %v1003_v2 = vsel %vm990_vm6, %v986_v54, -inf  ;;  %v1000_v11 = vsel %vm990_vm6, %v985_v5, -inf }
 0x38c   :  { %v967_v22 = vmul.f32 0.35355338, %v808_v55 }
 0x38d   :  { %1004 = vmax.xlane.f32.xlu0 %v1003_v2  ;;  %v13309_v12 = vadd.f32 %v13288_v28, %v968_v62 }
 0x38e   :  { %v958_v7 = vpop.f32.mrb[10].mxu1  ;;  %v13329_v24 = vadd.f32 %v13296_v34, %v967_v22  ;;  %v352_v22 = vmul.f32 %v13343_v32, %v13187_v6 }
 0x38f   :  { %v11603_v8 = vpop.f32.mrb[11].mxu1  ;;  %v1009_v15 = vsel %vm990_vm6, %v13309_v12, -inf  ;;  %v969_v23 = vmul.f32 0.35355338, %v958_v7 }
 0x390   :  { %v1006_v25 = vsel %vm990_vm6, %v13329_v24, -inf }
 0x391   :  { %1001 = vmax.xlane.f32.xlu0 %v1000_v11  ;;  %v13334_v26 = vadd.f32 %v13296_v34, %v969_v23 }
 0x393   :  { %v1012_v27 = vsel %vm990_vm6, %v13334_v26, -inf }
 0x395   :  { %1010 = vmax.xlane.f32.xlu0 %v1009_v15 }
 0x39a   :  { %1157 = vrot.lane.b32.xlu1 %v349_v17, %s15100_s7 }
 0x39e   :  { %1234 = vrot.lane.b32.xlu1 %v350_v19, %s15100_s7 }
 0x3ab   :  { %1080 = vrot.lane.b32.xlu0 %v348_v21, %s15100_s7  ;;  %v353_v21 = vmul.f32 %v13345_v33, %v13185_v4 }
 0x3c2   :  { %1007 = vmax.xlane.f32.xlu1 %v1006_v25 }
 0x3c6   :  { %1013 = vmax.xlane.f32.xlu1 %v1012_v27 }
 0x3d7   :  { %1311 = vrot.lane.b32.xlu1 %v351_v30, %s15100_s7 }
 0x412   :  { %v993_v37 = vpop.xlane.xlu0 %992 }
 0x413   :  { %v1015_v38 = vsub.f32 %v13291_v31, %v993_v37 }
 0x415   :  { %v1023_v39 = vmul.f32 1.442695, %v1015_v38 }
 0x416   :  { %v996_v42 = vpop.xlane.xlu1 %995  ;;  %v999_v43 = vpop.xlane.xlu0 %998 }
 0x417   :  { %12603 = vpow2.f32 %v1023_v39  ;;  %v1016_v45 = vsub.f32 %v983_v40, %v996_v42  ;;  %v1017_v49 = vsub.f32 %v984_v41, %v999_v43 }
 0x419   :  { %v1025_v50 = vmul.f32 1.442695, %v1016_v45  ;;  %v1027_v51 = vmul.f32 1.442695, %v1017_v49 }
 0x41a   :  { %v1158_v52 = vpop.permute.xlu1 %1157  ;;  %v1005_v53 = vpop.xlane.xlu0 %1004 }
 0x41b   :  { %12605 = vpow2.f32 %v1025_v50  ;;  %v1019_v55 = vsub.f32 %v986_v54, %v1005_v53  ;;  %11610 = vmatpush3.msra.mxu1 %v1158_v52  ;;  %v354_v52 = vmul.f32 %v13347_v35, %v13187_v6 }
 0x41c   :  { %12607 = vpow2.f32 %v1027_v51  ;;  %11619 = vmatprep.subr.mxu1 %v12934_v60  ;;  %v355_v51 = vmul.f32 %v13349_v36, %v13185_v4 }
 0x41d   :  { %v1031_v56 = vmul.f32 1.442695, %v1019_v55 }
 0x41e   :  { %v1002_v57 = vpop.xlane.xlu0 %1001  ;;  %v1235_v23 = vpop.permute.xlu1 %1234 }
 0x41f   :  { %12609 = vpow2.f32 %v1031_v56  ;;  %v1018_v31 = vsub.f32 %v985_v5, %v1002_v57 }
 0x421   :  { %v12604_v58 = vpop.eup %12603  ;;  %v1029_v62 = vmul.f32 1.442695, %v1018_v31 }
 0x422   :  { %v1011_v2 = vpop.xlane.xlu0 %1010  ;;  %v1039_v40 = vsel %vm990_vm6, %v12604_v58, 0.0 }
 0x423   :  { %12611 = vpow2.f32 %v1029_v62  ;;  %1040 = vadd.xlane.f32.xlu0 %v1039_v40  ;;  %v1021_v25 = vsub.f32 %v13309_v12, %v1011_v2 }
 0x425   :  { %v12606_v41 = vpop.eup %12605  ;;  %v1035_v38 = vmul.f32 1.442695, %v1021_v25 }
 0x426   :  { %v13354_v7 = vpop.eup %12607  ;;  %v1081_v8 = vpop.permute.xlu0 %1080  ;;  %v1042_v54 = vsel %vm990_vm6, %v12606_v41, 0.0 }
 0x427   :  { %1043 = vadd.xlane.f32.xlu1 %v1042_v54  ;;  %v1045_v11 = vsel %vm990_vm6, %v13354_v7, 0.0  ;;  %11605 = vmatpush3.msra.mxu0 %v1081_v8 }
 0x428   :  { %1046 = vadd.xlane.f32.xlu0 %v1045_v11  ;;  %11614 = vmatprep.subr.mxu0 %v12934_v60 }
 0x429   :  { %v13360_v5 = vpop.eup %12609 }
 0x42a   :  { %v1051_v15 = vsel %vm990_vm6, %v13360_v5, 0.0 }
 0x42c   :  { %1052 = vadd.xlane.f32.xlu0 %v1051_v15 }
 0x42d   :  { %v13364_v17 = vpop.eup %12611 }
 0x42e   :  { %v1048_v19 = vsel %vm990_vm6, %v13364_v17, 0.0 }
 0x430   :  { %1049 = vadd.xlane.f32.xlu0 %v1048_v19 }
 0x438   :  { %1465 = vrot.lane.b32.xlu1 %v353_v21, %s15100_s7 }
 0x446   :  { %1388 = vrot.lane.b32.xlu0 %v352_v22, %s15100_s7 }
 0x44f   :  { %v1008_v27 = vpop.xlane.xlu1 %1007 }
 0x450   :  { %v1020_v30 = vsub.f32 %v13329_v24, %v1008_v27 }
 0x452   :  { %v1033_v37 = vmul.f32 1.442695, %v1020_v30 }
 0x453   :  { %v1014_v39 = vpop.xlane.xlu1 %1013 }
 0x454   :  { %12613 = vpow2.f32 %v1033_v37  ;;  %v1022_v42 = vsub.f32 %v13334_v26, %v1014_v39 }
 0x455   :  { %12615 = vpow2.f32 %v1035_v38 }
 0x456   :  { %v1037_v43 = vmul.f32 1.442695, %v1022_v42 }
 0x457   :  { %v1312_v53 = vpop.permute.xlu1 %1311 }
 0x458   :  { %12617 = vpow2.f32 %v1037_v43 }
 0x45e   :  { %v13377_v45 = vpop.eup %12613 }
 0x45f   :  { %v1054_v49 = vsel %vm990_vm6, %v13377_v45, 0.0  ;;  %v13381_v50 = vpop.eup %12615 }
 0x460   :  { %1055 = vadd.xlane.f32.xlu1 %v1054_v49  ;;  %v1057_v26 = vsel %vm990_vm6, %v13381_v50, 0.0 }
 0x462   :  { %v13383_v12 = vpop.eup %12617 }
 0x463   :  { %v1060_v24 = vsel %vm990_vm6, %v13383_v12, 0.0 }
 0x464   :  { %1061 = vadd.xlane.f32.xlu1 %v1060_v24  ;;  %v243_v24 = vld [vmem:[%s15116_s24 + $0x18] sm:$0xff] }
 0x465   :  { %1058 = vadd.xlane.f32.xlu0 %v1057_v26 }
 0x475   :  { %1619 = vrot.lane.b32.xlu1 %v355_v51, %s15100_s7 }
 0x47b   :  { %1542 = vrot.lane.b32.xlu0 %v354_v52, %s15100_s7 }
 0x4b0   :  { %v1041_v55 = vpop.xlane.xlu0 %1040 }
 0x4b1   :  { %12619 = vrcp.f32 %v1041_v55 }
 0x4b4   :  { %v1044_v56 = vpop.xlane.xlu1 %1043 }
 0x4b5   :  { %12621 = vrcp.f32 %v1044_v56  ;;  %v1047_v57 = vpop.xlane.xlu0 %1046 }
 0x4b6   :  { %12623 = vrcp.f32 %v1047_v57 }
 0x4b8   :  { %v1466_v19 = vpop.permute.xlu1 %1465 }
 0x4b9   :  { %v1053_v31 = vpop.xlane.xlu0 %1052 }
 0x4bb   :  { %v12620_v62 = vpop.eup %12619 }
 0x4bc   :  { %v1071_v2 = vmul.f32 %v12620_v62, %v12604_v58 }
 0x4bd   :  { %v1050_v40 = vpop.xlane.xlu0 %1049 }
 0x4be   :  { %12625 = vrcp.f32 %v1050_v40  ;;  %11607 = vmatmul.mubr.msk.f32.vlgmr.msra.gmra.mrb[6].mxu0 %vm990_vm6, %v1071_v2 }
 0x4bf   :  { %v12622_v4 = vpop.eup %12621  ;;  %12627 = vrcp.f32 %v1053_v31  ;;  %11615 = vmatpush3.msra.mxu0 %v1235_v23  ;;  %11616 = vmatprep.mubr.msk.f32.mxu0 %vm12935_vm5, %v12934_v60 }
 0x4c0   :  { %v1072_v6 = vmul.f32 %v12622_v4, %v12606_v41  ;;  %11624 = vmatprep.subr.mxu0 %v12934_v60  ;;  %v12624_v8 = vpop.eup %12623 }
 0x4c1   :  { %v1073_v58 = vmul.f32 %v12624_v8, %v13354_v7  ;;  %v1389_v54 = vpop.permute.xlu0 %1388 }
 0x4c2   :  { %11612 = vmatmul.mubr.msk.f32.vlgmr.msra.gmra.mrb[12].mxu1 %vm990_vm6, %v1072_v6 }
 0x4c3   :  { %11620 = vmatpush3.msra.mxu1 %v1312_v53  ;;  %11621 = vmatprep.mubr.msk.f32.mxu1 %vm12935_vm5, %v12934_v60  ;;  %v13440_v53 = vsub.s32 0, %v13147_v44 }
 0x4c4   :  { %11629 = vmatprep.subr.mxu1 %v12934_v60 }
 0x4c5   :  { %v1704_v55 = vrot.slane %v13155_v47, %v13440_v53 }
 0x4c6   :  { %11617 = vmatmul.mubr.msk.f32.vlgmr.msra.gmra.mrb[6].mxu0 %vm990_vm6, %v1073_v58 }
 0x4c7   :  { %11625 = vmatpush3.msra.mxu0 %v1389_v54  ;;  %11626 = vmatprep.mubr.msk.f32.mxu0 %vm12935_vm5, %v12934_v60 }
 0x4c8   :  { %v12626_v41 = vpop.eup %12625  ;;  %11634 = vmatprep.subr.mxu0 %v12934_v60 }
 0x4c9   :  { %v12628_v11 = vpop.eup %12627  ;;  %v1074_v15 = vmul.f32 %v12626_v41, %v13364_v17  ;;  %v240_v17 = vld [vmem:[%s15116_s24] sm:$0xff] }
 0x4ca   :  { %v1075_v7 = vmul.f32 %v12628_v11, %v13360_v5  ;;  %v241_v5 = vld [vmem:[%s15116_s24 + $0x8] sm:$0xff] }
 0x4cb   :  { %11622 = vmatmul.mubr.msk.f32.vlgmr.msra.gmra.mrb[12].mxu1 %vm990_vm6, %v1074_v15  ;;  %v12315_v25 = vpack.c.bf16 %v241_v5, %v240_v17  ;;  %v1842_v17 = vld [vmem:[%s15117_s5 + $0x10] sm:$0xff] }
 0x4cc   :  { %11630 = vmatpush3.msra.mxu1 %v1466_v19  ;;  %11631 = vmatprep.mubr.msk.f32.mxu1 %vm12935_vm5, %v12934_v60 }
 0x4cd   :  { %11639 = vmatprep.subr.mxu1 %v12934_v60 }
 0x4ce   :  { %11627 = vmatmul.mubr.msk.f32.vlgmr.msra.gmra.mrb[6].mxu0 %vm990_vm6, %v1075_v7 }
 0x4cf   :  { %11636 = vmatprep.mubr.msk.f32.mxu0 %vm12935_vm5, %v12934_v60 }
 0x4ed   :  { %v1056_v21 = vpop.xlane.xlu1 %1055 }
 0x4ee   :  { %12629 = vrcp.f32 %v1056_v21  ;;  %v1840_v21 = vld [vmem:[%s15117_s5] sm:$0xff] }
 0x4f1   :  { %v1062_v22 = vpop.xlane.xlu1 %1061 }
 0x4f2   :  { %v1059_v23 = vpop.xlane.xlu0 %1058 }
 0x4f3   :  { %12631 = vrcp.f32 %v1059_v23  ;;  %v1843_v23 = vld [vmem:[%s15117_s5 + $0x18] sm:$0xff] }
 0x4f4   :  { %12633 = vrcp.f32 %v1062_v22  ;;  %v1841_v22 = vld [vmem:[%s15117_s5 + $0x8] sm:$0xff] }
 0x4f5   :  { %v1620_v38 = vpop.permute.xlu1 %1619  ;;  %v12323_v5 = vpack.c.bf16 %v1841_v22, %v1840_v21 }
 0x4f6   :  { %v1543_v27 = vpop.permute.xlu0 %1542 }
 0x4f7   :  { %11635 = vmatpush3.msra.mxu0 %v1543_v27  ;;  %v1845_v27 = vld [vmem:[%s15076_s8] sm:$0xff] }
 0x4f8   :  { %v12630_v30 = vpop.eup %12629  ;;  %12316 = vmatprep.subr.bf16.mxu0 %v12315_v25 }
 0x4f9   :  { %v1076_v37 = vmul.f32 %v12630_v30, %v13377_v45  ;;  %v242_v45 = vld [vmem:[%s15116_s24 + $0x10] sm:$0xff]  ;;  %v1846_v30 = vld [vmem:[%s15076_s8 + $0x8] sm:$0xff] }
 0x4fa   :  { %v12319_v26 = vpack.c.bf16 %v243_v24, %v242_v45 }
 0x4fb   :  { %11632 = vmatmul.mubr.msk.f32.vlgmr.msra.gmra.mrb[12].mxu1 %vm990_vm6, %v1076_v37  ;;  %v1847_v37 = vld [vmem:[%s15076_s8 + $0x10] sm:$0xff] }
 0x4fc   :  { %11640 = vmatpush3.msra.mxu1 %v1620_v38  ;;  %11641 = vmatprep.mubr.msk.f32.mxu1 %vm12935_vm5, %v12934_v60  ;;  %v12331_v38 = vpack.c.bf16 %v1846_v30, %v1845_v27  ;;  %v1851_v30 = vld [vmem:[%s15076_s8 + $0x30] sm:$0xff] }
 0x4fd   :  { %v12632_v39 = vpop.eup %12631  ;;  %12324 = vmatprep.subr.bf16.mxu1 %v12323_v5 }
 0x4fe   :  { %v12634_v42 = vpop.eup %12633  ;;  %v1077_v43 = vmul.f32 %v12632_v39, %v13381_v50  ;;  %v1848_v39 = vld [vmem:[%s15076_s8 + $0x18] sm:$0xff] }
 0x4ff   :  { %v1078_v49 = vmul.f32 %v12634_v42, %v13383_v12  ;;  %v12335_v42 = vpack.c.bf16 %v1848_v39, %v1847_v37 }
 0x500   :  { %11637 = vmatmul.mubr.msk.f32.vlgmr.msra.gmra.mrb[6].mxu0 %vm990_vm6, %v1077_v43  ;;  %v1849_v43 = vld [vmem:[%s15076_s8 + $0x20] sm:$0xff] }
 0x501   :  { %12318 = vmatpush3.bf16.msra.mxu0 %v12315_v25  ;;  %v12327_v25 = vpack.c.bf16 %v1843_v23, %v1842_v17 }
 0x502   :  { %12320 = vmatprep.subr.bf16.mxu0 %v12319_v26 }
 0x503   :  { %11642 = vmatmul.mubr.msk.f32.vlgmr.msra.gmra.mrb[12].mxu1 %vm990_vm6, %v1078_v49  ;;  %v1850_v49 = vld [vmem:[%s15076_s8 + $0x28] sm:$0xff] }
 0x504   :  { %12326 = vmatpush3.bf16.msra.mxu1 %v12323_v5  ;;  %v12339_v45 = vpack.c.bf16 %v1850_v49, %v1849_v43 }
 0x505   :  { %12322 = vmatpush3.bf16.msra.mxu0 %v12319_v26  ;;  %12328 = vmatprep.subr.bf16.mxu1 %v12327_v25 }
 0x506   :  { %12332 = vmatprep.subr.bf16.mxu0 %v12331_v38 }
 0x508   :  { %12330 = vmatpush3.bf16.msra.mxu1 %v12327_v25 }
 0x5d3   :  { %v1614_v51 = vpop.f32.mrb[6].mxu0 }
 0x5d4   :  { %v11638_v50 = vpop.f32.mrb[7].mxu0  ;;  %11652 = vmatprep.mubr.msk.f32.mxu0 %vm94_vm0, %v1614_v51 }
 0x5d6   :  { %v1691_v52 = vpop.f32.mrb[12].mxu1 }
 0x5d7   :  { %v11643_v12 = vpop.f32.mrb[13].mxu1  ;;  %11653 = vmatmul.mubr.msk.f32.vlgmr.msra.gmra.mrb[8].mxu0 %vm94_vm0, %v1691_v52 }
 0x5d8   :  { %12334 = vmatpush3.bf16.msra.mxu0 %v12331_v38 }
 0x5d9   :  { %12336 = vmatprep.subr.bf16.mxu0 %v12335_v42 }
 0x5dc   :  { %12338 = vmatpush3.bf16.msra.mxu0 %v12335_v42 }
 0x5dd   :  { %12340 = vmatprep.subr.bf16.mxu0 %v12339_v45 }
 0x5e0   :  { %12342 = vmatpush3.bf16.msra.mxu0 %v12339_v45 }
 0x6aa   :  { %v11654_v56 = vpop.f32.mrb[8].mxu0 }
 0x6ab   :  { %v1783_v57 = vadd.f32 %v11654_v56, %v1704_v55  ;;  %v1777_v31 = vpop.f32.mrb[9].mxu0 }
 0x6ac   :  { %v1778_v62 = vadd.f32 %v1777_v31, %v1704_v55 }
 0x6ad   :  { %v13445_v2 = vadd.f32 %v1783_v57, %v13069_v1 }
 0x6ae   :  { %v13448_v40 = vadd.f32 %v1778_v62, %v13064_v0 }
 0x6af   :  { %v1791_v4 = vsel %vm94_vm0, %v13445_v2, 0.0 }
 0x6b0   :  { %1792 = vadd.xlane.f32.xlu1 %v1791_v4  ;;  %v1788_v6 = vsel %vm94_vm0, %v13448_v40, 0.0 }
 0x6b1   :  { %1789 = vadd.xlane.f32.xlu0 %v1788_v6 }
 0x73d   :  { %v1793_v8 = vpop.xlane.xlu1 %1792 }
 0x73e   :  { %v1795_v58 = vmul.f32 0.03125, %v1793_v8  ;;  %v1790_v54 = vpop.xlane.xlu0 %1789 }
 0x73f   :  { %v1794_v41 = vmul.f32 0.03125, %v1790_v54 }
 0x740   :  { %v13455_v11 = vsub.f32 %v13445_v2, %v1795_v58 }
 0x741   :  { %v1796_v1 = vsub.f32 %v13448_v40, %v1794_v41  ;;  %v13493_v41 = vsub.s32 4, %v13147_v44 }
 0x742   :  { %v1799_v19 = vmul.f32 %v13455_v11, %v13455_v11 }
 0x743   :  { %v1798_v15 = vmul.f32 %v1796_v1, %v1796_v1 }
 0x744   :  { %v1803_v7 = vsel %vm94_vm0, %v1799_v19, 0.0 }
 0x745   :  { %v1800_v0 = vsel %vm94_vm0, %v1798_v15, 0.0  ;;  %v13496_v15 = vsub.s32 5, %v13147_v44 }
 0x746   :  { %1801 = vadd.xlane.f32.xlu0 %v1800_v0  ;;  %v1831_v0 = vrot.slane %v13155_v47, %v13493_v41 }
 0x747   :  { %v1837_v21 = vrot.slane %v13155_v47, %v13496_v15 }
 0x74a   :  { %1804 = vadd.xlane.f32.xlu0 %v1803_v7 }
 0x7d3   :  { %v1802_v24 = vpop.xlane.xlu0 %1801 }
 0x7d4   :  { %v1806_v26 = vmul.f32 0.032258064, %v1802_v24  ;;  %v13520_v24 = vsub.s32 1, %v13147_v44 }
 0x7d6   :  { %12635 = vrsqrt.f32 %v1806_v26  ;;  %vm1810_vm7 = vcmp.eq.f32.partialorder %v1806_v26, inf  ;;  %v1813_v55 = vand.u32 2147483648, %v1806_v26  ;;  %vm1812_vm8 = vcmp.eq.f32.partialorder %v1806_v26, 0.0 }
 0x7d7   :  { %v1805_v51 = vpop.xlane.xlu0 %1804 }
 0x7d8   :  { %v1807_v50 = vmul.f32 0.032258064, %v1805_v51 }
 0x7da   :  { %12637 = vrsqrt.f32 %v1807_v50  ;;  %vm1817_vm9 = vcmp.eq.f32.partialorder %v1807_v50, inf  ;;  %v1820_v6 = vand.u32 2147483648, %v1807_v50  ;;  %vm1819_vm10 = vcmp.eq.f32.partialorder %v1807_v50, 0.0 }
 0x7e0   :  { %v12636_v52 = vpop.eup %12635 }
 0x7e1   :  { %v1809_v12 = vmul.f32 %v12636_v52, %v1806_v26 }
 0x7e3   :  { %v1811_v56 = vsel %vm1810_vm7, %v1806_v26, %v1809_v12  ;;  %v1945_v26 = vrot.slane %v13155_v47, %v13520_v24 }
 0x7e4   :  { %v12638_v57 = vpop.eup %12637  ;;  %v1814_v31 = vsel %vm1812_vm8, %v1813_v55, %v1811_v56 }
 0x7e5   :  { %v1822_v62 = vadd.f32 1e-06, %v1814_v31  ;;  %v1816_v4 = vmul.f32 %v12638_v57, %v1807_v50 }
 0x7e7   :  { %v1818_v8 = vsel %vm1817_vm9, %v1807_v50, %v1816_v4  ;;  %12639 = vrcp.f32 %v1822_v62 }
 0x7e8   :  { %v1821_v58 = vsel %vm1819_vm10, %v1820_v6, %v1818_v8 }
 0x7e9   :  { %v1823_v54 = vadd.f32 1e-06, %v1821_v58 }
 0x7eb   :  { %12641 = vrcp.f32 %v1823_v54 }
 0x7f1   :  { %v12640_v19 = vpop.eup %12639 }
 0x7f2   :  { %v1826_v7 = vmul.f32 %v12640_v19, %v1796_v1  ;;  %v1852_v1 = vld [vmem:[%s15076_s8 + $0x38] sm:$0xff]  ;;  %v10992_v19 = vld [vmem:[%s15113_s2 + $0x20] sm:$0xff] }
 0x7f3   :  { %v12343_v37 = vpack.c.bf16 %v1852_v1, %v1851_v30 }
 0x7f4   :  { %v1832_v22 = vmul.f32 %v1831_v0, %v1826_v7  ;;  %v10993_v7 = vld [vmem:[%s15113_s2 + $0x28] sm:$0xff] }
 0x7f5   :  { %v12642_v17 = vpop.eup %12641  ;;  %12344 = vmatprep.subr.bf16.mxu0 %v12343_v37 }
 0x7f6   :  { %v1827_v5 = vmul.f32 %v12642_v17, %v13455_v11  ;;  %v1838_v23 = vadd.f32 %v1837_v21, %v1832_v22  ;;  %12346 = vmatpush3.bf16.msra.mxu0 %v12343_v37  ;;  %v10987_v11 = vld [vmem:[%s15078_s10] ss:$0 sm:$0xff]  ;;  %v12347_v22 = vpack.c.bf16 %v10993_v7, %v10992_v19  ;;  %v10995_v17 = vld [vmem:[%s15113_s2 + $0x38] sm:$0xff] }
 0x7f7   :  { %11706 = vmatprep.subr.mxu0 %v12934_v60 }
 0x7f8   :  { %v1833_v25 = vmul.f32 %v1831_v0, %v1827_v5  ;;  %11663 = vmatprep.mubr.msk.f32.mxu1 %vm94_vm0, %v1838_v23  ;;  %12348 = vmatprep.subr.bf16.mxu1 %v12347_v22 }
 0x7fa   :  { %v1839_v27 = vadd.f32 %v1837_v21, %v1833_v25  ;;  %v10994_v21 = vld [vmem:[%s15113_s2 + $0x30] sm:$0xff] }
 0x7fb   :  { %v12351_v5 = vpack.c.bf16 %v10995_v17, %v10994_v21 }
 0x7fc   :  { %11664 = vmatmul.mubr.msk.f32.vlgmr.msra.gmra.mrb[14].mxu1 %vm94_vm0, %v1839_v27 }
 0x7fd   :  { %12350 = vmatpush3.bf16.msra.mxu1 %v12347_v22 }
 0x7fe   :  { %12352 = vmatprep.subr.bf16.mxu1 %v12351_v5 }
 0x801   :  { %12354 = vmatpush3.bf16.msra.mxu1 %v12351_v5 }
 0x802   :  { %11696 = vmatprep.subr.mxu1 %v12934_v60 }
 0x8cf   :  { %v11665_v38 = vpop.f32.mrb[14].mxu1 }
 0x8d0   :  { %v1937_v39 = vadd.f32 %v11665_v38, %v10987_v11  ;;  %v1931_v42 = vpop.f32.mrb[15].mxu1 }
 0x8d1   :  { %v1932_v43 = vadd.f32 %v10987_v11, %v1931_v42 }
 0x8d2   :  { %v1941_v45 = vmax.f32 %v1937_v39, 0.0 }
 0x8d3   :  { %v1940_v49 = vmax.f32 %v1932_v43, 0.0 }
 0x8d5   :  { %11682 = vmatprep.mubr.msk.f32.mxu0 %vm1946_vm11, %v1940_v49 }
 0x8d6   :  { %11683 = vmatmul.mubr.msk.f32.vlgmr.msra.gmra.mrb[10].mxu0 %vm1946_vm11, %v1941_v45 }
 0x8d7   :  { %11708 = vmatprep.mubr.msk.f32.mxu0 %vm12935_vm5, %v12934_v60 }
 0x9a9   :  { %v11684_v51 = vpop.f32.mrb[10].mxu0 }
 0x9aa   :  { %v2025_v50 = vadd.f32 %v11684_v51, %v1945_v26  ;;  %v2019_v52 = vpop.f32.mrb[11].mxu0 }
 0x9ab   :  { %v2020_v12 = vadd.f32 %v2019_v52, %v1945_v26  ;;  %v13554_v52 = vld [vmem:[%s15079_s11 + $0x8] sm:$0x3f] }
 0x9ac   :  { %v13525_v55 = vadd.f32 %v2025_v50, %v13445_v2 }
 0x9ad   :  { %v13528_v56 = vadd.f32 %v2020_v12, %v13448_v40  ;;  %v2073_v12 = vrot.slane %v13554_v52, %v13440_v53 }
 0x9ae   :  { %v2033_v57 = vsel %vm94_vm0, %v13525_v55, 0.0 }
 0x9af   :  { %2034 = vadd.xlane.f32.xlu1 %v2033_v57  ;;  %v2030_v31 = vsel %vm94_vm0, %v13528_v56, 0.0 }
 0x9b0   :  { %2031 = vadd.xlane.f32.xlu0 %v2030_v31 }
 0xa3c   :  { %v2035_v62 = vpop.xlane.xlu1 %2034 }
 0xa3d   :  { %v2037_v47 = vmul.f32 0.03125, %v2035_v62  ;;  %v2032_v4 = vpop.xlane.xlu0 %2031 }
 0xa3e   :  { %v2036_v6 = vmul.f32 0.03125, %v2032_v4  ;;  %v2079_v4 = vrot.slane %v13554_v52, %v13520_v24 }
 0xa3f   :  { %v2039_v8 = vsub.f32 %v13525_v55, %v2037_v47 }
 0xa40   :  { %v2038_v2 = vsub.f32 %v13528_v56, %v2036_v6 }
 0xa41   :  { %v2041_v58 = vmul.f32 %v2039_v8, %v2039_v8 }
 0xa42   :  { %v2040_v54 = vmul.f32 %v2038_v2, %v2038_v2 }
 0xa43   :  { %v2045_v40 = vsel %vm94_vm0, %v2041_v58, 0.0 }
 0xa44   :  { %2046 = vadd.xlane.f32.xlu1 %v2045_v40  ;;  %v2042_v0 = vsel %vm94_vm0, %v2040_v54, 0.0 }
 0xa45   :  { %2043 = vadd.xlane.f32.xlu0 %v2042_v0  ;;  %v10997_v0 = vld [vmem:[%s15077_s9 + $0x1] ss:$0 sm:$0xff]  ;;  %s15119_s9 = smov 64  }
 0xad1   :  { %v2047_v23 = vpop.xlane.xlu1 %2046 }
 0xad2   :  { %v2049_v25 = vmul.f32 0.032258064, %v2047_v23  ;;  %v2044_v27 = vpop.xlane.xlu0 %2043 }
 0xad3   :  { %v2048_v30 = vmul.f32 0.032258064, %v2044_v27 }
 0xad4   :  { %12643 = vrsqrt.f32 %v2049_v25  ;;  %vm2059_vm12 = vcmp.eq.f32.partialorder %v2049_v25, inf  ;;  %v2062_v38 = vand.u32 2147483648, %v2049_v25  ;;  %vm2061_vm13 = vcmp.eq.f32.partialorder %v2049_v25, 0.0 }
 0xad5   :  { %12645 = vrsqrt.f32 %v2048_v30  ;;  %vm2052_vm14 = vcmp.eq.f32.partialorder %v2048_v30, inf  ;;  %v2055_v43 = vand.u32 2147483648, %v2048_v30  ;;  %vm2054_vm15 = vcmp.eq.f32.partialorder %v2048_v30, 0.0 }
 0xade   :  { %v12644_v1 = vpop.eup %12643 }
 0xadf   :  { %v12646_v37 = vpop.eup %12645  ;;  %v2058_v11 = vmul.f32 %v12644_v1, %v2049_v25 }
 0xae0   :  { %v2051_v39 = vmul.f32 %v12646_v37, %v2048_v30 }
 0xae1   :  { %v2060_v42 = vsel %vm2059_vm12, %v2049_v25, %v2058_v11 }
 0xae2   :  { %v2063_v49 = vsel %vm2061_vm13, %v2062_v38, %v2060_v42  ;;  %v2053_v45 = vsel %vm2052_vm14, %v2048_v30, %v2051_v39 }
 0xae3   :  { %v2065_v26 = vadd.f32 1e-06, %v2063_v49  ;;  %v2056_v51 = vsel %vm2054_vm15, %v2055_v43, %v2053_v45 }
 0xae4   :  { %v2064_v50 = vadd.f32 1e-06, %v2056_v51 }
 0xae5   :  { %12647 = vrcp.f32 %v2065_v26 }
 0xae6   :  { %12649 = vrcp.f32 %v2064_v50 }
 0xaef   :  { %v12648_v57 = vpop.eup %12647 }
 0xaf0   :  { %v12650_v31 = vpop.eup %12649  ;;  %v2069_v62 = vmul.f32 %v12648_v57, %v2039_v8 }
 0xaf1   :  { %v2068_v47 = vmul.f32 %v12650_v31, %v2038_v2 }
 0xaf2   :  { %v2075_v6 = vmul.f32 %v2073_v12, %v2069_v62 }
 0xaf3   :  { %v2074_v58 = vmul.f32 %v2073_v12, %v2068_v47 }
 0xaf4   :  { %v2081_v40 = vadd.f32 %v2079_v4, %v2075_v6 }
 0xaf5   :  { %v2080_v54 = vadd.f32 %v2079_v4, %v2074_v58 }
 0xaf7   :  { %11693 = vmatprep.mubr.msk.f32.mxu1 %vm94_vm0, %v2080_v54 }
 0xaf8   :  { %11694 = vmatmul.mubr.msk.f32.vlgmr.msra.gmra.mrb[16].mxu1 %vm94_vm0, %v2081_v40 }
 0xaf9   :  { %11698 = vmatprep.mubr.msk.f32.mxu1 %vm12935_vm5, %v12934_v60 }
 0xbcb   :  { %v11695_v8 = vpop.f32.mrb[16].mxu1 }
 0xbcc   :  { %v13567_v2 = vadd.f32 %v11695_v8, %v10997_v0  ;;  %v2167_v19 = vpop.f32.mrb[17].mxu1 }
 0xbcd   :  { %v13569_v7 = vadd.f32 %v10997_v0, %v2167_v19 }
 0xbce   :  { %v2182_v21 = vmul.f32 %v13567_v2, %v13168_v59  ;;  %v2184_v23 = vmul.f32 %v13567_v2, %v13181_v63  ;;  %v2186_v27 = vmul.f32 %v13567_v2, %v13194_v9  ;;  %v2188_v30 = vmul.f32 %v13567_v2, %v13207_v14 }
 0xbcf   :  { %v2181_v22 = vmul.f32 %v13569_v7, %v13183_v3  ;;  %v2183_v17 = vmul.f32 %v13569_v7, %v13172_v61  ;;  %v2185_v5 = vmul.f32 %v13569_v7, %v13197_v10  ;;  %v2187_v25 = vmul.f32 %v13569_v7, %v13211_v16 }
 0xbd0   :  { %2276 = vrot.lane.b32.xlu1 %v2182_v21, %s15118_s0 }
 0xbd1   :  { %2198 = vrot.lane.b32.xlu0 %v2181_v22, %s15118_s0 }
 0xbd4   :  { %2354 = vrot.lane.b32.xlu1 %v2183_v17, %s15118_s0 }
 0xbd5   :  { %2504 = vrot.lane.b32.xlu0 %v2185_v5, %s15118_s0 }
 0xbd8   :  { %2429 = vrot.lane.b32.xlu1 %v2184_v23, %s15118_s0 }
 0xbd9   :  { %2654 = vrot.lane.b32.xlu0 %v2187_v25, %s15118_s0 }
 0xbdc   :  { %2579 = vrot.lane.b32.xlu1 %v2186_v27, %s15118_s0 }
 0xbe0   :  { %2729 = vrot.lane.b32.xlu1 %v2188_v30, %s15118_s0 }
 0xc42   :  { %v2277_v1 = vpop.permute.xlu1 %2276 }
 0xc43   :  { %v2199_v37 = vpop.permute.xlu0 %2198 }
 0xc44   :  { %11697 = vmatpush3.xpose.msk.msra.mxu1 %vm94_vm0, %v2199_v37 }
 0xc45   :  { %11701 = vmatprep.subr.mxu1 %v12934_v60 }
 0xc46   :  { %v2355_v11 = vpop.permute.xlu1 %2354 }
 0xc47   :  { %11699 = vmatmul.mubr.msk.f32.vlgmr.msra.gmra.mrb[18].mxu1 %vm94_vm0, %v13569_v7  ;;  %11707 = vmatpush3.xpose.msk.msra.mxu0 %vm94_vm0, %v2355_v11  ;;  %v2505_v38 = vpop.permute.xlu0 %2504 }
 0xc48   :  { %11702 = vmatpush3.xpose.msk.msra.mxu1 %vm94_vm0, %v2277_v1  ;;  %11716 = vmatprep.subr.mxu0 %v12934_v60 }
 0xc49   :  { %11703 = vmatprep.mubr.msk.f32.mxu1 %vm12935_vm5, %v12934_v60  ;;  %11711 = vmatprep.subr.mxu1 %v12934_v60 }
 0xc4a   :  { %11709 = vmatmul.mubr.msk.f32.vlgmr.msra.gmra.mrb[12].mxu0 %vm94_vm0, %v13569_v7  ;;  %v2430_v39 = vpop.permute.xlu1 %2429 }
 0xc4b   :  { %11704 = vmatmul.mubr.msk.f32.vlgmr.msra.gmra.mrb[20].mxu1 %vm94_vm0, %v13567_v2  ;;  %11717 = vmatpush3.xpose.msk.msra.mxu0 %vm94_vm0, %v2505_v38  ;;  %v2655_v42 = vpop.permute.xlu0 %2654 }
 0xc4c   :  { %11712 = vmatpush3.xpose.msk.msra.mxu1 %vm94_vm0, %v2430_v39  ;;  %11718 = vmatprep.mubr.msk.f32.mxu0 %vm12935_vm5, %v12934_v60 }
 0xc4d   :  { %11713 = vmatprep.mubr.msk.f32.mxu1 %vm12935_vm5, %v12934_v60  ;;  %11726 = vmatprep.subr.mxu0 %v12934_v60 }
 0xc4e   :  { %v2580_v43 = vpop.permute.xlu1 %2579  ;;  %11719 = vmatmul.mubr.msk.f32.vlgmr.msra.gmra.mrb[14].mxu0 %vm94_vm0, %v13569_v7  ;;  %11721 = vmatprep.subr.mxu1 %v12934_v60 }
 0xc4f   :  { %11714 = vmatmul.mubr.msk.f32.vlgmr.msra.gmra.mrb[22].mxu1 %vm94_vm0, %v13567_v2  ;;  %11727 = vmatpush3.xpose.msk.msra.mxu0 %vm94_vm0, %v2655_v42 }
 0xc50   :  { %11722 = vmatpush3.xpose.msk.msra.mxu1 %vm94_vm0, %v2580_v43  ;;  %11728 = vmatprep.mubr.msk.f32.mxu0 %vm12935_vm5, %v12934_v60 }
 0xc51   :  { %11723 = vmatprep.mubr.msk.f32.mxu1 %vm12935_vm5, %v12934_v60  ;;  %11731 = vmatprep.subr.mxu1 %v12934_v60 }
 0xc52   :  { %v2730_v49 = vpop.permute.xlu1 %2729  ;;  %11729 = vmatmul.mubr.msk.f32.vlgmr.msra.gmra.mrb[16].mxu0 %vm94_vm0, %v13569_v7  ;;  %11736 = vmatprep.subr.mxu0 %v12934_v60 }
 0xc53   :  { %11724 = vmatmul.mubr.msk.f32.vlgmr.msra.gmra.mrb[24].mxu1 %vm94_vm0, %v13567_v2  ;;  %11738 = vmatprep.mubr.msk.f32.mxu0 %vm12935_vm5, %v12934_v60 }
 0xc54   :  { %11732 = vmatpush3.xpose.msk.msra.mxu1 %vm94_vm0, %v2730_v49  ;;  %11733 = vmatprep.mubr.msk.f32.mxu1 %vm12935_vm5, %v12934_v60 }
 0xc55   :  { %11741 = vmatprep.subr.mxu1 %v12934_v60 }
 0xc57   :  { %11734 = vmatmul.mubr.msk.f32.vlgmr.msra.gmra.mrb[26].mxu1 %vm94_vm0, %v13567_v2 }
 0xc58   :  { %11743 = vmatprep.mubr.msk.f32.mxu1 %vm12935_vm5, %v12934_v60 }
 0xd1a   :  { %v2271_v45 = vpop.f32.mrb[18].mxu1 }
 0xd1b   :  { %v2803_v26 = vmul.f32 0.35355338, %v2271_v45  ;;  %v11700_v51 = vpop.f32.mrb[19].mxu1 }
 0xd1c   :  { %v2191_v51 = vmul.f32 %v13569_v7, %v13317_v18 }
 0xd1d   :  { %v2424_v50 = vpop.f32.mrb[12].mxu0  ;;  %v2811_v12 = vadd.f32 %v13288_v28, %v2803_v26  ;;  %v2190_v26 = vmul.f32 %v13567_v2, %v13311_v13 }
 0xd1e   :  { %v2805_v57 = vmul.f32 0.35355338, %v2424_v50  ;;  %v2349_v31 = vpop.f32.mrb[20].mxu1  ;;  %v11710_v62 = vpop.f32.mrb[13].mxu0  ;;  %v2189_v50 = vmul.f32 %v13569_v7, %v13323_v20 }
 0xd1f   :  { %v2804_v47 = vmul.f32 0.35355338, %v2349_v31  ;;  %v11705_v4 = vpop.f32.mrb[21].mxu1  ;;  %v2819_v6 = vsel %vm990_vm6, %v2811_v12, -inf }
 0xd20   :  { %2820 = vmax.xlane.f32.xlu0 %v2819_v6  ;;  %v2813_v58 = vadd.f32 %v13288_v28, %v2805_v57  ;;  %v2192_v6 = vmul.f32 %v13567_v2, %v13338_v29 }
 0xd21   :  { %v2574_v54 = vpop.f32.mrb[14].mxu0  ;;  %v2812_v40 = vadd.f32 %v13296_v34, %v2804_v47 }
 0xd22   :  { %v2807_v0 = vmul.f32 0.35355338, %v2574_v54  ;;  %v2499_v8 = vpop.f32.mrb[22].mxu1  ;;  %v11720_v19 = vpop.f32.mrb[15].mxu0  ;;  %v2825_v21 = vsel %vm990_vm6, %v2813_v58, -inf }
 0xd23   :  { %v2806_v22 = vmul.f32 0.35355338, %v2499_v8  ;;  %v11715_v17 = vpop.f32.mrb[23].mxu1  ;;  %v2822_v5 = vsel %vm990_vm6, %v2812_v40, -inf }
 0xd24   :  { %2826 = vmax.xlane.f32.xlu0 %v2825_v21  ;;  %2823 = vmax.xlane.f32.xlu1 %v2822_v5  ;;  %v13650_v23 = vadd.f32 %v13288_v28, %v2807_v0 }
 0xd25   :  { %v2724_v25 = vpop.f32.mrb[16].mxu0  ;;  %v2814_v38 = vadd.f32 %v13296_v34, %v2806_v22 }
 0xd26   :  { %v2649_v27 = vpop.f32.mrb[24].mxu1  ;;  %v11730_v30 = vpop.f32.mrb[17].mxu0  ;;  %v2831_v1 = vsel %vm990_vm6, %v13650_v23, -inf  ;;  %v2809_v37 = vmul.f32 0.35355338, %v2724_v25 }
 0xd27   :  { %v11725_v11 = vpop.f32.mrb[25].mxu1  ;;  %v2828_v43 = vsel %vm990_vm6, %v2814_v38, -inf }
 0xd28   :  { %2832 = vmax.xlane.f32.xlu0 %v2831_v1  ;;  %v2817_v49 = vadd.f32 %v13288_v28, %v2809_v37  ;;  %v2808_v28 = vmul.f32 0.35355338, %v2649_v27 }
 0xd2a   :  { %v2799_v39 = vpop.f32.mrb[26].mxu1  ;;  %v2837_v45 = vsel %vm990_vm6, %v2817_v49, -inf  ;;  %v2816_v31 = vadd.f32 %v13296_v34, %v2808_v28 }
 0xd2b   :  { %v11735_v42 = vpop.f32.mrb[27].mxu1  ;;  %v2810_v57 = vmul.f32 0.35355338, %v2799_v39 }
 0xd2c   :  { %2829 = vmax.xlane.f32.xlu0 %v2828_v43  ;;  %v2834_v62 = vsel %vm990_vm6, %v2816_v31, -inf  ;;  %v2194_v43 = vmul.f32 %v13567_v2, %v13345_v33 }
 0xd2d   :  { %v2818_v47 = vadd.f32 %v13296_v34, %v2810_v57 }
 0xd2f   :  { %v2840_v4 = vsel %vm990_vm6, %v2818_v47, -inf }
 0xd30   :  { %2838 = vmax.xlane.f32.xlu0 %v2837_v45  ;;  %v2193_v45 = vmul.f32 %v13569_v7, %v13343_v32 }
 0xd35   :  { %2985 = vrot.lane.b32.xlu1 %v2190_v26, %s15119_s9 }
 0xd39   :  { %3062 = vrot.lane.b32.xlu1 %v2191_v51, %s15119_s9 }
 0xd46   :  { %2908 = vrot.lane.b32.xlu0 %v2189_v50, %s15119_s9 }
 0xd5d   :  { %2835 = vmax.xlane.f32.xlu1 %v2834_v62 }
 0xd61   :  { %2841 = vmax.xlane.f32.xlu1 %v2840_v4 }
 0xd72   :  { %3139 = vrot.lane.b32.xlu1 %v2192_v6, %s15119_s9 }
 0xdad   :  { %v2821_v54 = vpop.xlane.xlu0 %2820 }
 0xdae   :  { %v2843_v0 = vsub.f32 %v2811_v12, %v2821_v54 }
 0xdb0   :  { %v2851_v8 = vmul.f32 1.442695, %v2843_v0 }
 0xdb1   :  { %v2824_v19 = vpop.xlane.xlu1 %2823  ;;  %v2827_v21 = vpop.xlane.xlu0 %2826 }
 0xdb2   :  { %12651 = vpow2.f32 %v2851_v8  ;;  %v2844_v22 = vsub.f32 %v2812_v40, %v2824_v19  ;;  %v2845_v17 = vsub.f32 %v2813_v58, %v2827_v21 }
 0xdb4   :  { %v2853_v5 = vmul.f32 1.442695, %v2844_v22  ;;  %v2855_v25 = vmul.f32 1.442695, %v2845_v17 }
 0xdb5   :  { %v2986_v34 = vpop.permute.xlu1 %2985  ;;  %v2833_v27 = vpop.xlane.xlu0 %2832 }
 0xdb6   :  { %12653 = vpow2.f32 %v2853_v5  ;;  %11742 = vmatpush3.msra.mxu1 %v2986_v34  ;;  %v2847_v51 = vsub.f32 %v13650_v23, %v2833_v27  ;;  %v2196_v27 = vmul.f32 %v13567_v2, %v13349_v36 }
 0xdb7   :  { %12655 = vpow2.f32 %v2855_v25  ;;  %11751 = vmatprep.subr.mxu1 %v12934_v60 }
 0xdb8   :  { %v2859_v28 = vmul.f32 1.442695, %v2847_v51 }
 0xdb9   :  { %v2830_v30 = vpop.xlane.xlu0 %2829  ;;  %v3063_v57 = vpop.permute.xlu1 %3062 }
 0xdba   :  { %v2846_v26 = vsub.f32 %v2814_v38, %v2830_v30  ;;  %v2195_v30 = vmul.f32 %v13569_v7, %v13347_v35 }
 0xdbc   :  { %v12652_v1 = vpop.eup %12651  ;;  %v2857_v50 = vmul.f32 1.442695, %v2846_v26 }
 0xdbd   :  { %v2839_v37 = vpop.xlane.xlu0 %2838  ;;  %v2867_v12 = vsel %vm990_vm6, %v12652_v1, 0.0 }
 0xdbe   :  { %2868 = vadd.xlane.f32.xlu0 %v2867_v12  ;;  %v2849_v62 = vsub.f32 %v2817_v49, %v2839_v37  ;;  %12657 = vpow2.f32 %v2857_v50 }
 0xdbf   :  { %12659 = vpow2.f32 %v2859_v28 }
 0xdc0   :  { %v13676_v11 = vpop.eup %12653  ;;  %v2863_v4 = vmul.f32 1.442695, %v2849_v62 }
 0xdc1   :  { %v13678_v39 = vpop.eup %12655  ;;  %v2909_v58 = vpop.permute.xlu0 %2908  ;;  %v2870_v40 = vsel %vm990_vm6, %v13676_v11, 0.0 }
 0xdc2   :  { %2871 = vadd.xlane.f32.xlu1 %v2870_v40  ;;  %v2873_v42 = vsel %vm990_vm6, %v13678_v39, 0.0  ;;  %11737 = vmatpush3.msra.mxu0 %v2909_v58  ;;  %12661 = vpow2.f32 %v2863_v4 }
 0xdc3   :  { %2874 = vadd.xlane.f32.xlu0 %v2873_v42  ;;  %11746 = vmatprep.subr.mxu0 %v12934_v60 }
 0xdc8   :  { %v12658_v22 = vpop.eup %12657 }
 0xdc9   :  { %v12660_v38 = vpop.eup %12659  ;;  %v2876_v23 = vsel %vm990_vm6, %v12658_v22, 0.0 }
 0xdca   :  { %v2879_v17 = vsel %vm990_vm6, %v12660_v38, 0.0 }
 0xdcc   :  { %v13694_v49 = vpop.eup %12661 }
 0xdd3   :  { %3293 = vrot.lane.b32.xlu1 %v2194_v43, %s15119_s9 }
 0xdd9   :  { %3216 = vrot.lane.b32.xlu0 %v2193_v45, %s15119_s9 }
 0xdea   :  { %v2836_v6 = vpop.xlane.xlu1 %2835 }
 0xdeb   :  { %v2848_v54 = vsub.f32 %v2816_v31, %v2836_v6 }
 0xded   :  { %v2861_v0 = vmul.f32 1.442695, %v2848_v54 }
 0xdee   :  { %v2842_v8 = vpop.xlane.xlu1 %2841 }
 0xdef   :  { %12663 = vpow2.f32 %v2861_v0  ;;  %v2850_v19 = vsub.f32 %v2818_v47, %v2842_v8  ;;  %v2885_v47 = vsel %vm990_vm6, %v13694_v49, 0.0 }
 0xdf1   :  { %v2865_v21 = vmul.f32 1.442695, %v2850_v19 }
 0xdf2   :  { %v3140_v37 = vpop.permute.xlu1 %3139 }
 0xdf3   :  { %12665 = vpow2.f32 %v2865_v21 }
 0xdf7   :  { %2877 = vadd.xlane.f32.xlu1 %v2876_v23 }
 0xdf8   :  { %2880 = vadd.xlane.f32.xlu0 %v2879_v17 }
 0xdf9   :  { %v13696_v5 = vpop.eup %12663 }
 0xdfa   :  { %v2882_v31 = vsel %vm990_vm6, %v13696_v5, 0.0 }
 0xdfb   :  { %2883 = vadd.xlane.f32.xlu1 %v2882_v31 }
 0xdfc   :  { %2886 = vadd.xlane.f32.xlu0 %v2885_v47  ;;  %v11002_v47 = vld [vmem:[%s15116_s24 + $0x30] sm:$0xff] }
 0xdfd   :  { %v13702_v25 = vpop.eup %12665 }
 0xdfe   :  { %v2888_v34 = vsel %vm990_vm6, %v13702_v25, 0.0 }
 0xdff   :  { %2889 = vadd.xlane.f32.xlu1 %v2888_v34  ;;  %v11003_v34 = vld [vmem:[%s15116_s24 + $0x38] sm:$0xff] }
 0xe10   :  { %3447 = vrot.lane.b32.xlu1 %v2196_v27, %s15119_s9 }
 0xe12   :  { %3370 = vrot.lane.b32.xlu0 %v2195_v30, %s15119_s9 }
 0xe4b   :  { %v2869_v12 = vpop.xlane.xlu0 %2868 }
 0xe4c   :  { %12667 = vrcp.f32 %v2869_v12 }
 0xe4f   :  { %v2872_v58 = vpop.xlane.xlu1 %2871 }
 0xe50   :  { %12669 = vrcp.f32 %v2872_v58  ;;  %v2875_v40 = vpop.xlane.xlu0 %2874  ;;  %v13756_v58 = vsub.s32 6, %v13147_v44 }
 0xe51   :  { %12671 = vrcp.f32 %v2875_v40  ;;  %v13761_v40 = vld [vmem:[%s15079_s11] sm:$0xff] }
 0xe54   :  { %v3217_v26 = vpop.permute.xlu0 %3216 }
 0xe56   :  { %v12668_v42 = vpop.eup %12667 }
 0xe57   :  { %v2899_v43 = vmul.f32 %v12668_v42, %v12652_v1  ;;  %v3532_v42 = vrot.slane %v13761_v40, %v13756_v58 }
 0xe59   :  { %11739 = vmatmul.mubr.msk.f32.vlgmr.msra.gmra.mrb[18].mxu0 %vm990_vm6, %v2899_v43 }
 0xe5a   :  { %v12670_v45 = vpop.eup %12669  ;;  %11747 = vmatpush3.msra.mxu0 %v3063_v57  ;;  %11748 = vmatprep.mubr.msk.f32.mxu0 %vm12935_vm5, %v12934_v60 }
 0xe5b   :  { %v2900_v2 = vmul.f32 %v12670_v45, %v13676_v11  ;;  %11756 = vmatprep.subr.mxu0 %v12934_v60  ;;  %v12672_v7 = vpop.eup %12671  ;;  %v3294_v11 = vpop.permute.xlu1 %3293 }
 0xe5c   :  { %v2901_v1 = vmul.f32 %v12672_v7, %v13678_v39 }
 0xe5d   :  { %11744 = vmatmul.mubr.msk.f32.vlgmr.msra.gmra.mrb[28].mxu1 %vm990_vm6, %v2900_v2 }
 0xe5e   :  { %11752 = vmatpush3.msra.mxu1 %v3140_v37  ;;  %11753 = vmatprep.mubr.msk.f32.mxu1 %vm12935_vm5, %v12934_v60 }
 0xe5f   :  { %11761 = vmatprep.subr.mxu1 %v12934_v60 }
 0xe61   :  { %11749 = vmatmul.mubr.msk.f32.vlgmr.msra.gmra.mrb[18].mxu0 %vm990_vm6, %v2901_v1 }
 0xe62   :  { %11757 = vmatpush3.msra.mxu0 %v3217_v26  ;;  %11758 = vmatprep.mubr.msk.f32.mxu0 %vm12935_vm5, %v12934_v60 }
 0xe63   :  { %11766 = vmatprep.subr.mxu0 %v12934_v60 }
 0xe84   :  { %v2878_v51 = vpop.xlane.xlu1 %2877 }
 0xe85   :  { %12673 = vrcp.f32 %v2878_v51  ;;  %v2881_v50 = vpop.xlane.xlu0 %2880  ;;  %v13776_v51 = vld [vmem:[%s15120_s25] sm:$0xff] }
 0xe86   :  { %12675 = vrcp.f32 %v2881_v50 }
 0xe88   :  { %v2884_v28 = vpop.xlane.xlu1 %2883 }
 0xe89   :  { %v2887_v57 = vpop.xlane.xlu0 %2886  ;;  %12677 = vrcp.f32 %v2884_v28 }
 0xe8a   :  { %12679 = vrcp.f32 %v2887_v57 }
 0xe8c   :  { %v2890_v4 = vpop.xlane.xlu1 %2889 }
 0xe8d   :  { %12681 = vrcp.f32 %v2890_v4  ;;  %v3371_v0 = vpop.permute.xlu0 %3370 }
 0xe8f   :  { %v12674_v39 = vpop.eup %12673 }
 0xe90   :  { %v12676_v62 = vpop.eup %12675  ;;  %v2902_v6 = vmul.f32 %v12674_v39, %v12658_v22 }
 0xe91   :  { %v2903_v54 = vmul.f32 %v12676_v62, %v12660_v38  ;;  %v3448_v38 = vpop.permute.xlu1 %3447 }
 0xe92   :  { %11754 = vmatmul.mubr.msk.f32.vlgmr.msra.gmra.mrb[28].mxu1 %vm990_vm6, %v2902_v6 }
 0xe93   :  { %11759 = vmatmul.mubr.msk.f32.vlgmr.msra.gmra.mrb[18].mxu0 %vm990_vm6, %v2903_v54  ;;  %11762 = vmatpush3.msra.mxu1 %v3294_v11  ;;  %v12678_v8 = vpop.eup %12677 }
 0xe94   :  { %11767 = vmatpush3.msra.mxu0 %v3371_v0  ;;  %11763 = vmatprep.mubr.msk.f32.mxu1 %vm12935_vm5, %v12934_v60  ;;  %v12680_v19 = vpop.eup %12679  ;;  %v2904_v21 = vmul.f32 %v12678_v8, %v13696_v5  ;;  %v11000_v5 = vld [vmem:[%s15116_s24 + $0x20] sm:$0xff] }
 0xe95   :  { %11768 = vmatprep.mubr.msk.f32.mxu0 %vm12935_vm5, %v12934_v60  ;;  %11771 = vmatprep.subr.mxu1 %v12934_v60  ;;  %v2905_v22 = vmul.f32 %v12680_v19, %v13694_v49  ;;  %v11001_v49 = vld [vmem:[%s15116_s24 + $0x28] sm:$0xff] }
 0xe96   :  { %v12355_v31 = vpack.c.bf16 %v11001_v49, %v11000_v5 }
 0xe97   :  { %v12682_v23 = vpop.eup %12681 }
 0xe98   :  { %v2906_v17 = vmul.f32 %v12682_v23, %v13702_v25  ;;  %v12359_v25 = vpack.c.bf16 %v11003_v34, %v11002_v47  ;;  %12356 = vmatprep.subr.bf16.mxu0 %v12355_v31 }
 0xe9a   :  { %11764 = vmatmul.mubr.msk.f32.vlgmr.msra.gmra.mrb[28].mxu1 %vm990_vm6, %v2904_v21 }
 0xe9b   :  { %11769 = vmatmul.mubr.msk.f32.vlgmr.msra.gmra.mrb[18].mxu0 %vm990_vm6, %v2905_v22  ;;  %11772 = vmatpush3.msra.mxu1 %v3448_v38 }
 0xe9c   :  { %11773 = vmatprep.mubr.msk.f32.mxu1 %vm12935_vm5, %v12934_v60  ;;  %12358 = vmatpush3.bf16.msra.mxu0 %v12355_v31 }
 0xe9d   :  { %12360 = vmatprep.subr.bf16.mxu0 %v12359_v25 }
 0xea0   :  { %12362 = vmatpush3.bf16.msra.mxu0 %v12359_v25 }
 0xea2   :  { %11774 = vmatmul.mubr.msk.f32.vlgmr.msra.gmra.mrb[28].mxu1 %vm990_vm6, %v2906_v17 }
 0xf6e   :  { %v3442_v27 = vpop.f32.mrb[18].mxu0 }
 0xf6f   :  { %v11770_v30 = vpop.f32.mrb[19].mxu0  ;;  %11784 = vmatprep.mubr.msk.f32.mxu0 %vm94_vm0, %v3442_v27  ;;  %v11030_v27 = vld [vmem:[%s15117_s5 + $0x20] sm:$0xff] }
 0xf70   :  { %v11031_v30 = vld [vmem:[%s15117_s5 + $0x28] sm:$0xff] }
 0xf75   :  { %v3519_v37 = vpop.f32.mrb[28].mxu1 }
 0xf76   :  { %v11775_v12 = vpop.f32.mrb[29].mxu1  ;;  %11785 = vmatmul.mubr.msk.f32.vlgmr.msra.gmra.mrb[20].mxu0 %vm94_vm0, %v3519_v37  ;;  %v11032_v37 = vld [vmem:[%s15117_s5 + $0x30] sm:$0xff] }
 0xf77   :  { %v12363_v12 = vpack.c.bf16 %v11031_v30, %v11030_v27 }
 0xf79   :  { %12364 = vmatprep.subr.bf16.mxu1 %v12363_v12 }
 0xf7a   :  { %12366 = vmatpush3.bf16.msra.mxu1 %v12363_v12 }
0x1049   :  { %v11786_v43 = vpop.f32.mrb[20].mxu0 }
0x104a   :  { %v3611_v45 = vadd.f32 %v11786_v43, %v3532_v42  ;;  %v3605_v2 = vpop.f32.mrb[21].mxu0 }
0x104b   :  { %v3606_v7 = vadd.f32 %v3605_v2, %v3532_v42  ;;  %v11033_v42 = vld [vmem:[%s15117_s5 + $0x38] sm:$0xff]  ;;  %v3967_v2 = vld [vmem:[%s15080_s12 + $0x8] sm:$0xff]  ;;  %s15121_s5 = sld [smem:[#allocation8_spill]] }
0x104c   :  { %v13766_v1 = vadd.f32 %v3611_v45, %v13525_v55  ;;  %v3914_v55 = vsel %vm94_vm0, %v13776_v51, 0.0  ;;  %v12367_v43 = vpack.c.bf16 %v11033_v42, %v11032_v37  ;;  %v3966_v45 = vld [vmem:[%s15080_s12] sm:$0xff] }
0x104d   :  { %v13769_v26 = vadd.f32 %v3606_v7, %v13528_v56  ;;  %v13785_v56 = vld [vmem:[%s15120_s25 + $0x8] sm:$0xff]  ;;  %v13831_v7 = vpack.c.bf16 %v3967_v2, %v3966_v45 }
0x104e   :  { %v3619_v11 = vsel %vm94_vm0, %v13766_v1, 0.0  ;;  %v3917_v28 = vsel %vm94_vm0, %v13785_v56, 0.0  ;;  %12368 = vmatprep.subr.bf16.mxu1 %v12367_v43 }
0x104f   :  { %3620 = vadd.xlane.f32.xlu1 %v3619_v11  ;;  %v3616_v50 = vsel %vm94_vm0, %v13769_v26, 0.0  ;;  %12370 = vmatpush3.bf16.msra.mxu1 %v12367_v43  ;;  %v11035_v11 = vld [vmem:[%s15076_s8 + $0x40] sm:$0xff] }
0x1050   :  { %3617 = vadd.xlane.f32.xlu0 %v3616_v50  ;;  %12388 = vmatprep.subr.bf16.mxu1 %v13831_v7  ;;  %v11036_v50 = vld [vmem:[%s15076_s8 + $0x48] sm:$0xff] }
0x1054   :  { %3915 = vadd.xlane.f32.xlu0 %v3914_v55  ;;  %v11037_v55 = vld [vmem:[%s15076_s8 + $0x50] sm:$0xff] }
0x1058   :  { %3918 = vadd.xlane.f32.xlu0 %v3917_v28  ;;  %v12371_v28 = vpack.c.bf16 %v11036_v50, %v11035_v11 }
0x105a   :  { %12372 = vmatprep.subr.bf16.mxu0 %v12371_v28 }
0x105b   :  { %12374 = vmatpush3.bf16.msra.mxu0 %v12371_v28 }
0x10dc   :  { %v3621_v57 = vpop.xlane.xlu1 %3620 }
0x10dd   :  { %v3623_v39 = vmul.f32 0.03125, %v3621_v57  ;;  %v3618_v62 = vpop.xlane.xlu0 %3617  ;;  %v11038_v57 = vld [vmem:[%s15076_s8 + $0x58] sm:$0xff] }
0x10de   :  { %v3622_v4 = vmul.f32 0.03125, %v3618_v62  ;;  %v11039_v62 = vld [vmem:[%s15076_s8 + $0x60] sm:$0xff] }
0x10df   :  { %v13790_v6 = vsub.f32 %v13766_v1, %v3623_v39  ;;  %v12375_v39 = vpack.c.bf16 %v11038_v57, %v11037_v55 }
0x10e0   :  { %v13793_v54 = vsub.f32 %v13769_v26, %v3622_v4  ;;  %v11040_v4 = vld [vmem:[%s15076_s8 + $0x68] sm:$0xff] }
0x10e1   :  { %v3916_v0 = vpop.xlane.xlu0 %3915  ;;  %v3627_v8 = vmul.f32 %v13790_v6, %v13790_v6  ;;  %12376 = vmatprep.subr.bf16.mxu0 %v12375_v39 }
0x10e2   :  { %v3920_v19 = vmul.f32 0.03125, %v3916_v0  ;;  %v3626_v21 = vmul.f32 %v13793_v54, %v13793_v54  ;;  %v12379_v0 = vpack.c.bf16 %v11040_v4, %v11039_v62  ;;  %12378 = vmatpush3.bf16.msra.mxu0 %v12375_v39 }
0x10e3   :  { %v3631_v22 = vsel %vm94_vm0, %v3627_v8, 0.0 }
0x10e4   :  { %v13801_v38 = vsub.f32 %v13776_v51, %v3920_v19  ;;  %3632 = vadd.xlane.f32.xlu1 %v3631_v22  ;;  %v3628_v23 = vsel %vm94_vm0, %v3626_v21, 0.0  ;;  %12380 = vmatprep.subr.bf16.mxu0 %v12379_v0 }
0x10e5   :  { %3629 = vadd.xlane.f32.xlu0 %v3628_v23  ;;  %v3919_v17 = vpop.xlane.xlu0 %3918 }
0x10e6   :  { %v3921_v5 = vmul.f32 0.03125, %v3919_v17  ;;  %v3924_v49 = vmul.f32 %v13801_v38, %v13801_v38  ;;  %12382 = vmatpush3.bf16.msra.mxu0 %v12379_v0 }
0x10e8   :  { %v13807_v31 = vsub.f32 %v13785_v56, %v3921_v5  ;;  %v3926_v47 = vsel %vm94_vm0, %v3924_v49, 0.0 }
0x10e9   :  { %3927 = vadd.xlane.f32.xlu0 %v3926_v47 }
0x10ea   :  { %v3925_v34 = vmul.f32 %v13807_v31, %v13807_v31 }
0x10ec   :  { %v3929_v25 = vsel %vm94_vm0, %v3925_v34, 0.0 }
0x10ed   :  { %3930 = vadd.xlane.f32.xlu1 %v3929_v25 }
0x1171   :  { %v3633_v8 = vpop.xlane.xlu1 %3632 }
0x1172   :  { %v3635_v19 = vmul.f32 0.032258064, %v3633_v8  ;;  %v3630_v21 = vpop.xlane.xlu0 %3629 }
0x1173   :  { %v3634_v22 = vmul.f32 0.032258064, %v3630_v21 }
0x1174   :  { %12683 = vrsqrt.f32 %v3635_v19  ;;  %vm3645_vm1 = vcmp.eq.f32.partialorder %v3635_v19, inf  ;;  %v3648_v27 = vand.u32 2147483648, %v3635_v19  ;;  %vm3647_vm2 = vcmp.eq.f32.partialorder %v3635_v19, 0.0 }
0x1175   :  { %12685 = vrsqrt.f32 %v3634_v22  ;;  %vm3638_vm3 = vcmp.eq.f32.partialorder %v3634_v22, inf  ;;  %v3641_v12 = vand.u32 2147483648, %v3634_v22  ;;  %vm3640_vm4 = vcmp.eq.f32.partialorder %v3634_v22, 0.0 }
0x1176   :  { %v3928_v23 = vpop.xlane.xlu0 %3927 }
0x1177   :  { %v3932_v17 = vmul.f32 0.032258064, %v3928_v23  ;;  %v3659_v23 = vrot.slane %v13554_v52, %v13150_v46 }
0x1179   :  { %12687 = vrsqrt.f32 %v3932_v17  ;;  %vm3936_vm7 = vcmp.eq.f32.partialorder %v3932_v17, inf  ;;  %v3939_v28 = vand.u32 2147483648, %v3932_v17  ;;  %vm3938_vm8 = vcmp.eq.f32.partialorder %v3932_v17, 0.0 }
0x117a   :  { %v3931_v5 = vpop.xlane.xlu1 %3930 }
0x117b   :  { %v3933_v49 = vmul.f32 0.032258064, %v3931_v5 }
0x117d   :  { %12689 = vrsqrt.f32 %v3933_v49  ;;  %vm3943_vm9 = vcmp.eq.f32.partialorder %v3933_v49, inf  ;;  %v3946_v8 = vand.u32 2147483648, %v3933_v49  ;;  %vm3945_vm10 = vcmp.eq.f32.partialorder %v3933_v49, 0.0 }
0x117e   :  { %v12684_v47 = vpop.eup %12683 }
0x117f   :  { %v12686_v34 = vpop.eup %12685  ;;  %v3644_v25 = vmul.f32 %v12684_v47, %v3635_v19 }
0x1180   :  { %v3637_v30 = vmul.f32 %v12686_v34, %v3634_v22  ;;  %v13858_v34 = vld [vmem:[%s15090_s22] sm:$0xff] }
0x1181   :  { %v3646_v37 = vsel %vm3645_vm1, %v3635_v19, %v3644_v25 }
0x1182   :  { %v3649_v42 = vsel %vm3647_vm2, %v3648_v27, %v3646_v37  ;;  %v3639_v43 = vsel %vm3638_vm3, %v3634_v22, %v3637_v30  ;;  %v3968_v37 = vld [vmem:[%s15080_s12 + $0x10] sm:$0xff] }
0x1183   :  { %v12688_v45 = vpop.eup %12687  ;;  %v3651_v2 = vadd.f32 1e-06, %v3649_v42  ;;  %v3642_v11 = vsel %vm3640_vm4, %v3641_v12, %v3639_v43  ;;  %v3957_v12 = vrot.slane %v13858_v34, %v13493_v41 }
0x1184   :  { %v3650_v50 = vadd.f32 1e-06, %v3642_v11  ;;  %v3935_v55 = vmul.f32 %v12688_v45, %v3932_v17 }
0x1185   :  { %12691 = vrcp.f32 %v3651_v2 }
0x1186   :  { %v3937_v57 = vsel %vm3936_vm7, %v3932_v17, %v3935_v55  ;;  %12693 = vrcp.f32 %v3650_v50 }
0x1187   :  { %v12690_v39 = vpop.eup %12689  ;;  %v3940_v62 = vsel %vm3938_vm8, %v3939_v28, %v3937_v57 }
0x1188   :  { %v3948_v4 = vadd.f32 1e-06, %v3940_v62  ;;  %v3942_v0 = vmul.f32 %v12690_v39, %v3933_v49  ;;  %v11043_v62 = vld [vmem:[%s15078_s10 + $0x1] ss:$0 sm:$0xff] }
0x118a   :  { %v3944_v19 = vsel %vm3943_vm9, %v3933_v49, %v3942_v0  ;;  %12695 = vrcp.f32 %v3948_v4  ;;  %v3665_v49 = vrot.slane %v13554_v52, %v13158_v48  ;;  %v3963_v52 = vrot.slane %v13858_v34, %v13496_v15 }
0x118b   :  { %v3947_v21 = vsel %vm3945_vm10, %v3946_v8, %v3944_v19 }
0x118c   :  { %v3949_v22 = vadd.f32 1e-06, %v3947_v21 }
0x118e   :  { %12697 = vrcp.f32 %v3949_v22 }
0x118f   :  { %v12692_v5 = vpop.eup %12691 }
0x1190   :  { %v12694_v47 = vpop.eup %12693  ;;  %v3655_v17 = vmul.f32 %v12692_v5, %v13790_v6  ;;  %v3969_v6 = vld [vmem:[%s15080_s12 + $0x18] sm:$0xff] }
0x1191   :  { %v3654_v25 = vmul.f32 %v12694_v47, %v13793_v54  ;;  %v12391_v2 = vpack.c.bf16 %v3969_v6, %v3968_v37 }
0x1192   :  { %v3661_v27 = vmul.f32 %v3659_v23, %v3655_v17 }
0x1193   :  { %v3660_v30 = vmul.f32 %v3659_v23, %v3654_v25  ;;  %v11048_v23 = vld [vmem:[%s15087_s19] ss:$0 sm:$0xff] }
0x1194   :  { %v12696_v42 = vpop.eup %12695  ;;  %v3667_v45 = vadd.f32 %v3665_v49, %v3661_v27 }
0x1195   :  { %v3666_v43 = vadd.f32 %v3665_v49, %v3660_v30  ;;  %v3952_v54 = vmul.f32 %v12696_v42, %v13801_v38 }
0x1197   :  { %11795 = vmatprep.mubr.msk.f32.mxu1 %vm94_vm0, %v3666_v43  ;;  %v3958_v11 = vmul.f32 %v3957_v12, %v3952_v54 }
0x1198   :  { %v12698_v50 = vpop.eup %12697  ;;  %11796 = vmatmul.mubr.msk.f32.vlgmr.msra.gmra.mrb[30].mxu1 %vm94_vm0, %v3667_v45 }
0x1199   :  { %12390 = vmatpush3.bf16.msra.mxu1 %v13831_v7  ;;  %v3953_v55 = vmul.f32 %v12698_v50, %v13807_v31  ;;  %v3964_v28 = vadd.f32 %v3963_v52, %v3958_v11  ;;  %v11041_v7 = vld [vmem:[%s15076_s8 + $0x70] sm:$0xff]  ;;  %v11042_v31 = vld [vmem:[%s15076_s8 + $0x78] sm:$0xff] }
0x119a   :  { %12392 = vmatprep.subr.bf16.mxu1 %v12391_v2  ;;  %v12383_v39 = vpack.c.bf16 %v11042_v31, %v11041_v7  ;;  %v85_v7 = vld [vmem:[%s15121_s5] sm:$0xff] }
0x119b   :  { %v3959_v57 = vmul.f32 %v3957_v12, %v3953_v55  ;;  %11825 = vmatprep.mubr.msk.f32.mxu1 %vm94_vm0, %v3964_v28 }
0x119c   :  { %12384 = vmatprep.subr.bf16.mxu0 %v12383_v39 }
0x119d   :  { %v3965_v38 = vadd.f32 %v3963_v52, %v3959_v57  ;;  %12394 = vmatpush3.bf16.msra.mxu1 %v12391_v2  ;;  %12386 = vmatpush3.bf16.msra.mxu0 %v12383_v39 }
0x119e   :  { %11828 = vmatprep.subr.mxu1 %v12934_v60  ;;  %11838 = vmatprep.subr.mxu0 %v12934_v60 }
0x11a0   :  { %11826 = vmatmul.mubr.msk.f32.vlgmr.msra.gmra.mrb[32].mxu1 %vm94_vm0, %v3965_v38 }
0x11a1   :  { %11830 = vmatprep.mubr.msk.f32.mxu1 %vm12935_vm5, %v12934_v60 }
0x126b   :  { %v11797_v4 = vpop.f32.mrb[30].mxu1 }
0x126c   :  { %v3768_v0 = vadd.f32 %v11797_v4, %v11043_v62  ;;  %v3762_v8 = vpop.f32.mrb[31].mxu1 }
0x126d   :  { %v3763_v19 = vadd.f32 %v11043_v62, %v3762_v8 }
0x126e   :  { %v3772_v22 = vmax.f32 %v3768_v0, 0.0 }
0x126f   :  { %v3771_v21 = vmax.f32 %v3763_v19, 0.0  ;;  %v86_v19 = vld [vmem:[%s15121_s5 + $0x8] sm:$0xff] }
0x1271   :  { %11814 = vmatprep.mubr.msk.f32.mxu0 %vm1946_vm11, %v3771_v21 }
0x1272   :  { %11815 = vmatmul.mubr.msk.f32.vlgmr.msra.gmra.mrb[22].mxu0 %vm1946_vm11, %v3772_v22 }
0x1273   :  { %v11827_v5 = vpop.f32.mrb[32].mxu1  ;;  %11840 = vmatprep.mubr.msk.f32.mxu0 %vm12935_vm5, %v12934_v60 }
0x1274   :  { %v13900_v47 = vadd.f32 %v11827_v5, %v11048_v23  ;;  %v4049_v17 = vpop.f32.mrb[33].mxu1 }
0x1275   :  { %v13902_v25 = vadd.f32 %v11048_v23, %v4049_v17 }
0x1276   :  { %v4063_v49 = vmul.f32 %v13900_v47, %v13168_v59  ;;  %v4065_v6 = vmul.f32 %v13900_v47, %v13181_v63  ;;  %v4067_v42 = vmul.f32 %v13900_v47, %v13194_v9  ;;  %v4069_v43 = vmul.f32 %v13900_v47, %v13207_v14 }
0x1277   :  { %v4062_v27 = vmul.f32 %v13902_v25, %v13183_v3  ;;  %v4064_v30 = vmul.f32 %v13902_v25, %v13172_v61  ;;  %v4066_v37 = vmul.f32 %v13902_v25, %v13197_v10  ;;  %v4068_v12 = vmul.f32 %v13902_v25, %v13211_v16 }
0x1278   :  { %4157 = vrot.lane.b32.xlu1 %v4063_v49, %s15118_s0 }
0x1279   :  { %4079 = vrot.lane.b32.xlu0 %v4062_v27, %s15118_s0 }
0x127c   :  { %4235 = vrot.lane.b32.xlu1 %v4064_v30, %s15118_s0 }
0x127d   :  { %4385 = vrot.lane.b32.xlu0 %v4066_v37, %s15118_s0 }
0x1280   :  { %4310 = vrot.lane.b32.xlu1 %v4065_v6, %s15118_s0 }
0x1281   :  { %4535 = vrot.lane.b32.xlu0 %v4068_v12, %s15118_s0 }
0x1284   :  { %4460 = vrot.lane.b32.xlu1 %v4067_v42, %s15118_s0 }
0x1288   :  { %4610 = vrot.lane.b32.xlu1 %v4069_v43, %s15118_s0 }
0x12ea   :  { %v4158_v54 = vpop.permute.xlu1 %4157 }
0x12eb   :  { %v4080_v52 = vpop.permute.xlu0 %4079 }
0x12ec   :  { %11829 = vmatpush3.xpose.msk.msra.mxu1 %vm94_vm0, %v4080_v52 }
0x12ed   :  { %11833 = vmatprep.subr.mxu1 %v12934_v60 }
0x12ee   :  { %v4236_v45 = vpop.permute.xlu1 %4235 }
0x12ef   :  { %11831 = vmatmul.mubr.msk.f32.vlgmr.msra.gmra.mrb[34].mxu1 %vm94_vm0, %v13902_v25  ;;  %11839 = vmatpush3.xpose.msk.msra.mxu0 %vm94_vm0, %v4236_v45  ;;  %v4386_v2 = vpop.permute.xlu0 %4385 }
0x12f0   :  { %11834 = vmatpush3.xpose.msk.msra.mxu1 %vm94_vm0, %v4158_v54  ;;  %11848 = vmatprep.subr.mxu0 %v12934_v60 }
0x12f1   :  { %11835 = vmatprep.mubr.msk.f32.mxu1 %vm12935_vm5, %v12934_v60  ;;  %11843 = vmatprep.subr.mxu1 %v12934_v60 }
0x12f2   :  { %11841 = vmatmul.mubr.msk.f32.vlgmr.msra.gmra.mrb[24].mxu0 %vm94_vm0, %v13902_v25  ;;  %v4311_v11 = vpop.permute.xlu1 %4310 }
0x12f3   :  { %11836 = vmatmul.mubr.msk.f32.vlgmr.msra.gmra.mrb[36].mxu1 %vm94_vm0, %v13900_v47  ;;  %11849 = vmatpush3.xpose.msk.msra.mxu0 %vm94_vm0, %v4386_v2  ;;  %v4536_v50 = vpop.permute.xlu0 %4535 }
0x12f4   :  { %11844 = vmatpush3.xpose.msk.msra.mxu1 %vm94_vm0, %v4311_v11  ;;  %11850 = vmatprep.mubr.msk.f32.mxu0 %vm12935_vm5, %v12934_v60 }
0x12f5   :  { %11845 = vmatprep.mubr.msk.f32.mxu1 %vm12935_vm5, %v12934_v60  ;;  %11858 = vmatprep.subr.mxu0 %v12934_v60 }
0x12f6   :  { %v4461_v55 = vpop.permute.xlu1 %4460  ;;  %11851 = vmatmul.mubr.msk.f32.vlgmr.msra.gmra.mrb[26].mxu0 %vm94_vm0, %v13902_v25  ;;  %11853 = vmatprep.subr.mxu1 %v12934_v60 }
0x12f7   :  { %11846 = vmatmul.mubr.msk.f32.vlgmr.msra.gmra.mrb[38].mxu1 %vm94_vm0, %v13900_v47  ;;  %11859 = vmatpush3.xpose.msk.msra.mxu0 %vm94_vm0, %v4536_v50 }
0x12f8   :  { %11854 = vmatpush3.xpose.msk.msra.mxu1 %vm94_vm0, %v4461_v55  ;;  %11860 = vmatprep.mubr.msk.f32.mxu0 %vm12935_vm5, %v12934_v60 }
0x12f9   :  { %11855 = vmatprep.mubr.msk.f32.mxu1 %vm12935_vm5, %v12934_v60  ;;  %11863 = vmatprep.subr.mxu1 %v12934_v60 }
0x12fa   :  { %v4611_v28 = vpop.permute.xlu1 %4610  ;;  %11861 = vmatmul.mubr.msk.f32.vlgmr.msra.gmra.mrb[28].mxu0 %vm94_vm0, %v13902_v25  ;;  %11868 = vmatprep.subr.mxu0 %v12934_v60 }
0x12fb   :  { %11856 = vmatmul.mubr.msk.f32.vlgmr.msra.gmra.mrb[40].mxu1 %vm94_vm0, %v13900_v47  ;;  %11870 = vmatprep.mubr.msk.f32.mxu0 %vm12935_vm5, %v12934_v60 }
0x12fc   :  { %11864 = vmatpush3.xpose.msk.msra.mxu1 %vm94_vm0, %v4611_v28  ;;  %11865 = vmatprep.mubr.msk.f32.mxu1 %vm12935_vm5, %v12934_v60 }
0x12fd   :  { %11873 = vmatprep.subr.mxu1 %v12934_v60 }
0x12ff   :  { %11866 = vmatmul.mubr.msk.f32.vlgmr.msra.gmra.mrb[42].mxu1 %vm94_vm0, %v13900_v47 }
0x1300   :  { %11875 = vmatprep.mubr.msk.f32.mxu1 %vm12935_vm5, %v12934_v60 }
0x1345   :  { %v13976_v57 = vpop.f32.mrb[22].mxu0 }
0x1346   :  { %v13978_v38 = vpop.f32.mrb[23].mxu0 }
0x13c2   :  { %v4152_v31 = vpop.f32.mrb[34].mxu1 }
0x13c3   :  { %v4684_v39 = vmul.f32 0.35355338, %v4152_v31  ;;  %v11832_v62 = vpop.f32.mrb[35].mxu1 }
0x13c5   :  { %v4692_v4 = vadd.f32 %v4684_v39, %v85_v7  ;;  %v4305_v0 = vpop.f32.mrb[24].mxu0 }
0x13c6   :  { %v4686_v8 = vmul.f32 0.35355338, %v4305_v0  ;;  %v4230_v21 = vpop.f32.mrb[36].mxu1  ;;  %v11842_v22 = vpop.f32.mrb[25].mxu0 }
0x13c7   :  { %v4685_v23 = vmul.f32 0.35355338, %v4230_v21  ;;  %v11837_v5 = vpop.f32.mrb[37].mxu1  ;;  %v4700_v17 = vsel %vm990_vm6, %v4692_v4, -inf }
0x13c8   :  { %v4694_v49 = vadd.f32 %v4686_v8, %v85_v7  ;;  %4701 = vmax.xlane.f32.xlu0 %v4700_v17  ;;  %v4072_v5 = vmul.f32 %v13902_v25, %v13317_v18 }
0x13c9   :  { %v4693_v27 = vadd.f32 %v4685_v23, %v86_v19  ;;  %v4455_v30 = vpop.f32.mrb[26].mxu0  ;;  %v4071_v23 = vmul.f32 %v13900_v47, %v13311_v13 }
0x13ca   :  { %v4688_v37 = vmul.f32 0.35355338, %v4455_v30  ;;  %v4380_v6 = vpop.f32.mrb[38].mxu1  ;;  %v11852_v12 = vpop.f32.mrb[27].mxu0  ;;  %v4706_v42 = vsel %vm990_vm6, %v4694_v49, -inf }
0x13cb   :  { %v4687_v43 = vmul.f32 0.35355338, %v4380_v6  ;;  %v11847_v54 = vpop.f32.mrb[39].mxu1  ;;  %v4703_v52 = vsel %vm990_vm6, %v4693_v27, -inf }
0x13cc   :  { %v13989_v45 = vadd.f32 %v4688_v37, %v85_v7  ;;  %4707 = vmax.xlane.f32.xlu0 %v4706_v42  ;;  %4704 = vmax.xlane.f32.xlu1 %v4703_v52 }
0x13cd   :  { %v4605_v2 = vpop.f32.mrb[28].mxu0  ;;  %v13993_v28 = vadd.f32 %v4687_v43, %v86_v19  ;;  %v4073_v43 = vmul.f32 %v13900_v47, %v13338_v29 }
0x13ce   :  { %v4530_v11 = vpop.f32.mrb[40].mxu1  ;;  %v11862_v50 = vpop.f32.mrb[29].mxu0  ;;  %v4712_v55 = vsel %vm990_vm6, %v13989_v45, -inf  ;;  %v4690_v31 = vmul.f32 0.35355338, %v4605_v2 }
0x13cf   :  { %v11857_v39 = vpop.f32.mrb[41].mxu1  ;;  %v4709_v21 = vsel %vm990_vm6, %v13993_v28, -inf  ;;  %v4689_v17 = vmul.f32 0.35355338, %v4530_v11 }
0x13d0   :  { %4713 = vmax.xlane.f32.xlu0 %v4712_v55  ;;  %v13995_v0 = vadd.f32 %v4690_v31, %v85_v7  ;;  %v4070_v7 = vmul.f32 %v13902_v25, %v13323_v20 }
0x13d1   :  { %v4697_v30 = vadd.f32 %v4689_v17, %v86_v19 }
0x13d2   :  { %v4680_v62 = vpop.f32.mrb[42].mxu1  ;;  %v4718_v22 = vsel %vm990_vm6, %v13995_v0, -inf }
0x13d3   :  { %v11867_v8 = vpop.f32.mrb[43].mxu1  ;;  %v4691_v37 = vmul.f32 0.35355338, %v4680_v62  ;;  %v4715_v12 = vsel %vm990_vm6, %v4697_v30, -inf }
0x13d4   :  { %4710 = vmax.xlane.f32.xlu0 %v4709_v21 }
0x13d5   :  { %v4699_v6 = vadd.f32 %v4691_v37, %v86_v19  ;;  %v4075_v37 = vmul.f32 %v13900_v47, %v13345_v33 }
0x13d7   :  { %v4721_v42 = vsel %vm990_vm6, %v4699_v6, -inf }
0x13d8   :  { %4719 = vmax.xlane.f32.xlu0 %v4718_v22 }
0x13dd   :  { %4866 = vrot.lane.b32.xlu1 %v4071_v23, %s15119_s9 }
0x13e1   :  { %4943 = vrot.lane.b32.xlu1 %v4072_v5, %s15119_s9 }
0x13ee   :  { %4789 = vrot.lane.b32.xlu0 %v4070_v7, %s15119_s9 }
0x1405   :  { %4716 = vmax.xlane.f32.xlu1 %v4715_v12  ;;  %v4074_v12 = vmul.f32 %v13902_v25, %v13343_v32 }
0x1409   :  { %4722 = vmax.xlane.f32.xlu1 %v4721_v42 }
0x141a   :  { %5020 = vrot.lane.b32.xlu1 %v4073_v43, %s15119_s9 }
0x1455   :  { %v4702_v54 = vpop.xlane.xlu0 %4701 }
0x1456   :  { %v4724_v52 = vsub.f32 %v4692_v4, %v4702_v54 }
0x1458   :  { %v4732_v2 = vmul.f32 1.442695, %v4724_v52 }
0x1459   :  { %v4705_v50 = vpop.xlane.xlu1 %4704  ;;  %v4708_v55 = vpop.xlane.xlu0 %4707 }
0x145a   :  { %12699 = vpow2.f32 %v4732_v2  ;;  %v4725_v11 = vsub.f32 %v4693_v27, %v4705_v50  ;;  %v4726_v31 = vsub.f32 %v4694_v49, %v4708_v55 }
0x145c   :  { %v4734_v19 = vmul.f32 1.442695, %v4725_v11  ;;  %v4736_v39 = vmul.f32 1.442695, %v4726_v31 }
0x145d   :  { %v4867_v62 = vpop.permute.xlu1 %4866  ;;  %v4714_v8 = vpop.xlane.xlu0 %4713 }
0x145e   :  { %12701 = vpow2.f32 %v4734_v19  ;;  %11874 = vmatpush3.msra.mxu1 %v4867_v62  ;;  %v4728_v43 = vsub.f32 %v13989_v45, %v4714_v8 }
0x145f   :  { %12703 = vpow2.f32 %v4736_v39  ;;  %11883 = vmatprep.subr.mxu1 %v12934_v60 }
0x1460   :  { %v4740_v52 = vmul.f32 1.442695, %v4728_v43 }
0x1461   :  { %v4711_v21 = vpop.xlane.xlu0 %4710  ;;  %v4944_v2 = vpop.permute.xlu1 %4943 }
0x1462   :  { %v4727_v42 = vsub.f32 %v13993_v28, %v4711_v21 }
0x1464   :  { %v14016_v22 = vpop.eup %12699  ;;  %v4738_v54 = vmul.f32 1.442695, %v4727_v42 }
0x1465   :  { %v4720_v23 = vpop.xlane.xlu0 %4719  ;;  %v4748_v4 = vsel %vm990_vm6, %v14016_v22, 0.0 }
0x1466   :  { %4749 = vadd.xlane.f32.xlu0 %v4748_v4  ;;  %v4730_v50 = vsub.f32 %v13995_v0, %v4720_v23  ;;  %12705 = vpow2.f32 %v4738_v54 }
0x1467   :  { %12707 = vpow2.f32 %v4740_v52 }
0x1468   :  { %v14020_v5 = vpop.eup %12701  ;;  %v4744_v55 = vmul.f32 1.442695, %v4730_v50 }
0x1469   :  { %v14022_v49 = vpop.eup %12703  ;;  %v4790_v27 = vpop.permute.xlu0 %4789  ;;  %v4751_v7 = vsel %vm990_vm6, %v14020_v5, 0.0 }
0x146a   :  { %4752 = vadd.xlane.f32.xlu1 %v4751_v7  ;;  %v4754_v17 = vsel %vm990_vm6, %v14022_v49, 0.0  ;;  %11869 = vmatpush3.msra.mxu0 %v4790_v27  ;;  %12709 = vpow2.f32 %v4744_v55 }
0x146b   :  { %4755 = vadd.xlane.f32.xlu0 %v4754_v17  ;;  %11878 = vmatprep.subr.mxu0 %v12934_v60  ;;  %v4077_v17 = vmul.f32 %v13900_v47, %v13349_v36 }
0x1470   :  { %v14038_v27 = vpop.eup %12705 }
0x1471   :  { %v14040_v45 = vpop.eup %12707  ;;  %v4757_v28 = vsel %vm990_vm6, %v14038_v27, 0.0 }
0x1472   :  { %v4760_v0 = vsel %vm990_vm6, %v14040_v45, 0.0 }
0x1474   :  { %v14046_v8 = vpop.eup %12709 }
0x1475   :  { %v4766_v21 = vsel %vm990_vm6, %v14046_v8, 0.0 }
0x147b   :  { %5174 = vrot.lane.b32.xlu1 %v4075_v37, %s15119_s9  ;;  %v4076_v37 = vmul.f32 %v13902_v25, %v13347_v35 }
0x1481   :  { %5097 = vrot.lane.b32.xlu0 %v4074_v12, %s15119_s9  ;;  %v14065_v12 = vsub.s32 7, %v13147_v44 }
0x1483   :  { %v3776_v42 = vrot.slane %v13761_v40, %v14065_v12 }
0x1485   :  { %v3850_v43 = vadd.f32 %v13978_v38, %v3776_v42  ;;  %v3855_v54 = vadd.f32 %v13976_v57, %v3776_v42 }
0x1487   :  { %v14072_v52 = vadd.f32 %v3850_v43, %v13769_v26  ;;  %v14075_v47 = vadd.f32 %v3855_v54, %v13766_v1 }
0x1489   :  { %v3860_v25 = vsel %vm94_vm0, %v14072_v52, 0.0  ;;  %v3863_v44 = vsel %vm94_vm0, %v14075_v47, 0.0 }
0x1492   :  { %v4717_v11 = vpop.xlane.xlu1 %4716 }
0x1493   :  { %v4729_v31 = vsub.f32 %v4697_v30, %v4717_v11 }
0x1495   :  { %v4742_v19 = vmul.f32 1.442695, %v4729_v31 }
0x1496   :  { %v4723_v39 = vpop.xlane.xlu1 %4722 }
0x1497   :  { %12711 = vpow2.f32 %v4742_v19  ;;  %v4731_v62 = vsub.f32 %v4699_v6, %v4723_v39 }
0x1499   :  { %v4746_v4 = vmul.f32 1.442695, %v4731_v62 }
0x149a   :  { %v5021_v50 = vpop.permute.xlu1 %5020 }
0x149b   :  { %12713 = vpow2.f32 %v4746_v4 }
0x149f   :  { %4758 = vadd.xlane.f32.xlu1 %v4757_v28 }
0x14a0   :  { %4761 = vadd.xlane.f32.xlu0 %v4760_v0 }
0x14a1   :  { %v14048_v30 = vpop.eup %12711 }
0x14a2   :  { %v4763_v6 = vsel %vm990_vm6, %v14048_v30, 0.0 }
0x14a3   :  { %4764 = vadd.xlane.f32.xlu1 %v4763_v6 }
0x14a4   :  { %4767 = vadd.xlane.f32.xlu0 %v4766_v21 }
0x14a5   :  { %v14054_v23 = vpop.eup %12713 }
0x14a6   :  { %v4769_v7 = vsel %vm990_vm6, %v14054_v23, 0.0 }
0x14a7   :  { %4770 = vadd.xlane.f32.xlu1 %v4769_v7 }
0x14b8   :  { %5328 = vrot.lane.b32.xlu1 %v4077_v17, %s15119_s9 }
0x14ba   :  { %5251 = vrot.lane.b32.xlu0 %v4076_v37, %s15119_s9 }
0x14d9   :  { %3861 = vadd.xlane.f32.xlu0 %v3860_v25 }
0x14dc   :  { %3864 = vadd.xlane.f32.xlu1 %v3863_v44 }
0x14f3   :  { %v4750_v40 = vpop.xlane.xlu0 %4749 }
0x14f4   :  { %12715 = vrcp.f32 %v4750_v40  ;;  %v4058_v40 = vld [vmem:[%s15081_s13] sm:$0xff] }
0x14f7   :  { %v4753_v38 = vpop.xlane.xlu1 %4752 }
0x14f8   :  { %12717 = vrcp.f32 %v4753_v38  ;;  %v4756_v57 = vpop.xlane.xlu0 %4755 }
0x14f9   :  { %12719 = vrcp.f32 %v4756_v57  ;;  %v4061_v57 = vld [vmem:[%s15081_s13 + $0x18] sm:$0xff] }
0x14fc   :  { %v5098_v19 = vpop.permute.xlu0 %5097 }
0x14fe   :  { %v12716_v26 = vpop.eup %12715 }
0x14ff   :  { %v4780_v55 = vmul.f32 %v12716_v26, %v14016_v22 }
0x1501   :  { %11871 = vmatmul.mubr.msk.f32.vlgmr.msra.gmra.mrb[30].mxu0 %vm990_vm6, %v4780_v55 }
0x1502   :  { %v12718_v1 = vpop.eup %12717  ;;  %11879 = vmatpush3.msra.mxu0 %v4944_v2  ;;  %11880 = vmatprep.mubr.msk.f32.mxu0 %vm12935_vm5, %v12934_v60 }
0x1503   :  { %v4781_v11 = vmul.f32 %v12718_v1, %v14020_v5  ;;  %11888 = vmatprep.subr.mxu0 %v12934_v60  ;;  %v12720_v31 = vpop.eup %12719  ;;  %v5175_v5 = vpop.permute.xlu1 %5174 }
0x1504   :  { %v4782_v22 = vmul.f32 %v12720_v31, %v14022_v49 }
0x1505   :  { %11876 = vmatmul.mubr.msk.f32.vlgmr.msra.gmra.mrb[44].mxu1 %vm990_vm6, %v4781_v11 }
0x1506   :  { %11884 = vmatpush3.msra.mxu1 %v5021_v50  ;;  %11885 = vmatprep.mubr.msk.f32.mxu1 %vm12935_vm5, %v12934_v60 }
0x1507   :  { %11893 = vmatprep.subr.mxu1 %v12934_v60 }
0x1509   :  { %11881 = vmatmul.mubr.msk.f32.vlgmr.msra.gmra.mrb[30].mxu0 %vm990_vm6, %v4782_v22  ;;  %v5413_v22 = vrot.slane %v13858_v34, %v13440_v53 }
0x150a   :  { %11889 = vmatpush3.msra.mxu0 %v5098_v19  ;;  %11890 = vmatprep.mubr.msk.f32.mxu0 %vm12935_vm5, %v12934_v60 }
0x150b   :  { %11898 = vmatprep.subr.mxu0 %v12934_v60 }
0x152c   :  { %v4759_v2 = vpop.xlane.xlu1 %4758 }
0x152d   :  { %12721 = vrcp.f32 %v4759_v2  ;;  %v4762_v39 = vpop.xlane.xlu0 %4761 }
0x152e   :  { %12723 = vrcp.f32 %v4762_v39 }
0x1530   :  { %v4765_v62 = vpop.xlane.xlu1 %4764 }
0x1531   :  { %v4768_v4 = vpop.xlane.xlu0 %4767  ;;  %12725 = vrcp.f32 %v4765_v62 }
0x1532   :  { %12727 = vrcp.f32 %v4768_v4 }
0x1534   :  { %v4771_v0 = vpop.xlane.xlu1 %4770 }
0x1535   :  { %12729 = vrcp.f32 %v4771_v0  ;;  %v5252_v7 = vpop.permute.xlu0 %5251 }
0x1537   :  { %v12722_v49 = vpop.eup %12721 }
0x1538   :  { %v12724_v28 = vpop.eup %12723  ;;  %v4783_v6 = vmul.f32 %v12722_v49, %v14038_v27  ;;  %v5329_v42 = vpop.permute.xlu1 %5328 }
0x1539   :  { %v4784_v21 = vmul.f32 %v12724_v28, %v14040_v45 }
0x153a   :  { %11886 = vmatmul.mubr.msk.f32.vlgmr.msra.gmra.mrb[44].mxu1 %vm990_vm6, %v4783_v6 }
0x153b   :  { %11891 = vmatmul.mubr.msk.f32.vlgmr.msra.gmra.mrb[30].mxu0 %vm990_vm6, %v4784_v21  ;;  %11894 = vmatpush3.msra.mxu1 %v5175_v5  ;;  %v12726_v17 = vpop.eup %12725 }
0x153c   :  { %11899 = vmatpush3.msra.mxu0 %v5252_v7  ;;  %11895 = vmatprep.mubr.msk.f32.mxu1 %vm12935_vm5, %v12934_v60  ;;  %v12728_v27 = vpop.eup %12727  ;;  %v4785_v45 = vmul.f32 %v12726_v17, %v14048_v30 }
0x153d   :  { %11900 = vmatprep.mubr.msk.f32.mxu0 %vm12935_vm5, %v12934_v60  ;;  %11903 = vmatprep.subr.mxu1 %v12934_v60  ;;  %v4786_v37 = vmul.f32 %v12728_v27, %v14046_v8 }
0x153f   :  { %v12730_v43 = vpop.eup %12729 }
0x1540   :  { %v4787_v54 = vmul.f32 %v12730_v43, %v14054_v23  ;;  %v4059_v23 = vld [vmem:[%s15081_s13 + $0x8] sm:$0xff] }
0x1541   :  { %v12395_v38 = vpack.c.bf16 %v4059_v23, %v4058_v40 }
0x1542   :  { %11896 = vmatmul.mubr.msk.f32.vlgmr.msra.gmra.mrb[44].mxu1 %vm990_vm6, %v4785_v45  ;;  %v5641_v45 = vld [vmem:[%s15083_s15 + $0x18] sm:$0xff] }
0x1543   :  { %11901 = vmatmul.mubr.msk.f32.vlgmr.msra.gmra.mrb[30].mxu0 %vm990_vm6, %v4786_v37  ;;  %11904 = vmatpush3.msra.mxu1 %v5329_v42 }
0x1544   :  { %11905 = vmatprep.mubr.msk.f32.mxu1 %vm12935_vm5, %v12934_v60  ;;  %12396 = vmatprep.subr.bf16.mxu0 %v12395_v38 }
0x1545   :  { %12398 = vmatpush3.bf16.msra.mxu0 %v12395_v38 }
0x154a   :  { %11906 = vmatmul.mubr.msk.f32.vlgmr.msra.gmra.mrb[44].mxu1 %vm990_vm6, %v4787_v54 }
0x1566   :  { %v3862_v19 = vpop.xlane.xlu0 %3861 }
0x1567   :  { %v3866_v39 = vmul.f32 0.03125, %v3862_v19 }
0x1569   :  { %v3865_v25 = vpop.xlane.xlu1 %3864  ;;  %v3868_v28 = vsub.f32 %v14072_v52, %v3866_v39  ;;  %v5640_v52 = vld [vmem:[%s15083_s15 + $0x10] sm:$0xff] }
0x156a   :  { %v3867_v44 = vmul.f32 0.03125, %v3865_v25  ;;  %v12415_v37 = vpack.c.bf16 %v5641_v45, %v5640_v52 }
0x156b   :  { %v3870_v7 = vmul.f32 %v3868_v28, %v3868_v28 }
0x156c   :  { %v14114_v30 = vsub.f32 %v14075_v47, %v3867_v44  ;;  %v4060_v47 = vld [vmem:[%s15081_s13 + $0x10] sm:$0xff] }
0x156d   :  { %v12399_v26 = vpack.c.bf16 %v4061_v57, %v4060_v47  ;;  %v3872_v17 = vsel %vm94_vm0, %v3870_v7, 0.0 }
0x156e   :  { %v3871_v8 = vmul.f32 %v14114_v30, %v14114_v30 }
0x156f   :  { %12400 = vmatprep.subr.bf16.mxu0 %v12399_v26 }
0x1570   :  { %v3875_v50 = vsel %vm94_vm0, %v3871_v8, 0.0  ;;  %12402 = vmatpush3.bf16.msra.mxu0 %v12399_v26 }
0x1571   :  { %3876 = vadd.xlane.f32.xlu1 %v3875_v50 }
0x15fe   :  { %v3877_v42 = vpop.xlane.xlu1 %3876 }
0x15ff   :  { %v3879_v43 = vmul.f32 0.032258064, %v3877_v42 }
0x1601   :  { %12731 = vrsqrt.f32 %v3879_v43  ;;  %vm3889_vm12 = vcmp.eq.f32.partialorder %v3879_v43, inf  ;;  %vm3891_vm13 = vcmp.eq.f32.partialorder %v3879_v43, 0.0 }
0x160b   :  { %v12732_v23 = vpop.eup %12731 }
0x160c   :  { %v3888_v26 = vmul.f32 %v12732_v23, %v3879_v43 }
0x1616   :  { %v5323_v55 = vpop.f32.mrb[30].mxu0 }
0x1617   :  { %v11902_v1 = vpop.f32.mrb[31].mxu0  ;;  %11916 = vmatprep.mubr.msk.f32.mxu0 %vm94_vm0, %v5323_v55 }
0x161d   :  { %v5400_v11 = vpop.f32.mrb[44].mxu1 }
0x161e   :  { %v11907_v31 = vpop.f32.mrb[45].mxu1  ;;  %11917 = vmatmul.mubr.msk.f32.vlgmr.msra.gmra.mrb[32].mxu0 %vm94_vm0, %v5400_v11 }
0x161f   :  { %v3890_v31 = vsel %vm3889_vm12, %v3879_v43, %v3888_v26 }
0x16f1   :  { %v11918_v5 = vpop.f32.mrb[32].mxu0 }
0x16f2   :  { %v5486_v2 = vpop.f32.mrb[33].mxu0  ;;  %v5492_v62 = vadd.f32 %v11918_v5, %v5413_v22 }
0x16f3   :  { %v5487_v4 = vadd.f32 %v5486_v2, %v5413_v22  ;;  %v3892_v22 = vand.u32 2147483648, %v3879_v43 }
0x16f4   :  { %v14140_v0 = vadd.f32 %v5492_v62, %v13785_v56  ;;  %v5639_v56 = vld [vmem:[%s15083_s15 + $0x8] sm:$0xff] }
0x16f5   :  { %v14136_v49 = vadd.f32 %v5487_v4, %v13776_v51  ;;  %v5638_v51 = vld [vmem:[%s15083_s15] sm:$0xff]  ;;  %v3893_v19 = vsel %vm3891_vm13, %v3892_v22, %v3890_v31 }
0x16f6   :  { %v5500_v21 = vsel %vm94_vm0, %v14140_v0, 0.0  ;;  %v12411_v27 = vpack.c.bf16 %v5639_v56, %v5638_v51  ;;  %v3895_v5 = vadd.f32 1e-06, %v3893_v19  ;;  %v12884_v51 = vld [vmem:[%s15079_s11 + $0x8] sm:$0x3f] }
0x16f7   :  { %v5497_v6 = vsel %vm94_vm0, %v14136_v49, 0.0  ;;  %v3903_v56 = vrot.slane %v12884_v51, %v13493_v41 }
0x16f8   :  { %5498 = vadd.xlane.f32.xlu0 %v5497_v6  ;;  %12412 = vmatprep.subr.bf16.mxu0 %v12411_v27 }
0x16f9   :  { %12414 = vmatpush3.bf16.msra.mxu0 %v12411_v27 }
0x16fa   :  { %12416 = vmatprep.subr.bf16.mxu0 %v12415_v37 }
0x16fc   :  { %5501 = vadd.xlane.f32.xlu0 %v5500_v21 }
0x16fd   :  { %12418 = vmatpush3.bf16.msra.mxu0 %v12415_v37  ;;  %v3909_v37 = vrot.slane %v12884_v51, %v13496_v15  ;;  %v5546_v51 = vrot.slane %v13858_v34, %v14065_v12 }
0x16fe   :  { %11951 = vmatprep.subr.mxu0 %v12934_v60 }
0x1700   :  { %3873 = vadd.xlane.f32.xlu0 %v3872_v17 }
0x1785   :  { %v5499_v54 = vpop.xlane.xlu0 %5498 }
0x1786   :  { %v5503_v25 = vmul.f32 0.03125, %v5499_v54 }
0x1788   :  { %v14161_v44 = vsub.f32 %v14136_v49, %v5503_v25  ;;  %v5551_v25 = vld [vmem:[%s15082_s14 + $0x10] sm:$0xff] }
0x1789   :  { %v5502_v8 = vpop.xlane.xlu0 %5501 }
0x178a   :  { %v5504_v50 = vmul.f32 0.03125, %v5502_v8  ;;  %v5507_v40 = vmul.f32 %v14161_v44, %v14161_v44 }
0x178c   :  { %v14166_v38 = vsub.f32 %v14140_v0, %v5504_v50  ;;  %v5509_v47 = vsel %vm94_vm0, %v5507_v40, 0.0  ;;  %v5552_v50 = vld [vmem:[%s15082_s14 + $0x18] sm:$0xff] }
0x178d   :  { %5510 = vadd.xlane.f32.xlu0 %v5509_v47  ;;  %v3874_v57 = vpop.xlane.xlu0 %3873  ;;  %v12407_v40 = vpack.c.bf16 %v5552_v50, %v5551_v25 }
0x178e   :  { %v3878_v55 = vmul.f32 0.032258064, %v3874_v57  ;;  %v5508_v1 = vmul.f32 %v14166_v38, %v14166_v38 }
0x1790   :  { %12733 = vrsqrt.f32 %v3878_v55  ;;  %v5512_v11 = vsel %vm94_vm0, %v5508_v1, 0.0  ;;  %vm3882_vm14 = vcmp.eq.f32.partialorder %v3878_v55, inf  ;;  %v3885_v62 = vand.u32 2147483648, %v3878_v55 }
0x1791   :  { %5513 = vadd.xlane.f32.xlu1 %v5512_v11  ;;  %12735 = vrcp.f32 %v3895_v5  ;;  %vm3884_vm15 = vcmp.eq.f32.partialorder %v3878_v55, 0.0 }
0x179a   :  { %v12734_v2 = vpop.eup %12733 }
0x179b   :  { %v3881_v39 = vmul.f32 %v12734_v2, %v3878_v55  ;;  %v12736_v7 = vpop.eup %12735 }
0x179c   :  { %v3899_v17 = vmul.f32 %v12736_v7, %v14114_v30  ;;  %v5549_v30 = vld [vmem:[%s15082_s14] sm:$0xff] }
0x179d   :  { %v3883_v4 = vsel %vm3882_vm14, %v3878_v55, %v3881_v39 }
0x179e   :  { %v3886_v6 = vsel %vm3884_vm15, %v3885_v62, %v3883_v4  ;;  %v3905_v45 = vmul.f32 %v3903_v56, %v3899_v17 }
0x179f   :  { %v3894_v21 = vadd.f32 1e-06, %v3886_v6 }
0x17a0   :  { %v14180_v54 = vadd.f32 %v3909_v37, %v3905_v45 }
0x17a1   :  { %12737 = vrcp.f32 %v3894_v21  ;;  %v5540_v21 = vrot.slane %v13858_v34, %v13756_v58 }
0x17ab   :  { %v12738_v52 = vpop.eup %12737 }
0x17ac   :  { %v3898_v27 = vmul.f32 %v12738_v52, %v3868_v28  ;;  %v5550_v28 = vld [vmem:[%s15082_s14 + $0x8] sm:$0xff] }
0x17ad   :  { %v12403_v8 = vpack.c.bf16 %v5550_v28, %v5549_v30 }
0x17ae   :  { %v3904_v42 = vmul.f32 %v3903_v56, %v3898_v27 }
0x17af   :  { %12404 = vmatprep.subr.bf16.mxu1 %v12403_v8 }
0x17b0   :  { %v14178_v43 = vadd.f32 %v3909_v37, %v3904_v42  ;;  %12406 = vmatpush3.bf16.msra.mxu1 %v12403_v8 }
0x17b1   :  { %12408 = vmatprep.subr.bf16.mxu1 %v12407_v40 }
0x17b2   :  { %11938 = vmatprep.mubr.msk.f32.mxu0 %vm94_vm0, %v14178_v43 }
0x17b3   :  { %11939 = vmatmul.mubr.msk.f32.vlgmr.msra.gmra.mrb[34].mxu0 %vm94_vm0, %v14180_v54 }
0x17b4   :  { %11953 = vmatprep.mubr.msk.f32.mxu0 %vm12935_vm5, %v12934_v60  ;;  %12410 = vmatpush3.bf16.msra.mxu1 %v12407_v40  ;;  %v12886_v40 = vld [vmem:[%s15114_s30 + $0x2] ss:$0 sm:$0xff] }
0x17b5   :  { %11941 = vmatprep.subr.mxu1 %v12934_v60 }
0x181a   :  { %v5511_v23 = vpop.xlane.xlu0 %5510 }
0x181b   :  { %v5515_v47 = vmul.f32 0.032258064, %v5511_v23 }
0x181d   :  { %12739 = vrsqrt.f32 %v5515_v47  ;;  %vm5519_vm1 = vcmp.eq.f32.partialorder %v5515_v47, inf  ;;  %v5522_v11 = vand.u32 2147483648, %v5515_v47  ;;  %vm5521_vm2 = vcmp.eq.f32.partialorder %v5515_v47, 0.0 }
0x181e   :  { %v5514_v57 = vpop.xlane.xlu1 %5513 }
0x181f   :  { %v5516_v26 = vmul.f32 0.032258064, %v5514_v57 }
0x1821   :  { %12741 = vrsqrt.f32 %v5516_v26  ;;  %vm5526_vm3 = vcmp.eq.f32.partialorder %v5516_v26, inf  ;;  %v5529_v39 = vand.u32 2147483648, %v5516_v26  ;;  %vm5528_vm4 = vcmp.eq.f32.partialorder %v5516_v26, 0.0 }
0x1827   :  { %v12740_v55 = vpop.eup %12739 }
0x1828   :  { %v5518_v1 = vmul.f32 %v12740_v55, %v5515_v47 }
0x182a   :  { %v5520_v31 = vsel %vm5519_vm1, %v5515_v47, %v5518_v1  ;;  %v5556_v47 = vrot.slane %v13858_v34, %v13520_v24  ;;  %v12887_v1 = vld [vmem:[%s15114_s30 + $0x1] ss:$0 sm:$0xff] }
0x182b   :  { %v5523_v22 = vsel %vm5521_vm2, %v5522_v11, %v5520_v31  ;;  %v12742_v19 = vpop.eup %12741  ;;  %v12888_v31 = vld [vmem:[%s15114_s30 + $0x4] ss:$0 sm:$0xff] }
0x182c   :  { %v5531_v5 = vadd.f32 1e-06, %v5523_v22  ;;  %v5525_v2 = vmul.f32 %v12742_v19, %v5516_v26  ;;  %v12889_v19 = vld [vmem:[%s15114_s30 + $0x3] ss:$0 sm:$0xff] }
0x182e   :  { %12743 = vrcp.f32 %v5531_v5  ;;  %v5527_v62 = vsel %vm5526_vm3, %v5516_v26, %v5525_v2  ;;  %v12890_v2 = vld [vmem:[%s15114_s30 + $0x6] ss:$0 sm:$0xff] }
0x182f   :  { %v5530_v4 = vsel %vm5528_vm4, %v5529_v39, %v5527_v62  ;;  %v12891_v62 = vld [vmem:[%s15114_s30 + $0x5] ss:$0 sm:$0xff] }
0x1830   :  { %v5532_v6 = vadd.f32 1e-06, %v5530_v4 }
0x1832   :  { %12745 = vrcp.f32 %v5532_v6  ;;  %v12892_v6 = vld [vmem:[%s15114_s30 + $0x7] ss:$0 sm:$0xff] }
0x1838   :  { %v12744_v7 = vpop.eup %12743 }
0x1839   :  { %v5535_v17 = vmul.f32 %v12744_v7, %v14161_v44  ;;  %v11079_v44 = vld [vmem:[%s15088_s20] ss:$0 sm:$0xff] }
0x183b   :  { %v5541_v56 = vmul.f32 %v5540_v21, %v5535_v17 }
0x183c   :  { %v12746_v52 = vpop.eup %12745 }
0x183d   :  { %v5547_v27 = vadd.f32 %v5546_v51, %v5541_v56  ;;  %v5536_v45 = vmul.f32 %v12746_v52, %v14166_v38  ;;  %v12885_v38 = vld [vmem:[%s15114_s30] ss:$0 sm:$0xff] }
0x183f   :  { %11927 = vmatprep.mubr.msk.f32.mxu1 %vm94_vm0, %v5547_v27  ;;  %v5542_v37 = vmul.f32 %v5540_v21, %v5536_v45  ;;  %v12893_v45 = vld [vmem:[%s15115_s3] ss:$0 sm:$0xff] }
0x1841   :  { %v5548_v42 = vadd.f32 %v5546_v51, %v5542_v37 }
0x1843   :  { %11928 = vmatmul.mubr.msk.f32.vlgmr.msra.gmra.mrb[46].mxu1 %vm94_vm0, %v5548_v42 }
0x1844   :  { %11943 = vmatprep.mubr.msk.f32.mxu1 %vm12935_vm5, %v12934_v60 }
0x1886   :  { %v11940_v30 = vpop.f32.mrb[34].mxu0 }
0x1887   :  { %v14214_v28 = vadd.f32 %v11940_v30, %v11079_v44  ;;  %v5721_v25 = vpop.f32.mrb[35].mxu0 }
0x1888   :  { %v14216_v8 = vadd.f32 %v11079_v44, %v5721_v25 }
0x1889   :  { %v5735_v11 = vmul.f32 %v12887_v1, %v14214_v28  ;;  %v5737_v5 = vmul.f32 %v12889_v19, %v14214_v28  ;;  %v5739_v4 = vmul.f32 %v12891_v62, %v14214_v28  ;;  %v5741_v21 = vmul.f32 %v12892_v6, %v14214_v28 }
0x188a   :  { %v5734_v50 = vmul.f32 %v12885_v38, %v14216_v8  ;;  %v5736_v23 = vmul.f32 %v12886_v40, %v14216_v8  ;;  %v5738_v22 = vmul.f32 %v12888_v31, %v14216_v8  ;;  %v5740_v39 = vmul.f32 %v12890_v2, %v14216_v8 }
0x188c   :  { %11942 = vmatpush3.xpose.msk.msra.mxu1 %vm94_vm0, %v5734_v50  ;;  %11952 = vmatpush3.xpose.msk.msra.mxu0 %vm94_vm0, %v5736_v23 }
0x188d   :  { %11946 = vmatprep.subr.mxu1 %v12934_v60  ;;  %11961 = vmatprep.subr.mxu0 %v12934_v60 }
0x1916   :  { %v11929_v57 = vpop.f32.mrb[46].mxu1 }
0x1917   :  { %v5629_v26 = vpop.f32.mrb[47].mxu1  ;;  %v5635_v34 = vadd.f32 %v11929_v57, %v5556_v47 }
0x1918   :  { %v5630_v55 = vadd.f32 %v5629_v26, %v5556_v47  ;;  %v12894_v47 = vld [vmem:[%s15115_s3 + $0x1] ss:$0 sm:$0xff] }
0x191a   :  { %11944 = vmatmul.mubr.msk.f32.vlgmr.msra.gmra.mrb[48].mxu1 %vm94_vm0, %v5630_v55  ;;  %11954 = vmatmul.mubr.msk.f32.vlgmr.msra.gmra.mrb[36].mxu0 %vm94_vm0, %v5630_v55 }
0x191b   :  { %11947 = vmatpush3.xpose.msk.msra.mxu1 %vm94_vm0, %v5735_v11  ;;  %11962 = vmatpush3.xpose.msk.msra.mxu0 %vm94_vm0, %v5738_v22 }
0x191c   :  { %11948 = vmatprep.mubr.msk.f32.mxu1 %vm12935_vm5, %v12934_v60  ;;  %11956 = vmatprep.subr.mxu1 %v12934_v60 }
0x191d   :  { %11963 = vmatprep.mubr.msk.f32.mxu0 %vm12935_vm5, %v12934_v60  ;;  %11971 = vmatprep.subr.mxu0 %v12934_v60 }
0x191e   :  { %11949 = vmatmul.mubr.msk.f32.vlgmr.msra.gmra.mrb[50].mxu1 %vm94_vm0, %v5635_v34  ;;  %11964 = vmatmul.mubr.msk.f32.vlgmr.msra.gmra.mrb[38].mxu0 %vm94_vm0, %v5630_v55 }
0x191f   :  { %11957 = vmatpush3.xpose.msk.msra.mxu1 %vm94_vm0, %v5737_v5  ;;  %11972 = vmatpush3.xpose.msk.msra.mxu0 %vm94_vm0, %v5740_v39 }
0x1920   :  { %11958 = vmatprep.mubr.msk.f32.mxu1 %vm12935_vm5, %v12934_v60  ;;  %11966 = vmatprep.subr.mxu1 %v12934_v60 }
0x1921   :  { %11973 = vmatprep.mubr.msk.f32.mxu0 %vm12935_vm5, %v12934_v60  ;;  %11981 = vmatprep.subr.mxu0 %v12934_v60 }
0x1922   :  { %11959 = vmatmul.mubr.msk.f32.vlgmr.msra.gmra.mrb[52].mxu1 %vm94_vm0, %v5635_v34  ;;  %11974 = vmatmul.mubr.msk.f32.vlgmr.msra.gmra.mrb[40].mxu0 %vm94_vm0, %v5630_v55 }
0x1923   :  { %11967 = vmatpush3.xpose.msk.msra.mxu1 %vm94_vm0, %v5739_v4  ;;  %11968 = vmatprep.mubr.msk.f32.mxu1 %vm12935_vm5, %v12934_v60 }
0x1924   :  { %11976 = vmatprep.subr.mxu1 %v12934_v60  ;;  %11983 = vmatprep.mubr.msk.f32.mxu0 %vm12935_vm5, %v12934_v60 }
0x1926   :  { %11969 = vmatmul.mubr.msk.f32.vlgmr.msra.gmra.mrb[54].mxu1 %vm94_vm0, %v5635_v34 }
0x1927   :  { %11977 = vmatpush3.xpose.msk.msra.mxu1 %vm94_vm0, %v5741_v21  ;;  %11978 = vmatprep.mubr.msk.f32.mxu1 %vm12935_vm5, %v12934_v60 }
0x1928   :  { %11986 = vmatprep.subr.mxu1 %v12934_v60 }
0x192a   :  { %11979 = vmatmul.mubr.msk.f32.vlgmr.msra.gmra.mrb[56].mxu1 %vm94_vm0, %v5635_v34 }
0x192b   :  { %11988 = vmatprep.mubr.msk.f32.mxu1 %vm12935_vm5, %v12934_v60 }
0x19ed   :  { %v5822_v7 = vpop.f32.mrb[48].mxu1  ;;  %v5971_v17 = vpop.f32.mrb[36].mxu0 }
0x19ee   :  { %v6340_v51 = vmul.f32 0.35355338, %v5822_v7  ;;  %v11945_v56 = vpop.f32.mrb[49].mxu1  ;;  %v11955_v52 = vpop.f32.mrb[37].mxu0  ;;  %v6342_v27 = vmul.f32 0.35355338, %v5971_v17 }
0x19ef   :  { %v5743_v56 = vmul.f32 %v14214_v28, %v13168_v59  ;;  %v5744_v52 = vmul.f32 %v14216_v8, %v13172_v61 }
0x19f0   :  { %v6348_v37 = vadd.f32 %v12893_v45, %v6340_v51  ;;  %v6350_v50 = vadd.f32 %v12893_v45, %v6342_v27  ;;  %v5742_v27 = vmul.f32 %v14216_v8, %v13183_v3 }
0x19f1   :  { %v5898_v42 = vpop.f32.mrb[50].mxu1  ;;  %v6117_v44 = vpop.f32.mrb[38].mxu0 }
0x19f2   :  { %v6341_v30 = vmul.f32 0.35355338, %v5898_v42  ;;  %v11950_v25 = vpop.f32.mrb[51].mxu1  ;;  %v11965_v38 = vpop.f32.mrb[39].mxu0  ;;  %v6344_v40 = vmul.f32 0.35355338, %v6117_v44 }
0x19f3   :  { %v6356_v23 = vsel %vm990_vm6, %v6348_v37, -inf  ;;  %v6362_v19 = vsel %vm990_vm6, %v6350_v50, -inf }
0x19f4   :  { %v6349_v57 = vadd.f32 %v12894_v47, %v6341_v30  ;;  %6357 = vmax.xlane.f32.xlu0 %v6356_v23  ;;  %v14299_v22 = vadd.f32 %v12893_v45, %v6344_v40  ;;  %v5745_v40 = vmul.f32 %v14214_v28, %v13181_v63 }
0x19f5   :  { %v6044_v26 = vpop.f32.mrb[52].mxu1  ;;  %v6263_v55 = vpop.f32.mrb[40].mxu0 }
0x19f6   :  { %v6343_v1 = vmul.f32 0.35355338, %v6044_v26  ;;  %v11960_v11 = vpop.f32.mrb[53].mxu1  ;;  %v11975_v31 = vpop.f32.mrb[41].mxu0  ;;  %v6346_v34 = vmul.f32 0.35355338, %v6263_v55 }
0x19f7   :  { %v6359_v5 = vsel %vm990_vm6, %v6349_v57, -inf  ;;  %v6368_v21 = vsel %vm990_vm6, %v14299_v22, -inf }
0x19f8   :  { %v14303_v2 = vadd.f32 %v12894_v47, %v6343_v1  ;;  %6363 = vmax.xlane.f32.xlu0 %v6362_v19  ;;  %6360 = vmax.xlane.f32.xlu1 %v6359_v5  ;;  %v14307_v6 = vadd.f32 %v12893_v45, %v6346_v34 }
0x19f9   :  { %v6190_v39 = vpop.f32.mrb[54].mxu1 }
0x19fa   :  { %v11970_v62 = vpop.f32.mrb[55].mxu1  ;;  %v6365_v4 = vsel %vm990_vm6, %v14303_v2, -inf  ;;  %v6374_v51 = vsel %vm990_vm6, %v14307_v6, -inf  ;;  %v6345_v45 = vmul.f32 0.35355338, %v6190_v39 }
0x19fc   :  { %6369 = vmax.xlane.f32.xlu0 %v6368_v21  ;;  %6366 = vmax.xlane.f32.xlu1 %v6365_v4  ;;  %v6353_v42 = vadd.f32 %v12894_v47, %v6345_v45 }
0x19fd   :  { %v6336_v7 = vpop.f32.mrb[56].mxu1 }
0x19fe   :  { %v11980_v17 = vpop.f32.mrb[57].mxu1  ;;  %v6347_v44 = vmul.f32 0.35355338, %v6336_v7  ;;  %v6371_v25 = vsel %vm990_vm6, %v6353_v42, -inf }
0x1a00   :  { %6375 = vmax.xlane.f32.xlu0 %v6374_v51  ;;  %v6355_v30 = vadd.f32 %v12894_v47, %v6347_v44 }
0x1a02   :  { %v6377_v38 = vsel %vm990_vm6, %v6355_v30, -inf }
0x1a0d   :  { %6522 = vrot.lane.b32.xlu1 %v5743_v56, %s15118_s0  ;;  %v5747_v56 = vmul.f32 %v14214_v28, %v13194_v9 }
0x1a11   :  { %6599 = vrot.lane.b32.xlu1 %v5744_v52, %s15118_s0  ;;  %v5746_v52 = vmul.f32 %v14216_v8, %v13197_v10 }
0x1a16   :  { %6445 = vrot.lane.b32.xlu0 %v5742_v27, %s15118_s0 }
0x1a35   :  { %6372 = vmax.xlane.f32.xlu1 %v6371_v25 }
0x1a39   :  { %6378 = vmax.xlane.f32.xlu1 %v6377_v38 }
0x1a4a   :  { %6676 = vrot.lane.b32.xlu1 %v5745_v40, %s15118_s0 }
0x1a81   :  { %v6358_v23 = vpop.xlane.xlu0 %6357 }
0x1a82   :  { %v6380_v26 = vsub.f32 %v6348_v37, %v6358_v23 }
0x1a84   :  { %v6388_v55 = vmul.f32 1.442695, %v6380_v26 }
0x1a85   :  { %v6364_v1 = vpop.xlane.xlu0 %6363  ;;  %v6361_v11 = vpop.xlane.xlu1 %6360 }
0x1a86   :  { %12747 = vpow2.f32 %v6388_v55  ;;  %v6382_v31 = vsub.f32 %v6350_v50, %v6364_v1  ;;  %v6381_v34 = vsub.f32 %v6349_v57, %v6361_v11 }
0x1a88   :  { %v6392_v47 = vmul.f32 1.442695, %v6382_v31  ;;  %v6390_v19 = vmul.f32 1.442695, %v6381_v34 }
0x1a89   :  { %v6370_v5 = vpop.xlane.xlu0 %6369  ;;  %v6367_v39 = vpop.xlane.xlu1 %6366 }
0x1a8a   :  { %12749 = vpow2.f32 %v6392_v47  ;;  %v6384_v27 = vsub.f32 %v14299_v22, %v6370_v5  ;;  %v6383_v45 = vsub.f32 %v14303_v2, %v6367_v39 }
0x1a8b   :  { %12751 = vpow2.f32 %v6390_v19 }
0x1a8c   :  { %v6396_v44 = vmul.f32 1.442695, %v6384_v27  ;;  %v6394_v38 = vmul.f32 1.442695, %v6383_v45 }
0x1a8d   :  { %v6376_v62 = vpop.xlane.xlu0 %6375  ;;  %v6523_v4 = vpop.permute.xlu1 %6522 }
0x1a8e   :  { %11987 = vmatpush3.msra.mxu1 %v6523_v4  ;;  %v6386_v25 = vsub.f32 %v14307_v6, %v6376_v62  ;;  %12753 = vpow2.f32 %v6396_v44  ;;  %v5748_v4 = vmul.f32 %v14216_v8, %v13211_v16 }
0x1a8f   :  { %11996 = vmatprep.subr.mxu1 %v12934_v60  ;;  %12755 = vpow2.f32 %v6394_v38 }
0x1a90   :  { %v12748_v21 = vpop.eup %12747  ;;  %v6400_v40 = vmul.f32 1.442695, %v6386_v25 }
0x1a91   :  { %v6446_v7 = vpop.permute.xlu0 %6445  ;;  %v6404_v37 = vsel %vm990_vm6, %v12748_v21, 0.0  ;;  %v6600_v23 = vpop.permute.xlu1 %6599 }
0x1a92   :  { %6405 = vadd.xlane.f32.xlu0 %v6404_v37  ;;  %11982 = vmatpush3.msra.mxu0 %v6446_v7  ;;  %12757 = vpow2.f32 %v6400_v40  ;;  %v5749_v7 = vmul.f32 %v14214_v28, %v13207_v14 }
0x1a93   :  { %11991 = vmatprep.subr.mxu0 %v12934_v60 }
0x1a94   :  { %v14330_v50 = vpop.eup %12749 }
0x1a95   :  { %v12752_v57 = vpop.eup %12751  ;;  %v6410_v17 = vsel %vm990_vm6, %v14330_v50, 0.0 }
0x1a96   :  { %6411 = vadd.xlane.f32.xlu0 %v6410_v17  ;;  %v6407_v51 = vsel %vm990_vm6, %v12752_v57, 0.0 }
0x1a97   :  { %6408 = vadd.xlane.f32.xlu1 %v6407_v51 }
0x1a98   :  { %v12754_v31 = vpop.eup %12753 }
0x1a99   :  { %v12756_v47 = vpop.eup %12755  ;;  %v6416_v2 = vsel %vm990_vm6, %v12754_v31, 0.0 }
0x1a9a   :  { %v6413_v6 = vsel %vm990_vm6, %v12756_v47, 0.0 }
0x1a9c   :  { %v14345_v19 = vpop.eup %12757 }
0x1a9d   :  { %v6422_v5 = vsel %vm990_vm6, %v14345_v19, 0.0 }
0x1aa8   :  { %6830 = vrot.lane.b32.xlu1 %v5747_v56, %s15118_s0 }
0x1aac   :  { %6753 = vrot.lane.b32.xlu0 %v5746_v52, %s15118_s0 }
0x1ac2   :  { %v6373_v26 = vpop.xlane.xlu1 %6372 }
0x1ac3   :  { %v6385_v55 = vsub.f32 %v6353_v42, %v6373_v26 }
0x1ac5   :  { %v6398_v1 = vmul.f32 1.442695, %v6385_v55 }
0x1ac6   :  { %v6379_v11 = vpop.xlane.xlu1 %6378 }
0x1ac7   :  { %12759 = vpow2.f32 %v6398_v1  ;;  %v6387_v34 = vsub.f32 %v6355_v30, %v6379_v11 }
0x1ac9   :  { %v6402_v22 = vmul.f32 1.442695, %v6387_v34 }
0x1aca   :  { %v6677_v17 = vpop.permute.xlu1 %6676 }
0x1acb   :  { %12761 = vpow2.f32 %v6402_v22  ;;  %6417 = vadd.xlane.f32.xlu0 %v6416_v2 }
0x1acc   :  { %6414 = vadd.xlane.f32.xlu1 %v6413_v6 }
0x1acf   :  { %6423 = vadd.xlane.f32.xlu0 %v6422_v5 }
0x1ad1   :  { %v12760_v42 = vpop.eup %12759 }
0x1ad2   :  { %v6419_v39 = vsel %vm990_vm6, %v12760_v42, 0.0 }
0x1ad3   :  { %6420 = vadd.xlane.f32.xlu1 %v6419_v39 }
0x1ad5   :  { %v14351_v30 = vpop.eup %12761 }
0x1ad6   :  { %v6425_v62 = vsel %vm990_vm6, %v14351_v30, 0.0 }
0x1ad7   :  { %6426 = vadd.xlane.f32.xlu1 %v6425_v62  ;;  %v5730_v62 = vld [vmem:[%s15084_s16] sm:$0xff] }
0x1ae5   :  { %6907 = vrot.lane.b32.xlu0 %v5748_v4, %s15118_s0  ;;  %v5732_v4 = vld [vmem:[%s15084_s16 + $0x10] sm:$0xff] }
0x1ae8   :  { %6984 = vrot.lane.b32.xlu1 %v5749_v7, %s15118_s0  ;;  %v5733_v7 = vld [vmem:[%s15084_s16 + $0x18] sm:$0xff] }
0x1b1f   :  { %v6406_v37 = vpop.xlane.xlu0 %6405 }
0x1b20   :  { %12763 = vrcp.f32 %v6406_v37 }
0x1b23   :  { %v6412_v51 = vpop.xlane.xlu0 %6411 }
0x1b24   :  { %v6409_v56 = vpop.xlane.xlu1 %6408 }
0x1b25   :  { %12765 = vrcp.f32 %v6409_v56 }
0x1b26   :  { %12767 = vrcp.f32 %v6412_v51 }
0x1b2a   :  { %v12764_v52 = vpop.eup %12763 }
0x1b2b   :  { %v6436_v27 = vmul.f32 %v12764_v52, %v12748_v21  ;;  %v6754_v21 = vpop.permute.xlu0 %6753  ;;  %v14405_v52 = vld [vmem:[%s15090_s22] sm:$0xff] }
0x1b2d   :  { %11984 = vmatmul.mubr.msk.f32.vlgmr.msra.gmra.mrb[42].mxu0 %vm990_vm6, %v6436_v27  ;;  %v7069_v27 = vrot.slane %v14405_v52, %v13150_v46 }
0x1b2e   :  { %11992 = vmatpush3.msra.mxu0 %v6600_v23  ;;  %11993 = vmatprep.mubr.msk.f32.mxu0 %vm12935_vm5, %v12934_v60 }
0x1b2f   :  { %v12766_v8 = vpop.eup %12765  ;;  %12001 = vmatprep.subr.mxu0 %v12934_v60 }
0x1b30   :  { %v12768_v28 = vpop.eup %12767  ;;  %v6437_v45 = vmul.f32 %v12766_v8, %v12752_v57  ;;  %v6831_v57 = vpop.permute.xlu1 %6830 }
0x1b31   :  { %v6438_v44 = vmul.f32 %v12768_v28, %v14330_v50 }
0x1b32   :  { %11989 = vmatmul.mubr.msk.f32.vlgmr.msra.gmra.mrb[58].mxu1 %vm990_vm6, %v6437_v45 }
0x1b33   :  { %11997 = vmatpush3.msra.mxu1 %v6677_v17  ;;  %11998 = vmatprep.mubr.msk.f32.mxu1 %vm12935_vm5, %v12934_v60 }
0x1b34   :  { %12006 = vmatprep.subr.mxu1 %v12934_v60 }
0x1b35   :  { %11994 = vmatmul.mubr.msk.f32.vlgmr.msra.gmra.mrb[42].mxu0 %vm990_vm6, %v6438_v44 }
0x1b36   :  { %12002 = vmatpush3.msra.mxu0 %v6754_v21  ;;  %12003 = vmatprep.mubr.msk.f32.mxu0 %vm12935_vm5, %v12934_v60 }
0x1b37   :  { %12011 = vmatprep.subr.mxu0 %v12934_v60 }
0x1b58   :  { %v6418_v25 = vpop.xlane.xlu0 %6417 }
0x1b59   :  { %12769 = vrcp.f32 %v6418_v25  ;;  %v6415_v38 = vpop.xlane.xlu1 %6414 }
0x1b5a   :  { %12771 = vrcp.f32 %v6415_v38 }
0x1b5c   :  { %v6424_v50 = vpop.xlane.xlu0 %6423 }
0x1b5d   :  { %12773 = vrcp.f32 %v6424_v50 }
0x1b60   :  { %v6421_v40 = vpop.xlane.xlu1 %6420  ;;  %v6908_v34 = vpop.permute.xlu0 %6907 }
0x1b61   :  { %12775 = vrcp.f32 %v6421_v40 }
0x1b63   :  { %v12770_v23 = vpop.eup %12769 }
0x1b64   :  { %v12772_v26 = vpop.eup %12771  ;;  %v6440_v55 = vmul.f32 %v12770_v23, %v12754_v31  ;;  %v6427_v11 = vpop.xlane.xlu1 %6426 }
0x1b65   :  { %v6439_v1 = vmul.f32 %v12772_v26, %v12756_v47  ;;  %12777 = vrcp.f32 %v6427_v11 }
0x1b66   :  { %12004 = vmatmul.mubr.msk.f32.vlgmr.msra.gmra.mrb[42].mxu0 %vm990_vm6, %v6440_v55 }
0x1b67   :  { %11999 = vmatmul.mubr.msk.f32.vlgmr.msra.gmra.mrb[58].mxu1 %vm990_vm6, %v6439_v1  ;;  %12012 = vmatpush3.msra.mxu0 %v6908_v34  ;;  %v12774_v22 = vpop.eup %12773 }
0x1b68   :  { %12007 = vmatpush3.msra.mxu1 %v6831_v57  ;;  %12008 = vmatprep.mubr.msk.f32.mxu1 %vm12935_vm5, %v12934_v60  ;;  %v6442_v47 = vmul.f32 %v12774_v22, %v14345_v19  ;;  %v6985_v6 = vpop.permute.xlu1 %6984  ;;  %v5731_v19 = vld [vmem:[%s15084_s16 + $0x8] sm:$0xff]  ;;  %v7205_v22 = vld [vmem:[%s15085_s17] sm:$0xff] }
0x1b69   :  { %12013 = vmatprep.mubr.msk.f32.mxu0 %vm12935_vm5, %v12934_v60  ;;  %12016 = vmatprep.subr.mxu1 %v12934_v60 }
0x1b6b   :  { %v12776_v31 = vpop.eup %12775 }
0x1b6c   :  { %v6441_v2 = vmul.f32 %v12776_v31, %v12760_v42  ;;  %v12419_v42 = vpack.c.bf16 %v5731_v19, %v5730_v62  ;;  %v7206_v31 = vld [vmem:[%s15085_s17 + $0x8] sm:$0xff]  ;;  %v7212_v19 = vld [vmem:[%s15086_s18 + $0x10] sm:$0xff] }
0x1b6d   :  { %v7211_v62 = vld [vmem:[%s15086_s18 + $0x8] sm:$0xff] }
0x1b6e   :  { %12014 = vmatmul.mubr.msk.f32.vlgmr.msra.gmra.mrb[42].mxu0 %vm990_vm6, %v6442_v47  ;;  %12420 = vmatprep.subr.bf16.mxu0 %v12419_v42  ;;  %v7207_v47 = vld [vmem:[%s15085_s17 + $0x10] sm:$0xff] }
0x1b6f   :  { %12009 = vmatmul.mubr.msk.f32.vlgmr.msra.gmra.mrb[58].mxu1 %vm990_vm6, %v6441_v2  ;;  %v12778_v5 = vpop.eup %12777  ;;  %12422 = vmatpush3.bf16.msra.mxu0 %v12419_v42  ;;  %v12427_v2 = vpack.c.bf16 %v7206_v31, %v7205_v22 }
0x1b70   :  { %12017 = vmatpush3.msra.mxu1 %v6985_v6  ;;  %12018 = vmatprep.mubr.msk.f32.mxu1 %vm12935_vm5, %v12934_v60  ;;  %v6443_v39 = vmul.f32 %v12778_v5, %v14351_v30  ;;  %v12423_v30 = vpack.c.bf16 %v5733_v7, %v5732_v4  ;;  %v7208_v6 = vld [vmem:[%s15085_s17 + $0x18] sm:$0xff] }
0x1b71   :  { %v12431_v5 = vpack.c.bf16 %v7208_v6, %v7207_v47  ;;  %12428 = vmatprep.subr.bf16.mxu1 %v12427_v2  ;;  %v7213_v4 = vld [vmem:[%s15086_s18 + $0x18] sm:$0xff] }
0x1b72   :  { %12424 = vmatprep.subr.bf16.mxu0 %v12423_v30  ;;  %v12439_v7 = vpack.c.bf16 %v7213_v4, %v7212_v19  ;;  %v7216_v4 = vld [vmem:[%s15086_s18 + $0x30] sm:$0xff] }
0x1b73   :  { %12426 = vmatpush3.bf16.msra.mxu0 %v12423_v30  ;;  %v7214_v30 = vld [vmem:[%s15086_s18 + $0x20] sm:$0xff] }
0x1b77   :  { %12019 = vmatmul.mubr.msk.f32.vlgmr.msra.gmra.mrb[58].mxu1 %vm990_vm6, %v6443_v39  ;;  %v7210_v39 = vld [vmem:[%s15086_s18] sm:$0xff] }
0x1b78   :  { %12430 = vmatpush3.bf16.msra.mxu1 %v12427_v2  ;;  %v12435_v42 = vpack.c.bf16 %v7211_v62, %v7210_v39 }
0x1b79   :  { %12432 = vmatprep.subr.bf16.mxu1 %v12431_v5 }
0x1b7a   :  { %12436 = vmatprep.subr.bf16.mxu0 %v12435_v42 }
0x1b7c   :  { %12434 = vmatpush3.bf16.msra.mxu1 %v12431_v5 }
0x1c41   :  { %v6979_v37 = vpop.f32.mrb[42].mxu0 }
0x1c42   :  { %v12015_v17 = vpop.f32.mrb[43].mxu0  ;;  %12029 = vmatprep.mubr.msk.f32.mxu0 %vm94_vm0, %v6979_v37  ;;  %v7215_v37 = vld [vmem:[%s15086_s18 + $0x28] sm:$0xff] }
0x1c43   :  { %v12443_v17 = vpack.c.bf16 %v7215_v37, %v7214_v30 }
0x1c4a   :  { %v7056_v51 = vpop.f32.mrb[58].mxu1 }
0x1c4b   :  { %v12020_v56 = vpop.f32.mrb[59].mxu1  ;;  %12030 = vmatmul.mubr.msk.f32.vlgmr.msra.gmra.mrb[44].mxu0 %vm94_vm0, %v7056_v51 }
0x1c4c   :  { %12438 = vmatpush3.bf16.msra.mxu0 %v12435_v42 }
0x1c4d   :  { %12440 = vmatprep.subr.bf16.mxu0 %v12439_v7 }
0x1c50   :  { %12442 = vmatpush3.bf16.msra.mxu0 %v12439_v7 }
0x1c51   :  { %12444 = vmatprep.subr.bf16.mxu0 %v12443_v17 }
0x1c54   :  { %12446 = vmatpush3.bf16.msra.mxu0 %v12443_v17 }
0x1d1e   :  { %v12031_v8 = vpop.f32.mrb[44].mxu0 }
0x1d1f   :  { %v7148_v28 = vadd.f32 %v12031_v8, %v7069_v27  ;;  %v7142_v45 = vpop.f32.mrb[45].mxu0 }
0x1d20   :  { %v7143_v44 = vadd.f32 %v7142_v45, %v7069_v27 }
0x1d21   :  { %v14410_v21 = vadd.f32 %v7148_v28, %v14140_v0 }
0x1d22   :  { %v14413_v57 = vadd.f32 %v7143_v44, %v14136_v49 }
0x1d23   :  { %v7156_v25 = vsel %vm94_vm0, %v14410_v21, 0.0 }
0x1d24   :  { %7157 = vadd.xlane.f32.xlu1 %v7156_v25  ;;  %v7153_v38 = vsel %vm94_vm0, %v14413_v57, 0.0 }
0x1d25   :  { %7154 = vadd.xlane.f32.xlu0 %v7153_v38 }
0x1db1   :  { %v7158_v50 = vpop.xlane.xlu1 %7157 }
0x1db2   :  { %v7160_v40 = vmul.f32 0.03125, %v7158_v50  ;;  %v7155_v23 = vpop.xlane.xlu0 %7154 }
0x1db3   :  { %v7159_v26 = vmul.f32 0.03125, %v7155_v23 }
0x1db4   :  { %v14420_v55 = vsub.f32 %v14410_v21, %v7160_v40 }
0x1db5   :  { %v7161_v0 = vsub.f32 %v14413_v57, %v7159_v26 }
0x1db6   :  { %v7164_v11 = vmul.f32 %v14420_v55, %v14420_v55 }
0x1db7   :  { %v7163_v1 = vmul.f32 %v7161_v0, %v7161_v0 }
0x1db8   :  { %v7168_v34 = vsel %vm94_vm0, %v7164_v11, 0.0 }
0x1db9   :  { %v7165_v49 = vsel %vm94_vm0, %v7163_v1, 0.0 }
0x1dba   :  { %7166 = vadd.xlane.f32.xlu0 %v7165_v49 }
0x1dbe   :  { %7169 = vadd.xlane.f32.xlu0 %v7168_v34  ;;  %v14460_v34 = vld [vmem:[%s15090_s22 + $0x8] sm:$0xff] }
0x1dbf   :  { %v7196_v22 = vrot.slane %v14460_v34, %v13440_v53  ;;  %v7202_v2 = vrot.slane %v14460_v34, %v13520_v24 }
0x1e47   :  { %v7167_v51 = vpop.xlane.xlu0 %7166 }
0x1e48   :  { %v7171_v56 = vmul.f32 0.032258064, %v7167_v51 }
0x1e4a   :  { %12779 = vrsqrt.f32 %v7171_v56  ;;  %vm7175_vm7 = vcmp.eq.f32.partialorder %v7171_v56, inf  ;;  %v7178_v44 = vand.u32 2147483648, %v7171_v56  ;;  %vm7177_vm8 = vcmp.eq.f32.partialorder %v7171_v56, 0.0 }
0x1e4b   :  { %v7170_v27 = vpop.xlane.xlu0 %7169 }
0x1e4c   :  { %v7172_v8 = vmul.f32 0.032258064, %v7170_v27 }
0x1e4e   :  { %12781 = vrsqrt.f32 %v7172_v8  ;;  %vm7182_vm9 = vcmp.eq.f32.partialorder %v7172_v8, inf  ;;  %v7185_v26 = vand.u32 2147483648, %v7172_v8  ;;  %vm7184_vm10 = vcmp.eq.f32.partialorder %v7172_v8, 0.0 }
0x1e54   :  { %v12780_v28 = vpop.eup %12779 }
0x1e55   :  { %v7174_v45 = vmul.f32 %v12780_v28, %v7171_v56 }
0x1e57   :  { %v7176_v25 = vsel %vm7175_vm7, %v7171_v56, %v7174_v45 }
0x1e58   :  { %v12782_v38 = vpop.eup %12781  ;;  %v7179_v50 = vsel %vm7177_vm8, %v7178_v44, %v7176_v25 }
0x1e59   :  { %v7187_v40 = vadd.f32 1e-06, %v7179_v50  ;;  %v7181_v23 = vmul.f32 %v12782_v38, %v7172_v8 }
0x1e5b   :  { %12783 = vrcp.f32 %v7187_v40  ;;  %v7183_v1 = vsel %vm7182_vm9, %v7172_v8, %v7181_v23  ;;  %v7310_v8 = vrot.slane %v14405_v52, %v13158_v48 }
0x1e5c   :  { %v7186_v49 = vsel %vm7184_vm10, %v7185_v26, %v7183_v1 }
0x1e5d   :  { %v7188_v11 = vadd.f32 1e-06, %v7186_v49 }
0x1e5f   :  { %12785 = vrcp.f32 %v7188_v11 }
0x1e65   :  { %v12784_v31 = vpop.eup %12783 }
0x1e66   :  { %v7191_v47 = vmul.f32 %v12784_v31, %v7161_v0  ;;  %v7217_v0 = vld [vmem:[%s15086_s18 + $0x38] sm:$0xff] }
0x1e67   :  { %v12447_v7 = vpack.c.bf16 %v7217_v0, %v7216_v4 }
0x1e68   :  { %v7197_v6 = vmul.f32 %v7196_v22, %v7191_v47 }
0x1e69   :  { %v12786_v5 = vpop.eup %12785  ;;  %12448 = vmatprep.subr.bf16.mxu0 %v12447_v7 }
0x1e6a   :  { %v7192_v39 = vmul.f32 %v12786_v5, %v14420_v55  ;;  %v7203_v62 = vadd.f32 %v7202_v2, %v7197_v6  ;;  %12450 = vmatpush3.bf16.msra.mxu0 %v12447_v7  ;;  %v11108_v55 = vld [vmem:[%s15089_s21] ss:$0 sm:$0xff]  ;;  %v11114_v6 = vld [vmem:[%s15080_s12 + $0x28] sm:$0xff]  ;;  %v11115_v5 = vld [vmem:[%s15080_s12 + $0x30] sm:$0xff] }
0x1e6b   :  { %12083 = vmatprep.subr.mxu0 %v12934_v60 }
0x1e6c   :  { %v7198_v19 = vmul.f32 %v7196_v22, %v7192_v39  ;;  %12040 = vmatprep.mubr.msk.f32.mxu1 %vm94_vm0, %v7203_v62  ;;  %v11116_v62 = vld [vmem:[%s15080_s12 + $0x38] sm:$0xff] }
0x1e6e   :  { %v7204_v42 = vadd.f32 %v7202_v2, %v7198_v19  ;;  %v11113_v2 = vld [vmem:[%s15080_s12 + $0x20] sm:$0xff]  ;;  %v12455_v19 = vpack.c.bf16 %v11116_v62, %v11115_v5 }
0x1e6f   :  { %v12451_v39 = vpack.c.bf16 %v11114_v6, %v11113_v2 }
0x1e70   :  { %12041 = vmatmul.mubr.msk.f32.vlgmr.msra.gmra.mrb[60].mxu1 %vm94_vm0, %v7204_v42 }
0x1e71   :  { %12452 = vmatprep.subr.bf16.mxu1 %v12451_v39 }
0x1e72   :  { %12454 = vmatpush3.bf16.msra.mxu1 %v12451_v39 }
0x1e73   :  { %12456 = vmatprep.subr.bf16.mxu1 %v12455_v19 }
0x1e76   :  { %12458 = vmatpush3.bf16.msra.mxu1 %v12455_v19 }
0x1e77   :  { %12073 = vmatprep.subr.mxu1 %v12934_v60 }
0x1f43   :  { %v12042_v30 = vpop.f32.mrb[60].mxu1 }
0x1f44   :  { %v7302_v37 = vadd.f32 %v12042_v30, %v11108_v55  ;;  %v7296_v17 = vpop.f32.mrb[61].mxu1 }
0x1f45   :  { %v7297_v51 = vadd.f32 %v11108_v55, %v7296_v17 }
0x1f46   :  { %v7306_v27 = vmax.f32 %v7302_v37, 0.0 }
0x1f47   :  { %v7305_v56 = vmax.f32 %v7297_v51, 0.0 }
0x1f49   :  { %12059 = vmatprep.mubr.msk.f32.mxu0 %vm1946_vm11, %v7305_v56 }
0x1f4a   :  { %12060 = vmatmul.mubr.msk.f32.vlgmr.msra.gmra.mrb[46].mxu0 %vm1946_vm11, %v7306_v27 }
0x1f4b   :  { %12085 = vmatprep.mubr.msk.f32.mxu0 %vm12935_vm5, %v12934_v60 }
0x201d   :  { %v12061_v28 = vpop.f32.mrb[46].mxu0 }
0x201e   :  { %v7389_v45 = vadd.f32 %v12061_v28, %v7310_v8  ;;  %v7383_v44 = vpop.f32.mrb[47].mxu0 }
0x201f   :  { %v7384_v25 = vadd.f32 %v7383_v44, %v7310_v8 }
0x2020   :  { %v14486_v38 = vadd.f32 %v7389_v45, %v14410_v21 }
0x2021   :  { %v14489_v50 = vadd.f32 %v7384_v25, %v14413_v57 }
0x2022   :  { %v7397_v40 = vsel %vm94_vm0, %v14486_v38, 0.0 }
0x2023   :  { %7398 = vadd.xlane.f32.xlu1 %v7397_v40  ;;  %v7394_v23 = vsel %vm94_vm0, %v14489_v50, 0.0  ;;  %v7437_v40 = vrot.slane %v14460_v34, %v13756_v58  ;;  %v11118_v58 = vld [vmem:[%s15087_s19 + $0x1] ss:$0 sm:$0xff] }
0x2024   :  { %7395 = vadd.xlane.f32.xlu0 %v7394_v23 }
0x20b0   :  { %v7399_v26 = vpop.xlane.xlu1 %7398 }
0x20b1   :  { %v7401_v52 = vmul.f32 0.03125, %v7399_v26  ;;  %v7396_v1 = vpop.xlane.xlu0 %7395 }
0x20b2   :  { %v7400_v49 = vmul.f32 0.03125, %v7396_v1 }
0x20b3   :  { %v7403_v11 = vsub.f32 %v14486_v38, %v7401_v52 }
0x20b4   :  { %v7402_v21 = vsub.f32 %v14489_v50, %v7400_v49  ;;  %v7443_v49 = vrot.slane %v14460_v34, %v14065_v12 }
0x20b5   :  { %v7405_v22 = vmul.f32 %v7403_v11, %v7403_v11 }
0x20b6   :  { %v7404_v31 = vmul.f32 %v7402_v21, %v7402_v21 }
0x20b7   :  { %v7409_v57 = vsel %vm94_vm0, %v7405_v22, 0.0 }
0x20b8   :  { %7410 = vadd.xlane.f32.xlu1 %v7409_v57  ;;  %v7406_v47 = vsel %vm94_vm0, %v7404_v31, 0.0 }
0x20b9   :  { %7407 = vadd.xlane.f32.xlu0 %v7406_v47 }
0x2145   :  { %v7411_v42 = vpop.xlane.xlu1 %7410 }
0x2146   :  { %v7413_v4 = vmul.f32 0.032258064, %v7411_v42  ;;  %v7408_v0 = vpop.xlane.xlu0 %7407 }
0x2147   :  { %v7412_v7 = vmul.f32 0.032258064, %v7408_v0 }
0x2148   :  { %12787 = vrsqrt.f32 %v7413_v4  ;;  %vm7423_vm12 = vcmp.eq.f32.partialorder %v7413_v4, inf  ;;  %v7426_v17 = vand.u32 2147483648, %v7413_v4  ;;  %vm7425_vm13 = vcmp.eq.f32.partialorder %v7413_v4, 0.0 }
0x2149   :  { %12789 = vrsqrt.f32 %v7412_v7  ;;  %vm7416_vm14 = vcmp.eq.f32.partialorder %v7412_v7, inf  ;;  %v7419_v27 = vand.u32 2147483648, %v7412_v7  ;;  %vm7418_vm15 = vcmp.eq.f32.partialorder %v7412_v7, 0.0 }
0x2152   :  { %v12788_v55 = vpop.eup %12787 }
0x2153   :  { %v12790_v30 = vpop.eup %12789  ;;  %v7422_v37 = vmul.f32 %v12788_v55, %v7413_v4 }
0x2154   :  { %v7415_v51 = vmul.f32 %v12790_v30, %v7412_v7 }
0x2155   :  { %v7424_v56 = vsel %vm7423_vm12, %v7413_v4, %v7422_v37 }
0x2156   :  { %v7427_v8 = vsel %vm7425_vm13, %v7426_v17, %v7424_v56  ;;  %v7417_v28 = vsel %vm7416_vm14, %v7412_v7, %v7415_v51 }
0x2157   :  { %v7429_v45 = vadd.f32 1e-06, %v7427_v8  ;;  %v7420_v44 = vsel %vm7418_vm15, %v7419_v27, %v7417_v28 }
0x2158   :  { %v7428_v25 = vadd.f32 1e-06, %v7420_v44  ;;  %v12896_v44 = vld [vmem:[%s15121_s5] sm:$0xff] }
0x2159   :  { %12791 = vrcp.f32 %v7429_v45 }
0x215a   :  { %12793 = vrcp.f32 %v7428_v25 }
0x2163   :  { %v12792_v23 = vpop.eup %12791 }
0x2164   :  { %v12794_v26 = vpop.eup %12793  ;;  %v7433_v52 = vmul.f32 %v12792_v23, %v7403_v11 }
0x2165   :  { %v7432_v1 = vmul.f32 %v12794_v26, %v7402_v21 }
0x2166   :  { %v7439_v22 = vmul.f32 %v7437_v40, %v7433_v52 }
0x2167   :  { %v7438_v31 = vmul.f32 %v7437_v40, %v7432_v1 }
0x2168   :  { %v7445_v47 = vadd.f32 %v7443_v49, %v7439_v22 }
0x2169   :  { %v7444_v57 = vadd.f32 %v7443_v49, %v7438_v31 }
0x216b   :  { %12070 = vmatprep.mubr.msk.f32.mxu1 %vm94_vm0, %v7444_v57  ;;  %v12897_v57 = vld [vmem:[%s15121_s5 + $0x8] sm:$0xff] }
0x216c   :  { %12071 = vmatmul.mubr.msk.f32.vlgmr.msra.gmra.mrb[62].mxu1 %vm94_vm0, %v7445_v47 }
0x216d   :  { %12075 = vmatprep.mubr.msk.f32.mxu1 %vm12935_vm5, %v12934_v60 }
0x223f   :  { %v12072_v11 = vpop.f32.mrb[62].mxu1 }
0x2240   :  { %v14523_v21 = vadd.f32 %v12072_v11, %v11118_v58  ;;  %v7531_v2 = vpop.f32.mrb[63].mxu1 }
0x2241   :  { %v14525_v12 = vadd.f32 %v11118_v58, %v7531_v2 }
0x2242   :  { %v7546_v6 = vmul.f32 %v14523_v21, %v13168_v59  ;;  %v7548_v19 = vmul.f32 %v14523_v21, %v13181_v63  ;;  %v7550_v4 = vmul.f32 %v14523_v21, %v13194_v9  ;;  %v7552_v0 = vmul.f32 %v14523_v21, %v13207_v14 }
0x2243   :  { %v7545_v5 = vmul.f32 %v14525_v12, %v13183_v3  ;;  %v7547_v39 = vmul.f32 %v14525_v12, %v13172_v61  ;;  %v7549_v62 = vmul.f32 %v14525_v12, %v13197_v10  ;;  %v7551_v42 = vmul.f32 %v14525_v12, %v13211_v16 }
0x2244   :  { %7640 = vrot.lane.b32.xlu1 %v7546_v6, %s15118_s0 }
0x2245   :  { %7562 = vrot.lane.b32.xlu0 %v7545_v5, %s15118_s0 }
0x2248   :  { %7718 = vrot.lane.b32.xlu1 %v7547_v39, %s15118_s0 }
0x2249   :  { %7868 = vrot.lane.b32.xlu0 %v7549_v62, %s15118_s0 }
0x224c   :  { %7793 = vrot.lane.b32.xlu1 %v7548_v19, %s15118_s0 }
0x224d   :  { %8018 = vrot.lane.b32.xlu0 %v7551_v42, %s15118_s0 }
0x2250   :  { %7943 = vrot.lane.b32.xlu1 %v7550_v4, %s15118_s0 }
0x2254   :  { %8093 = vrot.lane.b32.xlu1 %v7552_v0, %s15118_s0 }
0x22b6   :  { %v7641_v7 = vpop.permute.xlu1 %7640 }
0x22b7   :  { %v7563_v55 = vpop.permute.xlu0 %7562 }
0x22b8   :  { %12074 = vmatpush3.xpose.msk.msra.mxu1 %vm94_vm0, %v7563_v55 }
0x22b9   :  { %12078 = vmatprep.subr.mxu1 %v12934_v60 }
0x22ba   :  { %v7719_v30 = vpop.permute.xlu1 %7718 }
0x22bb   :  { %12076 = vmatmul.mubr.msk.f32.vlgmr.msra.gmra.mrb[64].mxu1 %vm94_vm0, %v14525_v12  ;;  %12084 = vmatpush3.xpose.msk.msra.mxu0 %vm94_vm0, %v7719_v30  ;;  %v7869_v37 = vpop.permute.xlu0 %7868 }
0x22bc   :  { %12079 = vmatpush3.xpose.msk.msra.mxu1 %vm94_vm0, %v7641_v7  ;;  %12093 = vmatprep.subr.mxu0 %v12934_v60 }
0x22bd   :  { %12080 = vmatprep.mubr.msk.f32.mxu1 %vm12935_vm5, %v12934_v60  ;;  %12088 = vmatprep.subr.mxu1 %v12934_v60 }
0x22be   :  { %12086 = vmatmul.mubr.msk.f32.vlgmr.msra.gmra.mrb[48].mxu0 %vm94_vm0, %v14525_v12  ;;  %v7794_v17 = vpop.permute.xlu1 %7793 }
0x22bf   :  { %12081 = vmatmul.mubr.msk.f32.vlgmr.msra.gmra.mrb[66].mxu1 %vm94_vm0, %v14523_v21  ;;  %12094 = vmatpush3.xpose.msk.msra.mxu0 %vm94_vm0, %v7869_v37  ;;  %v8019_v51 = vpop.permute.xlu0 %8018 }
0x22c0   :  { %12089 = vmatpush3.xpose.msk.msra.mxu1 %vm94_vm0, %v7794_v17  ;;  %12095 = vmatprep.mubr.msk.f32.mxu0 %vm12935_vm5, %v12934_v60 }
0x22c1   :  { %12090 = vmatprep.mubr.msk.f32.mxu1 %vm12935_vm5, %v12934_v60  ;;  %12103 = vmatprep.subr.mxu0 %v12934_v60 }
0x22c2   :  { %v7944_v56 = vpop.permute.xlu1 %7943  ;;  %12096 = vmatmul.mubr.msk.f32.vlgmr.msra.gmra.mrb[50].mxu0 %vm94_vm0, %v14525_v12  ;;  %12098 = vmatprep.subr.mxu1 %v12934_v60 }
0x22c3   :  { %12091 = vmatmul.mubr.msk.f32.vlgmr.msra.gmra.mrb[68].mxu1 %vm94_vm0, %v14523_v21  ;;  %12104 = vmatpush3.xpose.msk.msra.mxu0 %vm94_vm0, %v8019_v51 }
0x22c4   :  { %12099 = vmatpush3.xpose.msk.msra.mxu1 %vm94_vm0, %v7944_v56  ;;  %12105 = vmatprep.mubr.msk.f32.mxu0 %vm12935_vm5, %v12934_v60 }
0x22c5   :  { %12100 = vmatprep.mubr.msk.f32.mxu1 %vm12935_vm5, %v12934_v60  ;;  %12108 = vmatprep.subr.mxu1 %v12934_v60 }
0x22c6   :  { %v8094_v27 = vpop.permute.xlu1 %8093  ;;  %12106 = vmatmul.mubr.msk.f32.vlgmr.msra.gmra.mrb[52].mxu0 %vm94_vm0, %v14525_v12  ;;  %12113 = vmatprep.subr.mxu0 %v12934_v60 }
0x22c7   :  { %12101 = vmatmul.mubr.msk.f32.vlgmr.msra.gmra.mrb[70].mxu1 %vm94_vm0, %v14523_v21  ;;  %12115 = vmatprep.mubr.msk.f32.mxu0 %vm12935_vm5, %v12934_v60 }
0x22c8   :  { %12109 = vmatpush3.xpose.msk.msra.mxu1 %vm94_vm0, %v8094_v27  ;;  %12110 = vmatprep.mubr.msk.f32.mxu1 %vm12935_vm5, %v12934_v60 }
0x22c9   :  { %12118 = vmatprep.subr.mxu1 %v12934_v60 }
0x22cb   :  { %12111 = vmatmul.mubr.msk.f32.vlgmr.msra.gmra.mrb[72].mxu1 %vm94_vm0, %v14523_v21 }
0x22cc   :  { %12120 = vmatprep.mubr.msk.f32.mxu1 %vm12935_vm5, %v12934_v60 }
0x238e   :  { %v7635_v8 = vpop.f32.mrb[64].mxu1 }
0x238f   :  { %v8167_v28 = vmul.f32 0.35355338, %v7635_v8  ;;  %v12077_v45 = vpop.f32.mrb[65].mxu1 }
0x2390   :  { %v7554_v45 = vmul.f32 %v14523_v21, %v13311_v13 }
0x2391   :  { %v8175_v25 = vadd.f32 %v12896_v44, %v8167_v28  ;;  %v7788_v40 = vpop.f32.mrb[48].mxu0 }
0x2392   :  { %v8169_v23 = vmul.f32 0.35355338, %v7788_v40  ;;  %v7713_v26 = vpop.f32.mrb[66].mxu1  ;;  %v12087_v52 = vpop.f32.mrb[49].mxu0  ;;  %v7555_v40 = vmul.f32 %v14525_v12, %v13317_v18  ;;  %v7556_v18 = vmul.f32 %v14523_v21, %v13338_v29 }
0x2393   :  { %v8168_v1 = vmul.f32 0.35355338, %v7713_v26  ;;  %v12082_v49 = vpop.f32.mrb[67].mxu1  ;;  %v8183_v22 = vsel %vm990_vm6, %v8175_v25, -inf }
0x2394   :  { %v8177_v31 = vadd.f32 %v12896_v44, %v8169_v23  ;;  %8184 = vmax.xlane.f32.xlu0 %v8183_v22 }
0x2395   :  { %v8176_v47 = vadd.f32 %v12897_v57, %v8168_v1  ;;  %v7938_v58 = vpop.f32.mrb[50].mxu0 }
0x2396   :  { %v8171_v11 = vmul.f32 0.35355338, %v7938_v58  ;;  %v7863_v2 = vpop.f32.mrb[68].mxu1  ;;  %v12097_v6 = vpop.f32.mrb[51].mxu0  ;;  %v8189_v5 = vsel %vm990_vm6, %v8177_v31, -inf }
0x2397   :  { %v8170_v39 = vmul.f32 0.35355338, %v7863_v2  ;;  %v12092_v62 = vpop.f32.mrb[69].mxu1  ;;  %v8186_v19 = vsel %vm990_vm6, %v8176_v47, -inf }
0x2398   :  { %v14608_v42 = vadd.f32 %v12896_v44, %v8171_v11  ;;  %8190 = vmax.xlane.f32.xlu0 %v8189_v5  ;;  %8187 = vmax.xlane.f32.xlu1 %v8186_v19 }
0x2399   :  { %v8088_v4 = vpop.f32.mrb[52].mxu0  ;;  %v14612_v30 = vadd.f32 %v12897_v57, %v8170_v39 }
0x239a   :  { %v8013_v0 = vpop.f32.mrb[70].mxu1  ;;  %v12107_v7 = vpop.f32.mrb[53].mxu0  ;;  %v8195_v55 = vsel %vm990_vm6, %v14608_v42, -inf  ;;  %v8173_v37 = vmul.f32 0.35355338, %v8088_v4 }
0x239b   :  { %v12102_v17 = vpop.f32.mrb[71].mxu1  ;;  %v8192_v8 = vsel %vm990_vm6, %v14612_v30, -inf  ;;  %v8172_v23 = vmul.f32 0.35355338, %v8013_v0 }
0x239c   :  { %8196 = vmax.xlane.f32.xlu0 %v8195_v55  ;;  %v14614_v56 = vadd.f32 %v12896_v44, %v8173_v37  ;;  %v7553_v44 = vmul.f32 %v14525_v12, %v13323_v20  ;;  %v7558_v17 = vmul.f32 %v14523_v21, %v13345_v33 }
0x239d   :  { %v8180_v26 = vadd.f32 %v12897_v57, %v8172_v23 }
0x239e   :  { %v8163_v51 = vpop.f32.mrb[72].mxu1  ;;  %v8201_v28 = vsel %vm990_vm6, %v14614_v56, -inf }
0x239f   :  { %v12112_v27 = vpop.f32.mrb[73].mxu1  ;;  %v8174_v52 = vmul.f32 0.35355338, %v8163_v51  ;;  %v8198_v49 = vsel %vm990_vm6, %v8180_v26, -inf  ;;  %v7557_v51 = vmul.f32 %v14525_v12, %v13343_v32 }
0x23a0   :  { %8193 = vmax.xlane.f32.xlu0 %v8192_v8 }
0x23a1   :  { %v8182_v1 = vadd.f32 %v12897_v57, %v8174_v52 }
0x23a3   :  { %v8204_v13 = vsel %vm990_vm6, %v8182_v1, -inf }
0x23a4   :  { %8202 = vmax.xlane.f32.xlu0 %v8201_v28 }
0x23a9   :  { %8349 = vrot.lane.b32.xlu1 %v7554_v45, %s15119_s9 }
0x23ad   :  { %8426 = vrot.lane.b32.xlu1 %v7555_v40, %s15119_s9 }
0x23ba   :  { %8272 = vrot.lane.b32.xlu0 %v7553_v44, %s15119_s9 }
0x23d1   :  { %8199 = vmax.xlane.f32.xlu1 %v8198_v49 }
0x23d5   :  { %8205 = vmax.xlane.f32.xlu1 %v8204_v13 }
0x23e6   :  { %8503 = vrot.lane.b32.xlu1 %v7556_v18, %s15119_s9 }
0x2421   :  { %v8185_v22 = vpop.xlane.xlu0 %8184 }
0x2422   :  { %v8207_v58 = vsub.f32 %v8175_v25, %v8185_v22 }
0x2424   :  { %v8215_v20 = vmul.f32 1.442695, %v8207_v58 }
0x2425   :  { %v8188_v11 = vpop.xlane.xlu1 %8187  ;;  %v8191_v2 = vpop.xlane.xlu0 %8190 }
0x2426   :  { %12795 = vpow2.f32 %v8215_v20  ;;  %v8208_v6 = vsub.f32 %v8176_v47, %v8188_v11  ;;  %v8209_v5 = vsub.f32 %v8177_v31, %v8191_v2 }
0x2428   :  { %v8217_v57 = vmul.f32 1.442695, %v8208_v6  ;;  %v8219_v39 = vmul.f32 1.442695, %v8209_v5  ;;  %v7560_v6 = vmul.f32 %v14523_v21, %v13349_v36  ;;  %v7559_v5 = vmul.f32 %v14525_v12, %v13347_v35 }
0x2429   :  { %v8350_v62 = vpop.permute.xlu1 %8349  ;;  %v8197_v19 = vpop.xlane.xlu0 %8196 }
0x242a   :  { %12797 = vpow2.f32 %v8217_v57  ;;  %12119 = vmatpush3.msra.mxu1 %v8350_v62  ;;  %v8211_v8 = vsub.f32 %v14608_v42, %v8197_v19 }
0x242b   :  { %12799 = vpow2.f32 %v8219_v39  ;;  %12128 = vmatprep.subr.mxu1 %v12934_v60 }
0x242c   :  { %v8223_v45 = vmul.f32 1.442695, %v8211_v8 }
0x242d   :  { %v8194_v29 = vpop.xlane.xlu0 %8193  ;;  %v8427_v40 = vpop.permute.xlu1 %8426 }
0x242e   :  { %v8210_v27 = vsub.f32 %v14612_v30, %v8194_v29 }
0x2430   :  { %v12796_v4 = vpop.eup %12795  ;;  %v8221_v28 = vmul.f32 1.442695, %v8210_v27 }
0x2431   :  { %v8203_v0 = vpop.xlane.xlu0 %8202  ;;  %v8231_v25 = vsel %vm990_vm6, %v12796_v4, 0.0 }
0x2432   :  { %8232 = vadd.xlane.f32.xlu0 %v8231_v25  ;;  %v8213_v44 = vsub.f32 %v14614_v56, %v8203_v0  ;;  %12801 = vpow2.f32 %v8221_v28 }
0x2433   :  { %12803 = vpow2.f32 %v8223_v45 }
0x2434   :  { %v14636_v7 = vpop.eup %12797  ;;  %v8227_v23 = vmul.f32 1.442695, %v8213_v44 }
0x2435   :  { %v14638_v55 = vpop.eup %12799  ;;  %v8273_v31 = vpop.permute.xlu0 %8272  ;;  %v8234_v47 = vsel %vm990_vm6, %v14636_v7, 0.0 }
0x2436   :  { %8235 = vadd.xlane.f32.xlu1 %v8234_v47  ;;  %v8237_v37 = vsel %vm990_vm6, %v14638_v55, 0.0  ;;  %12114 = vmatpush3.msra.mxu0 %v8273_v31  ;;  %12805 = vpow2.f32 %v8227_v23 }
0x2437   :  { %8238 = vadd.xlane.f32.xlu0 %v8237_v37  ;;  %12123 = vmatprep.subr.mxu0 %v12934_v60 }
0x243c   :  { %v12802_v22 = vpop.eup %12801 }
0x243d   :  { %v12804_v30 = vpop.eup %12803  ;;  %v8240_v42 = vsel %vm990_vm6, %v12802_v22, 0.0 }
0x243e   :  { %v8243_v58 = vsel %vm990_vm6, %v12804_v30, 0.0 }
0x2440   :  { %v14656_v56 = vpop.eup %12805 }
0x2447   :  { %8657 = vrot.lane.b32.xlu1 %v7558_v17, %s15119_s9 }
0x244d   :  { %8580 = vrot.lane.b32.xlu0 %v7557_v51, %s15119_s9 }
0x245e   :  { %v8200_v33 = vpop.xlane.xlu1 %8199 }
0x245f   :  { %v8212_v52 = vsub.f32 %v8180_v26, %v8200_v33 }
0x2461   :  { %v8225_v49 = vmul.f32 1.442695, %v8212_v52 }
0x2462   :  { %v8206_v13 = vpop.xlane.xlu1 %8205 }
0x2463   :  { %12807 = vpow2.f32 %v8225_v49  ;;  %v8214_v32 = vsub.f32 %v8182_v1, %v8206_v13  ;;  %v8249_v1 = vsel %vm990_vm6, %v14656_v56, 0.0  ;;  %v11121_v13 = vld [vmem:[%s15081_s13 + $0x20] sm:$0xff] }
0x2465   :  { %v8229_v18 = vmul.f32 1.442695, %v8214_v32  ;;  %v11122_v32 = vld [vmem:[%s15081_s13 + $0x28] sm:$0xff] }
0x2466   :  { %v8504_v57 = vpop.permute.xlu1 %8503 }
0x2467   :  { %12809 = vpow2.f32 %v8229_v18  ;;  %v12459_v18 = vpack.c.bf16 %v11122_v32, %v11121_v13 }
0x246b   :  { %8241 = vadd.xlane.f32.xlu1 %v8240_v42 }
0x246c   :  { %8244 = vadd.xlane.f32.xlu0 %v8243_v58  ;;  %v11157_v58 = vld [vmem:[%s15083_s15 + $0x20] sm:$0xff] }
0x246d   :  { %v14658_v20 = vpop.eup %12807 }
0x246e   :  { %v8246_v26 = vsel %vm990_vm6, %v14658_v20, 0.0 }
0x246f   :  { %8247 = vadd.xlane.f32.xlu1 %v8246_v26 }
0x2470   :  { %8250 = vadd.xlane.f32.xlu0 %v8249_v1 }
0x2471   :  { %v14664_v11 = vpop.eup %12809 }
0x2472   :  { %v8252_v2 = vsel %vm990_vm6, %v14664_v11, 0.0 }
0x2473   :  { %8253 = vadd.xlane.f32.xlu1 %v8252_v2  ;;  %v11160_v2 = vld [vmem:[%s15083_s15 + $0x38] sm:$0xff] }
0x2484   :  { %8811 = vrot.lane.b32.xlu1 %v7560_v6, %s15119_s9 }
0x2486   :  { %8734 = vrot.lane.b32.xlu0 %v7559_v5, %s15119_s9 }
0x24bf   :  { %v8233_v39 = vpop.xlane.xlu0 %8232 }
0x24c0   :  { %12811 = vrcp.f32 %v8233_v39  ;;  %v8896_v39 = vrot.slane %v14460_v34, %v13150_v46 }
0x24c3   :  { %v8236_v62 = vpop.xlane.xlu1 %8235 }
0x24c4   :  { %12813 = vrcp.f32 %v8236_v62  ;;  %v8239_v19 = vpop.xlane.xlu0 %8238 }
0x24c5   :  { %12815 = vrcp.f32 %v8239_v19 }
0x24c8   :  { %v8581_v12 = vpop.permute.xlu0 %8580 }
0x24ca   :  { %v12812_v29 = vpop.eup %12811 }
0x24cb   :  { %v8263_v0 = vmul.f32 %v12812_v29, %v12796_v4  ;;  %v8658_v4 = vpop.permute.xlu1 %8657 }
0x24cd   :  { %12116 = vmatmul.mubr.msk.f32.vlgmr.msra.gmra.mrb[54].mxu0 %vm990_vm6, %v8263_v0 }
0x24ce   :  { %v12814_v25 = vpop.eup %12813  ;;  %12124 = vmatpush3.msra.mxu0 %v8427_v40  ;;  %12125 = vmatprep.mubr.msk.f32.mxu0 %vm12935_vm5, %v12934_v60 }
0x24cf   :  { %v8264_v35 = vmul.f32 %v12814_v25, %v14636_v7  ;;  %12133 = vmatprep.subr.mxu0 %v12934_v60  ;;  %v12816_v36 = vpop.eup %12815 }
0x24d0   :  { %v8265_v21 = vmul.f32 %v12816_v36, %v14638_v55 }
0x24d1   :  { %12121 = vmatmul.mubr.msk.f32.vlgmr.msra.gmra.mrb[74].mxu1 %vm990_vm6, %v8264_v35 }
0x24d2   :  { %12129 = vmatpush3.msra.mxu1 %v8504_v57  ;;  %12130 = vmatprep.mubr.msk.f32.mxu1 %vm12935_vm5, %v12934_v60 }
0x24d3   :  { %12138 = vmatprep.subr.mxu1 %v12934_v60 }
0x24d5   :  { %12126 = vmatmul.mubr.msk.f32.vlgmr.msra.gmra.mrb[54].mxu0 %vm990_vm6, %v8265_v21 }
0x24d6   :  { %12134 = vmatpush3.msra.mxu0 %v8581_v12  ;;  %12135 = vmatprep.mubr.msk.f32.mxu0 %vm12935_vm5, %v12934_v60 }
0x24d7   :  { %12143 = vmatprep.subr.mxu0 %v12934_v60 }
0x24f8   :  { %v8242_v7 = vpop.xlane.xlu1 %8241 }
0x24f9   :  { %12817 = vrcp.f32 %v8242_v7  ;;  %v8245_v31 = vpop.xlane.xlu0 %8244 }
0x24fa   :  { %12819 = vrcp.f32 %v8245_v31 }
0x24fc   :  { %v8248_v47 = vpop.xlane.xlu1 %8247 }
0x24fd   :  { %v8251_v37 = vpop.xlane.xlu0 %8250  ;;  %12821 = vrcp.f32 %v8248_v47 }
0x24fe   :  { %12823 = vrcp.f32 %v8251_v37 }
0x2500   :  { %v8254_v27 = vpop.xlane.xlu1 %8253 }
0x2501   :  { %12825 = vrcp.f32 %v8254_v27  ;;  %v8735_v28 = vpop.permute.xlu0 %8734 }
0x2503   :  { %v12818_v55 = vpop.eup %12817 }
0x2504   :  { %v12820_v17 = vpop.eup %12819  ;;  %v8266_v51 = vmul.f32 %v12818_v55, %v12802_v22  ;;  %v8812_v33 = vpop.permute.xlu1 %8811  ;;  %v11123_v22 = vld [vmem:[%s15081_s13 + $0x30] sm:$0xff] }
0x2505   :  { %v8267_v8 = vmul.f32 %v12820_v17, %v12804_v30  ;;  %v11124_v30 = vld [vmem:[%s15081_s13 + $0x38] sm:$0xff] }
0x2506   :  { %12131 = vmatmul.mubr.msk.f32.vlgmr.msra.gmra.mrb[74].mxu1 %vm990_vm6, %v8266_v51  ;;  %v12463_v42 = vpack.c.bf16 %v11124_v30, %v11123_v22 }
0x2507   :  { %12136 = vmatmul.mubr.msk.f32.vlgmr.msra.gmra.mrb[54].mxu0 %vm990_vm6, %v8267_v8  ;;  %12139 = vmatpush3.msra.mxu1 %v8658_v4  ;;  %v12822_v45 = vpop.eup %12821 }
0x2508   :  { %12144 = vmatpush3.msra.mxu0 %v8735_v28  ;;  %12140 = vmatprep.mubr.msk.f32.mxu1 %vm12935_vm5, %v12934_v60  ;;  %v12824_v40 = vpop.eup %12823  ;;  %v8268_v44 = vmul.f32 %v12822_v45, %v14658_v20 }
0x2509   :  { %12145 = vmatprep.mubr.msk.f32.mxu0 %vm12935_vm5, %v12934_v60  ;;  %12148 = vmatprep.subr.mxu1 %v12934_v60  ;;  %v8269_v23 = vmul.f32 %v12824_v40, %v14656_v56  ;;  %v11158_v56 = vld [vmem:[%s15083_s15 + $0x28] sm:$0xff]  ;;  %v11151_v40 = vld [vmem:[%s15082_s14 + $0x20] sm:$0xff] }
0x250a   :  { %12460 = vmatprep.subr.bf16.mxu0 %v12459_v18  ;;  %v12475_v20 = vpack.c.bf16 %v11158_v56, %v11157_v58 }
0x250b   :  { %v12826_v52 = vpop.eup %12825 }
0x250c   :  { %v8270_v49 = vmul.f32 %v12826_v52, %v14664_v11  ;;  %v11159_v11 = vld [vmem:[%s15083_s15 + $0x30] sm:$0xff]  ;;  %v11154_v52 = vld [vmem:[%s15082_s14 + $0x38] sm:$0xff] }
0x250d   :  { %v12479_v6 = vpack.c.bf16 %v11160_v2, %v11159_v11 }
0x250e   :  { %12141 = vmatmul.mubr.msk.f32.vlgmr.msra.gmra.mrb[74].mxu1 %vm990_vm6, %v8268_v44  ;;  %v11152_v44 = vld [vmem:[%s15082_s14 + $0x28] sm:$0xff] }
0x250f   :  { %12146 = vmatmul.mubr.msk.f32.vlgmr.msra.gmra.mrb[54].mxu0 %vm990_vm6, %v8269_v23  ;;  %12149 = vmatpush3.msra.mxu1 %v8812_v33  ;;  %v11153_v23 = vld [vmem:[%s15082_s14 + $0x30] sm:$0xff]  ;;  %v12467_v33 = vpack.c.bf16 %v11152_v44, %v11151_v40  ;;  %v12904_v44 = vld [vmem:[%s15114_s30 + $0x5] ss:$0 sm:$0xff] }
0x2510   :  { %12150 = vmatprep.mubr.msk.f32.mxu1 %vm12935_vm5, %v12934_v60  ;;  %12462 = vmatpush3.bf16.msra.mxu0 %v12459_v18 }
0x2511   :  { %12464 = vmatprep.subr.bf16.mxu0 %v12463_v42  ;;  %12468 = vmatprep.subr.bf16.mxu1 %v12467_v33 }
0x2514   :  { %12466 = vmatpush3.bf16.msra.mxu0 %v12463_v42 }
0x2515   :  { %12476 = vmatprep.subr.bf16.mxu0 %v12475_v20 }
0x2516   :  { %12151 = vmatmul.mubr.msk.f32.vlgmr.msra.gmra.mrb[74].mxu1 %vm990_vm6, %v8270_v49  ;;  %v12471_v49 = vpack.c.bf16 %v11154_v52, %v11153_v23 }
0x2517   :  { %12470 = vmatpush3.bf16.msra.mxu1 %v12467_v33  ;;  %v12905_v33 = vld [vmem:[%s15114_s30 + $0x7] ss:$0 sm:$0xff] }
0x2518   :  { %12472 = vmatprep.subr.bf16.mxu1 %v12471_v49 }
0x251b   :  { %12474 = vmatpush3.bf16.msra.mxu1 %v12471_v49 }
0x251c   :  { %12186 = vmatprep.subr.mxu1 %v12934_v60 }
0x25e2   :  { %v8806_v26 = vpop.f32.mrb[54].mxu0 }
0x25e3   :  { %v12147_v1 = vpop.f32.mrb[55].mxu0  ;;  %12161 = vmatprep.mubr.msk.f32.mxu0 %vm94_vm0, %v8806_v26 }
0x25e9   :  { %v8883_v5 = vpop.f32.mrb[74].mxu1 }
0x25ea   :  { %v12152_v57 = vpop.f32.mrb[75].mxu1  ;;  %12162 = vmatmul.mubr.msk.f32.vlgmr.msra.gmra.mrb[56].mxu0 %vm94_vm0, %v8883_v5 }
0x25eb   :  { %12478 = vmatpush3.bf16.msra.mxu0 %v12475_v20  ;;  %12183 = vmatprep.mubr.msk.f32.mxu0 %vm94_vm0, %v14178_v43 }
0x25ec   :  { %12480 = vmatprep.subr.bf16.mxu0 %v12479_v6 }
0x25ef   :  { %12482 = vmatpush3.bf16.msra.mxu0 %v12479_v6 }
0x25f0   :  { %12196 = vmatprep.subr.mxu0 %v12934_v60 }
0x25f2   :  { %12184 = vmatmul.mubr.msk.f32.vlgmr.msra.gmra.mrb[58].mxu0 %vm94_vm0, %v14180_v54  ;;  %v11162_v54 = vld [vmem:[%s15088_s20 + $0x1] ss:$0 sm:$0xff] }
0x25f3   :  { %12198 = vmatprep.mubr.msk.f32.mxu0 %vm12935_vm5, %v12934_v60 }
0x26bd   :  { %v12163_v62 = vpop.f32.mrb[56].mxu0 }
0x26be   :  { %v8975_v19 = vadd.f32 %v12163_v62, %v8896_v39  ;;  %v8969_v29 = vpop.f32.mrb[57].mxu0 }
0x26bf   :  { %v8970_v0 = vadd.f32 %v8969_v29, %v8896_v39  ;;  %v14781_v39 = vld [vmem:[%s15090_s22 + $0x10] sm:$0x3f] }
0x26c0   :  { %v14739_v25 = vadd.f32 %v8975_v19, %v14486_v38  ;;  %v9023_v62 = vrot.slane %v14781_v39, %v13440_v53  ;;  %v9040_v53 = vrot.slane %v14460_v34, %v13158_v48 }
0x26c1   :  { %v14742_v43 = vadd.f32 %v8970_v0, %v14489_v50  ;;  %v12898_v50 = vld [vmem:[%s15114_s30 + $0x2] ss:$0 sm:$0xff]  ;;  %v9029_v0 = vrot.slane %v14781_v39, %v13520_v24 }
0x26c2   :  { %v8983_v35 = vsel %vm94_vm0, %v14739_v25, 0.0 }
0x26c3   :  { %8984 = vadd.xlane.f32.xlu1 %v8983_v35  ;;  %v8980_v36 = vsel %vm94_vm0, %v14742_v43, 0.0 }
0x26c4   :  { %8981 = vadd.xlane.f32.xlu0 %v8980_v36 }
0x26c5   :  { %v12185_v21 = vpop.f32.mrb[58].mxu0 }
0x26c6   :  { %v14751_v12 = vadd.f32 %v12185_v21, %v11162_v54  ;;  %v9201_v38 = vpop.f32.mrb[59].mxu0 }
0x26c7   :  { %v14753_v4 = vadd.f32 %v11162_v54, %v9201_v38 }
0x26c8   :  { %v9220_v23 = vmul.f32 %v12904_v44, %v14751_v12  ;;  %v9222_v52 = vmul.f32 %v12905_v33, %v14751_v12 }
0x26c9   :  { %v9217_v7 = vmul.f32 %v12898_v50, %v14753_v4 }
0x26cb   :  { %12197 = vmatpush3.xpose.msk.msra.mxu0 %vm94_vm0, %v9217_v7  ;;  %v12899_v7 = vld [vmem:[%s15114_s30] ss:$0 sm:$0xff] }
0x26cc   :  { %12206 = vmatprep.subr.mxu0 %v12934_v60 }
0x2750   :  { %v8985_v31 = vpop.xlane.xlu1 %8984 }
0x2751   :  { %v8987_v47 = vmul.f32 0.03125, %v8985_v31  ;;  %v8982_v37 = vpop.xlane.xlu0 %8981  ;;  %v9215_v31 = vmul.f32 %v12899_v7, %v14753_v4 }
0x2752   :  { %v8986_v55 = vmul.f32 0.03125, %v8982_v37 }
0x2753   :  { %v8989_v17 = vsub.f32 %v14739_v25, %v8987_v47 }
0x2754   :  { %v8988_v51 = vsub.f32 %v14742_v43, %v8986_v55  ;;  %v12900_v55 = vld [vmem:[%s15114_s30 + $0x1] ss:$0 sm:$0xff] }
0x2755   :  { %v8991_v28 = vmul.f32 %v8989_v17, %v8989_v17 }
0x2756   :  { %v8990_v27 = vmul.f32 %v8988_v51, %v8988_v51 }
0x2757   :  { %v8995_v45 = vsel %vm94_vm0, %v8991_v28, 0.0 }
0x2758   :  { %v8992_v8 = vsel %vm94_vm0, %v8990_v27, 0.0 }
0x2759   :  { %8993 = vadd.xlane.f32.xlu0 %v8992_v8  ;;  %v12902_v8 = vld [vmem:[%s15114_s30 + $0x3] ss:$0 sm:$0xff] }
0x275a   :  { %v9218_v28 = vmul.f32 %v12902_v8, %v14751_v12  ;;  %v9223_v8 = vmul.f32 %v14753_v4, %v13183_v3 }
0x275d   :  { %8996 = vadd.xlane.f32.xlu0 %v8995_v45  ;;  %v12903_v45 = vld [vmem:[%s15114_s30 + $0x6] ss:$0 sm:$0xff] }
0x275e   :  { %v9221_v40 = vmul.f32 %v12903_v45, %v14753_v4 }
0x27e6   :  { %v8994_v13 = vpop.xlane.xlu0 %8993 }
0x27e7   :  { %v8998_v32 = vmul.f32 0.032258064, %v8994_v13 }
0x27e9   :  { %12827 = vrsqrt.f32 %v8998_v32  ;;  %vm9002_vm1 = vcmp.eq.f32.partialorder %v8998_v32, inf  ;;  %v9005_v58 = vand.u32 2147483648, %v8998_v32  ;;  %vm9004_vm2 = vcmp.eq.f32.partialorder %v8998_v32, 0.0 }
0x27ea   :  { %v8997_v18 = vpop.xlane.xlu0 %8996 }
0x27eb   :  { %v8999_v22 = vmul.f32 0.032258064, %v8997_v18 }
0x27ed   :  { %12829 = vrsqrt.f32 %v8999_v22  ;;  %vm9009_vm3 = vcmp.eq.f32.partialorder %v8999_v22, inf  ;;  %v9012_v2 = vand.u32 2147483648, %v8999_v22  ;;  %vm9011_vm4 = vcmp.eq.f32.partialorder %v8999_v22, 0.0 }
0x27f3   :  { %v12828_v30 = vpop.eup %12827 }
0x27f4   :  { %v9001_v42 = vmul.f32 %v12828_v30, %v8998_v32 }
0x27f6   :  { %v9003_v56 = vsel %vm9002_vm1, %v8998_v32, %v9001_v42  ;;  %v12906_v42 = vld [vmem:[%s15115_s3] ss:$0 sm:$0xff] }
0x27f7   :  { %v12830_v20 = vpop.eup %12829  ;;  %v9006_v26 = vsel %vm9004_vm2, %v9005_v58, %v9003_v56 }
0x27f8   :  { %v9014_v1 = vadd.f32 1e-06, %v9006_v26  ;;  %v9008_v11 = vmul.f32 %v12830_v20, %v8999_v22 }
0x27fa   :  { %12831 = vrcp.f32 %v9014_v1  ;;  %v9010_v6 = vsel %vm9009_vm3, %v8999_v22, %v9008_v11 }
0x27fb   :  { %v9013_v5 = vsel %vm9011_vm4, %v9012_v2, %v9010_v6 }
0x27fc   :  { %v9015_v57 = vadd.f32 1e-06, %v9013_v5 }
0x27fe   :  { %12833 = vrcp.f32 %v9015_v57  ;;  %v12907_v57 = vld [vmem:[%s15115_s3 + $0x1] ss:$0 sm:$0xff] }
0x2804   :  { %v12832_v19 = vpop.eup %12831 }
0x2805   :  { %v9018_v29 = vmul.f32 %v12832_v19, %v8988_v51  ;;  %v12901_v51 = vld [vmem:[%s15114_s30 + $0x4] ss:$0 sm:$0xff] }
0x2806   :  { %v9219_v27 = vmul.f32 %v12901_v51, %v14753_v4 }
0x2807   :  { %v9024_v35 = vmul.f32 %v9023_v62, %v9018_v29 }
0x2808   :  { %v12834_v54 = vpop.eup %12833 }
0x2809   :  { %v9019_v36 = vmul.f32 %v12834_v54, %v8989_v17  ;;  %v9030_v21 = vadd.f32 %v9029_v0, %v9024_v35  ;;  %v9216_v17 = vmul.f32 %v12900_v55, %v14751_v12 }
0x280b   :  { %v9025_v38 = vmul.f32 %v9023_v62, %v9019_v36  ;;  %12172 = vmatprep.mubr.msk.f32.mxu1 %vm94_vm0, %v9030_v21 }
0x280d   :  { %v9031_v50 = vadd.f32 %v9029_v0, %v9025_v38 }
0x280f   :  { %12173 = vmatmul.mubr.msk.f32.vlgmr.msra.gmra.mrb[76].mxu1 %vm94_vm0, %v9031_v50 }
0x2810   :  { %12187 = vmatpush3.xpose.msk.msra.mxu1 %vm94_vm0, %v9215_v31  ;;  %12188 = vmatprep.mubr.msk.f32.mxu1 %vm12935_vm5, %v12934_v60 }
0x2811   :  { %12191 = vmatprep.subr.mxu1 %v12934_v60 }
0x28e2   :  { %v12174_v24 = vpop.f32.mrb[76].mxu1 }
0x28e3   :  { %v9113_v47 = vpop.f32.mrb[77].mxu1  ;;  %v9119_v34 = vadd.f32 %v12174_v24, %v9040_v53 }
0x28e4   :  { %v9114_v37 = vadd.f32 %v9113_v47, %v9040_v53 }
0x28e6   :  { %12189 = vmatmul.mubr.msk.f32.vlgmr.msra.gmra.mrb[78].mxu1 %vm94_vm0, %v9114_v37  ;;  %12199 = vmatmul.mubr.msk.f32.vlgmr.msra.gmra.mrb[60].mxu0 %vm94_vm0, %v9114_v37 }
0x28e7   :  { %12192 = vmatpush3.xpose.msk.msra.mxu1 %vm94_vm0, %v9216_v17  ;;  %12207 = vmatpush3.xpose.msk.msra.mxu0 %vm94_vm0, %v9219_v27  ;;  %v9224_v27 = vmul.f32 %v14751_v12, %v13168_v59 }
0x28e8   :  { %12193 = vmatprep.mubr.msk.f32.mxu1 %vm12935_vm5, %v12934_v60  ;;  %12201 = vmatprep.subr.mxu1 %v12934_v60 }
0x28e9   :  { %12208 = vmatprep.mubr.msk.f32.mxu0 %vm12935_vm5, %v12934_v60  ;;  %12216 = vmatprep.subr.mxu0 %v12934_v60 }
0x28ea   :  { %12194 = vmatmul.mubr.msk.f32.vlgmr.msra.gmra.mrb[80].mxu1 %vm94_vm0, %v9119_v34  ;;  %12209 = vmatmul.mubr.msk.f32.vlgmr.msra.gmra.mrb[62].mxu0 %vm94_vm0, %v9114_v37 }
0x28eb   :  { %12202 = vmatpush3.xpose.msk.msra.mxu1 %vm94_vm0, %v9218_v28  ;;  %12217 = vmatpush3.xpose.msk.msra.mxu0 %vm94_vm0, %v9221_v40 }
0x28ec   :  { %12203 = vmatprep.mubr.msk.f32.mxu1 %vm12935_vm5, %v12934_v60  ;;  %12211 = vmatprep.subr.mxu1 %v12934_v60 }
0x28ed   :  { %12218 = vmatprep.mubr.msk.f32.mxu0 %vm12935_vm5, %v12934_v60  ;;  %12226 = vmatprep.subr.mxu0 %v12934_v60 }
0x28ee   :  { %12204 = vmatmul.mubr.msk.f32.vlgmr.msra.gmra.mrb[82].mxu1 %vm94_vm0, %v9119_v34  ;;  %12219 = vmatmul.mubr.msk.f32.vlgmr.msra.gmra.mrb[64].mxu0 %vm94_vm0, %v9114_v37 }
0x28ef   :  { %12212 = vmatpush3.xpose.msk.msra.mxu1 %vm94_vm0, %v9220_v23  ;;  %12213 = vmatprep.mubr.msk.f32.mxu1 %vm12935_vm5, %v12934_v60 }
0x28f0   :  { %12221 = vmatprep.subr.mxu1 %v12934_v60  ;;  %12228 = vmatprep.mubr.msk.f32.mxu0 %vm12935_vm5, %v12934_v60 }
0x28f2   :  { %12214 = vmatmul.mubr.msk.f32.vlgmr.msra.gmra.mrb[84].mxu1 %vm94_vm0, %v9119_v34 }
0x28f3   :  { %12222 = vmatpush3.xpose.msk.msra.mxu1 %vm94_vm0, %v9222_v52  ;;  %12223 = vmatprep.mubr.msk.f32.mxu1 %vm12935_vm5, %v12934_v60 }
0x28f4   :  { %12231 = vmatprep.subr.mxu1 %v12934_v60 }
0x28f6   :  { %12224 = vmatmul.mubr.msk.f32.vlgmr.msra.gmra.mrb[86].mxu1 %vm94_vm0, %v9119_v34  ;;  %v9225_v34 = vmul.f32 %v14753_v4, %v13172_v61  ;;  %v9226_v61 = vmul.f32 %v14751_v12, %v13181_v63 }
0x28f7   :  { %12233 = vmatprep.mubr.msk.f32.mxu1 %vm12935_vm5, %v12934_v60 }
0x29b9   :  { %v9303_v49 = vpop.f32.mrb[78].mxu1  ;;  %v9452_v13 = vpop.f32.mrb[60].mxu0 }
0x29ba   :  { %v9821_v32 = vmul.f32 0.35355338, %v9303_v49  ;;  %v12190_v18 = vpop.f32.mrb[79].mxu1  ;;  %v12200_v22 = vpop.f32.mrb[61].mxu0  ;;  %v9823_v30 = vmul.f32 0.35355338, %v9452_v13 }
0x29bc   :  { %v9829_v58 = vadd.f32 %v12906_v42, %v9821_v32  ;;  %v9831_v2 = vadd.f32 %v12906_v42, %v9823_v30 }
0x29bd   :  { %v9379_v56 = vpop.f32.mrb[80].mxu1  ;;  %v9598_v20 = vpop.f32.mrb[62].mxu0 }
0x29be   :  { %v9822_v26 = vmul.f32 0.35355338, %v9379_v56  ;;  %v12195_v1 = vpop.f32.mrb[81].mxu1  ;;  %v12210_v11 = vpop.f32.mrb[63].mxu0  ;;  %v9825_v6 = vmul.f32 0.35355338, %v9598_v20 }
0x29bf   :  { %v9837_v5 = vsel %vm990_vm6, %v9829_v58, -inf  ;;  %v9843_v38 = vsel %vm990_vm6, %v9831_v2, -inf }
0x29c0   :  { %v9830_v62 = vadd.f32 %v12907_v57, %v9822_v26  ;;  %9838 = vmax.xlane.f32.xlu0 %v9837_v5  ;;  %v14866_v36 = vadd.f32 %v12906_v42, %v9825_v6 }
0x29c1   :  { %v9525_v19 = vpop.f32.mrb[82].mxu1  ;;  %v9744_v29 = vpop.f32.mrb[64].mxu0 }
0x29c2   :  { %v9824_v0 = vmul.f32 0.35355338, %v9525_v19  ;;  %v12205_v35 = vpop.f32.mrb[83].mxu1  ;;  %v12220_v54 = vpop.f32.mrb[65].mxu0  ;;  %v9827_v21 = vmul.f32 0.35355338, %v9744_v29 }
0x29c3   :  { %v9840_v50 = vsel %vm990_vm6, %v9830_v62, -inf  ;;  %v9849_v37 = vsel %vm990_vm6, %v14866_v36, -inf }
0x29c4   :  { %v14870_v7 = vadd.f32 %v12907_v57, %v9824_v0  ;;  %9844 = vmax.xlane.f32.xlu0 %v9843_v38  ;;  %9841 = vmax.xlane.f32.xlu1 %v9840_v50  ;;  %v14874_v47 = vadd.f32 %v12906_v42, %v9827_v21 }
0x29c5   :  { %v9671_v31 = vpop.f32.mrb[84].mxu1 }
0x29c6   :  { %v12215_v53 = vpop.f32.mrb[85].mxu1  ;;  %v9846_v24 = vsel %vm990_vm6, %v14870_v7, -inf  ;;  %v9855_v51 = vsel %vm990_vm6, %v14874_v47, -inf  ;;  %v9826_v28 = vmul.f32 0.35355338, %v9671_v31 }
0x29c8   :  { %9850 = vmax.xlane.f32.xlu0 %v9849_v37  ;;  %9847 = vmax.xlane.f32.xlu1 %v9846_v24  ;;  %v9834_v45 = vadd.f32 %v12907_v57, %v9826_v28  ;;  %v9229_v28 = vmul.f32 %v14753_v4, %v13211_v16 }
0x29c9   :  { %v9817_v55 = vpop.f32.mrb[86].mxu1 }
0x29ca   :  { %v12225_v17 = vpop.f32.mrb[87].mxu1  ;;  %v9828_v40 = vmul.f32 0.35355338, %v9817_v55  ;;  %v9852_v23 = vsel %vm990_vm6, %v9834_v45, -inf }
0x29cc   :  { %9856 = vmax.xlane.f32.xlu0 %v9855_v51  ;;  %v9836_v44 = vadd.f32 %v12907_v57, %v9828_v40  ;;  %v9228_v57 = vmul.f32 %v14751_v12, %v13194_v9 }
0x29ce   :  { %v9858_v59 = vsel %vm990_vm6, %v9836_v44, -inf }
0x29d9   :  { %10003 = vrot.lane.b32.xlu1 %v9224_v27, %s15118_s0 }
0x29dd   :  { %10080 = vrot.lane.b32.xlu1 %v9225_v34, %s15118_s0 }
0x29e2   :  { %9926 = vrot.lane.b32.xlu0 %v9223_v8, %s15118_s0 }
0x2a01   :  { %9853 = vmax.xlane.f32.xlu1 %v9852_v23 }
0x2a05   :  { %9859 = vmax.xlane.f32.xlu1 %v9858_v59 }
0x2a16   :  { %10157 = vrot.lane.b32.xlu1 %v9226_v61, %s15118_s0 }
0x2a4d   :  { %v9839_v33 = vpop.xlane.xlu0 %9838 }
0x2a4e   :  { %v9861_v52 = vsub.f32 %v9829_v58, %v9839_v33 }
0x2a50   :  { %v9869_v3 = vmul.f32 1.442695, %v9861_v52 }
0x2a51   :  { %v9845_v49 = vpop.xlane.xlu0 %9844  ;;  %v9842_v13 = vpop.xlane.xlu1 %9841 }
0x2a52   :  { %12835 = vpow2.f32 %v9869_v3  ;;  %v9863_v32 = vsub.f32 %v9831_v2, %v9845_v49  ;;  %v9862_v18 = vsub.f32 %v9830_v62, %v9842_v13  ;;  %v9227_v62 = vmul.f32 %v14753_v4, %v13197_v10 }
0x2a54   :  { %v9873_v22 = vmul.f32 1.442695, %v9863_v32  ;;  %v9871_v30 = vmul.f32 1.442695, %v9862_v18 }
0x2a55   :  { %v9851_v42 = vpop.xlane.xlu0 %9850  ;;  %v9848_v56 = vpop.xlane.xlu1 %9847 }
0x2a56   :  { %12837 = vpow2.f32 %v9873_v22  ;;  %v9865_v19 = vsub.f32 %v14866_v36, %v9851_v42  ;;  %v9864_v29 = vsub.f32 %v14870_v7, %v9848_v56 }
0x2a57   :  { %12839 = vpow2.f32 %v9871_v30 }
0x2a58   :  { %v9877_v0 = vmul.f32 1.442695, %v9865_v19  ;;  %v9875_v54 = vmul.f32 1.442695, %v9864_v29  ;;  %v11167_v19 = vld [vmem:[%s15084_s16 + $0x30] sm:$0xff] }
0x2a59   :  { %v9857_v20 = vpop.xlane.xlu0 %9856  ;;  %v10004_v26 = vpop.permute.xlu1 %10003 }
0x2a5a   :  { %12232 = vmatpush3.msra.mxu1 %v10004_v26  ;;  %v9867_v35 = vsub.f32 %v14874_v47, %v9857_v20  ;;  %12841 = vpow2.f32 %v9877_v0 }
0x2a5b   :  { %12241 = vmatprep.subr.mxu1 %v12934_v60  ;;  %12843 = vpow2.f32 %v9875_v54 }
0x2a5c   :  { %v12836_v63 = vpop.eup %12835  ;;  %v9881_v21 = vmul.f32 1.442695, %v9867_v35 }
0x2a5d   :  { %v9927_v1 = vpop.permute.xlu0 %9926  ;;  %v9885_v58 = vsel %vm990_vm6, %v12836_v63, 0.0  ;;  %v10081_v38 = vpop.permute.xlu1 %10080 }
0x2a5e   :  { %9886 = vadd.xlane.f32.xlu0 %v9885_v58  ;;  %12227 = vmatpush3.msra.mxu0 %v9927_v1  ;;  %12845 = vpow2.f32 %v9881_v21 }
0x2a5f   :  { %12236 = vmatprep.subr.mxu0 %v12934_v60 }
0x2a60   :  { %v14897_v11 = vpop.eup %12837 }
0x2a61   :  { %v12840_v2 = vpop.eup %12839  ;;  %v9891_v6 = vsel %vm990_vm6, %v14897_v11, 0.0 }
0x2a62   :  { %9892 = vadd.xlane.f32.xlu0 %v9891_v6  ;;  %v9888_v5 = vsel %vm990_vm6, %v12840_v2, 0.0 }
0x2a63   :  { %9889 = vadd.xlane.f32.xlu1 %v9888_v5 }
0x2a64   :  { %v12842_v10 = vpop.eup %12841 }
0x2a65   :  { %v12844_v37 = vpop.eup %12843  ;;  %v9897_v7 = vsel %vm990_vm6, %v12842_v10, 0.0 }
0x2a66   :  { %v9894_v47 = vsel %vm990_vm6, %v12844_v37, 0.0 }
0x2a68   :  { %v14912_v55 = vpop.eup %12845 }
0x2a69   :  { %v9903_v17 = vsel %vm990_vm6, %v14912_v55, 0.0 }
0x2a74   :  { %10311 = vrot.lane.b32.xlu1 %v9228_v57, %s15118_s0  ;;  %v11165_v57 = vld [vmem:[%s15084_s16 + $0x20] sm:$0xff] }
0x2a78   :  { %10234 = vrot.lane.b32.xlu0 %v9227_v62, %s15118_s0  ;;  %v11166_v62 = vld [vmem:[%s15084_s16 + $0x28] sm:$0xff] }
0x2a79   :  { %v12483_v29 = vpack.c.bf16 %v11166_v62, %v11165_v57 }
0x2a8e   :  { %v9854_v9 = vpop.xlane.xlu1 %9853 }
0x2a8f   :  { %v9866_v50 = vsub.f32 %v9834_v45, %v9854_v9  ;;  %v9230_v45 = vmul.f32 %v14751_v12, %v13207_v14  ;;  %v14972_v9 = vld [vmem:[%s15090_s22 + $0x8] sm:$0xff] }
0x2a91   :  { %v9879_v31 = vmul.f32 1.442695, %v9866_v50  ;;  %v10550_v50 = vrot.slane %v14972_v9, %v13493_v41 }
0x2a92   :  { %v9860_v53 = vpop.xlane.xlu1 %9859 }
0x2a93   :  { %12847 = vpow2.f32 %v9879_v31  ;;  %v9868_v24 = vsub.f32 %v9836_v44, %v9860_v53 }
0x2a95   :  { %v9883_v36 = vmul.f32 1.442695, %v9868_v24 }
0x2a96   :  { %v10158_v44 = vpop.permute.xlu1 %10157 }
0x2a97   :  { %12849 = vpow2.f32 %v9883_v36  ;;  %9898 = vadd.xlane.f32.xlu0 %v9897_v7 }
0x2a98   :  { %9895 = vadd.xlane.f32.xlu1 %v9894_v47 }
0x2a9b   :  { %9904 = vadd.xlane.f32.xlu0 %v9903_v17 }
0x2a9d   :  { %v12848_v51 = vpop.eup %12847 }
0x2a9e   :  { %v9900_v27 = vsel %vm990_vm6, %v12848_v51, 0.0 }
0x2a9f   :  { %9901 = vadd.xlane.f32.xlu1 %v9900_v27 }
0x2aa1   :  { %v14918_v34 = vpop.eup %12849 }
0x2aa2   :  { %v9906_v8 = vsel %vm990_vm6, %v14918_v34, 0.0 }
0x2aa3   :  { %9907 = vadd.xlane.f32.xlu1 %v9906_v8 }
0x2ab1   :  { %10388 = vrot.lane.b32.xlu0 %v9229_v28, %s15118_s0 }
0x2ab4   :  { %10465 = vrot.lane.b32.xlu1 %v9230_v45, %s15118_s0 }
0x2aeb   :  { %v9887_v40 = vpop.xlane.xlu0 %9886 }
0x2aec   :  { %12851 = vrcp.f32 %v9887_v40  ;;  %v11195_v40 = vld [vmem:[%s15085_s17 + $0x20] sm:$0xff] }
0x2aef   :  { %v9893_v23 = vpop.xlane.xlu0 %9892 }
0x2af0   :  { %v9890_v59 = vpop.xlane.xlu1 %9889 }
0x2af1   :  { %12853 = vrcp.f32 %v9890_v59 }
0x2af2   :  { %12855 = vrcp.f32 %v9893_v23  ;;  %v11197_v23 = vld [vmem:[%s15085_s17 + $0x30] sm:$0xff] }
0x2af3   :  { %v10235_v52 = vpop.permute.xlu0 %10234 }
0x2af4   :  { %v10312_v3 = vpop.permute.xlu1 %10311 }
0x2af6   :  { %v12852_v61 = vpop.eup %12851 }
0x2af7   :  { %v9917_v33 = vmul.f32 %v12852_v61, %v12836_v63  ;;  %v11198_v61 = vld [vmem:[%s15085_s17 + $0x38] sm:$0xff] }
0x2af9   :  { %12229 = vmatmul.mubr.msk.f32.vlgmr.msra.gmra.mrb[66].mxu0 %vm990_vm6, %v9917_v33  ;;  %v12495_v33 = vpack.c.bf16 %v11198_v61, %v11197_v23 }
0x2afa   :  { %12237 = vmatpush3.msra.mxu0 %v10081_v38  ;;  %12238 = vmatprep.mubr.msk.f32.mxu0 %vm12935_vm5, %v12934_v60 }
0x2afb   :  { %v12854_v16 = vpop.eup %12853  ;;  %12246 = vmatprep.subr.mxu0 %v12934_v60 }
0x2afc   :  { %v12856_v14 = vpop.eup %12855  ;;  %v9918_v12 = vmul.f32 %v12854_v16, %v12840_v2  ;;  %v11200_v16 = vld [vmem:[%s15086_s18 + $0x40] sm:$0xff] }
0x2afd   :  { %v9919_v4 = vmul.f32 %v12856_v14, %v14897_v11  ;;  %v11201_v14 = vld [vmem:[%s15086_s18 + $0x48] sm:$0xff] }
0x2afe   :  { %12234 = vmatmul.mubr.msk.f32.vlgmr.msra.gmra.mrb[88].mxu1 %vm990_vm6, %v9918_v12  ;;  %v11202_v12 = vld [vmem:[%s15086_s18 + $0x50] sm:$0xff] }
0x2aff   :  { %12242 = vmatpush3.msra.mxu1 %v10158_v44  ;;  %12243 = vmatprep.mubr.msk.f32.mxu1 %vm12935_vm5, %v12934_v60  ;;  %v11196_v44 = vld [vmem:[%s15085_s17 + $0x28] sm:$0xff] }
0x2b00   :  { %12251 = vmatprep.subr.mxu1 %v12934_v60  ;;  %v12491_v59 = vpack.c.bf16 %v11196_v44, %v11195_v40 }
0x2b01   :  { %12239 = vmatmul.mubr.msk.f32.vlgmr.msra.gmra.mrb[66].mxu0 %vm990_vm6, %v9919_v4  ;;  %v12499_v4 = vpack.c.bf16 %v11201_v14, %v11200_v16 }
0x2b02   :  { %12247 = vmatpush3.msra.mxu0 %v10235_v52  ;;  %12248 = vmatprep.mubr.msk.f32.mxu0 %vm12935_vm5, %v12934_v60  ;;  %v11203_v52 = vld [vmem:[%s15086_s18 + $0x58] sm:$0xff] }
0x2b03   :  { %12256 = vmatprep.subr.mxu0 %v12934_v60 }
0x2b24   :  { %v9899_v49 = vpop.xlane.xlu0 %9898 }
0x2b25   :  { %12857 = vrcp.f32 %v9899_v49  ;;  %v9896_v13 = vpop.xlane.xlu1 %9895  ;;  %v11204_v49 = vld [vmem:[%s15086_s18 + $0x60] sm:$0xff] }
0x2b26   :  { %12859 = vrcp.f32 %v9896_v13  ;;  %v11205_v13 = vld [vmem:[%s15086_s18 + $0x68] sm:$0xff] }
0x2b28   :  { %v9905_v32 = vpop.xlane.xlu0 %9904 }
0x2b29   :  { %12861 = vrcp.f32 %v9905_v32  ;;  %v12507_v32 = vpack.c.bf16 %v11205_v13, %v11204_v49 }
0x2b2c   :  { %v9902_v18 = vpop.xlane.xlu1 %9901  ;;  %v10389_v26 = vpop.permute.xlu0 %10388 }
0x2b2d   :  { %12863 = vrcp.f32 %v9902_v18 }
0x2b2f   :  { %v12858_v22 = vpop.eup %12857 }
0x2b30   :  { %v12860_v30 = vpop.eup %12859  ;;  %v9921_v42 = vmul.f32 %v12858_v22, %v12842_v10  ;;  %v9908_v20 = vpop.xlane.xlu1 %9907 }
0x2b31   :  { %v9920_v56 = vmul.f32 %v12860_v30, %v12844_v37  ;;  %12865 = vrcp.f32 %v9908_v20 }
0x2b32   :  { %12249 = vmatmul.mubr.msk.f32.vlgmr.msra.gmra.mrb[66].mxu0 %vm990_vm6, %v9921_v42 }
0x2b33   :  { %12244 = vmatmul.mubr.msk.f32.vlgmr.msra.gmra.mrb[88].mxu1 %vm990_vm6, %v9920_v56  ;;  %12257 = vmatpush3.msra.mxu0 %v10389_v26  ;;  %v12862_v63 = vpop.eup %12861 }
0x2b34   :  { %12252 = vmatpush3.msra.mxu1 %v10312_v3  ;;  %12253 = vmatprep.mubr.msk.f32.mxu1 %vm12935_vm5, %v12934_v60  ;;  %v9923_v58 = vmul.f32 %v12862_v63, %v14912_v55  ;;  %v10466_v2 = vpop.permute.xlu1 %10465  ;;  %v12503_v3 = vpack.c.bf16 %v11203_v52, %v11202_v12 }
0x2b35   :  { %12258 = vmatprep.mubr.msk.f32.mxu0 %vm12935_vm5, %v12934_v60  ;;  %12261 = vmatprep.subr.mxu1 %v12934_v60 }
0x2b36   :  { %12484 = vmatprep.subr.bf16.mxu0 %v12483_v29 }
0x2b37   :  { %v12864_v1 = vpop.eup %12863 }
0x2b38   :  { %v9922_v11 = vmul.f32 %v12864_v1, %v12848_v51 }
0x2b3a   :  { %12259 = vmatmul.mubr.msk.f32.vlgmr.msra.gmra.mrb[66].mxu0 %vm990_vm6, %v9923_v58 }
0x2b3b   :  { %12254 = vmatmul.mubr.msk.f32.vlgmr.msra.gmra.mrb[88].mxu1 %vm990_vm6, %v9922_v11  ;;  %v12866_v6 = vpop.eup %12865  ;;  %12486 = vmatpush3.bf16.msra.mxu0 %v12483_v29 }
0x2b3c   :  { %12262 = vmatpush3.msra.mxu1 %v10466_v2  ;;  %12263 = vmatprep.mubr.msk.f32.mxu1 %vm12935_vm5, %v12934_v60  ;;  %v9924_v5 = vmul.f32 %v12866_v6, %v14918_v34  ;;  %v11168_v60 = vld [vmem:[%s15084_s16 + $0x38] sm:$0xff] }
0x2b3d   :  { %v12487_v0 = vpack.c.bf16 %v11168_v60, %v11167_v19  ;;  %12492 = vmatprep.subr.bf16.mxu1 %v12491_v59  ;;  %v10677_v19 = vrot.slane %v14781_v39, %v13150_v46  ;;  %v11206_v46 = vld [vmem:[%s15086_s18 + $0x70] sm:$0xff] }
0x2b3f   :  { %12488 = vmatprep.subr.bf16.mxu0 %v12487_v0 }
0x2b40   :  { %12490 = vmatpush3.bf16.msra.mxu0 %v12487_v0  ;;  %v10683_v0 = vrot.slane %v14781_v39, %v13158_v48 }
0x2b41   :  { %12500 = vmatprep.subr.bf16.mxu0 %v12499_v4 }
0x2b43   :  { %12264 = vmatmul.mubr.msk.f32.vlgmr.msra.gmra.mrb[88].mxu1 %vm990_vm6, %v9924_v5 }
0x2b44   :  { %12494 = vmatpush3.bf16.msra.mxu1 %v12491_v59 }
0x2b45   :  { %12496 = vmatprep.subr.bf16.mxu1 %v12495_v33 }
0x2b48   :  { %12498 = vmatpush3.bf16.msra.mxu1 %v12495_v33 }
0x2c0d   :  { %v10460_v35 = vpop.f32.mrb[66].mxu0 }
0x2c0e   :  { %v12260_v54 = vpop.f32.mrb[67].mxu0  ;;  %12274 = vmatprep.mubr.msk.f32.mxu0 %vm94_vm0, %v10460_v35 }
0x2c16   :  { %v10537_v21 = vpop.f32.mrb[88].mxu1 }
0x2c17   :  { %v12265_v38 = vpop.f32.mrb[89].mxu1  ;;  %12275 = vmatmul.mubr.msk.f32.vlgmr.msra.gmra.mrb[68].mxu0 %vm94_vm0, %v10537_v21 }
0x2c18   :  { %12502 = vmatpush3.bf16.msra.mxu0 %v12499_v4 }
0x2c19   :  { %12504 = vmatprep.subr.bf16.mxu0 %v12503_v3 }
0x2c1c   :  { %12506 = vmatpush3.bf16.msra.mxu0 %v12503_v3 }
0x2c1d   :  { %12508 = vmatprep.subr.bf16.mxu0 %v12507_v32 }
0x2c20   :  { %12510 = vmatpush3.bf16.msra.mxu0 %v12507_v32 }
0x2cea   :  { %v12276_v31 = vpop.f32.mrb[68].mxu0 }
0x2ceb   :  { %v10629_v53 = vadd.f32 %v12276_v31, %v10550_v50  ;;  %v10623_v10 = vpop.f32.mrb[69].mxu0 }
0x2cec   :  { %v10624_v24 = vadd.f32 %v10623_v10, %v10550_v50  ;;  %v11208_v10 = vld [vmem:[%s15089_s21 + $0x1] ss:$0 sm:$0xff] }
0x2ced   :  { %v14977_v37 = vadd.f32 %v10629_v53, %v14739_v25  ;;  %v11207_v53 = vld [vmem:[%s15086_s18 + $0x78] sm:$0xff]  ;;  %s12938_s18 = smov [#allocation2]  }
0x2cee   :  { %v14980_v36 = vadd.f32 %v10624_v24, %v14742_v43  ;;  %v12511_v48 = vpack.c.bf16 %v11207_v53, %v11206_v46  ;;  %s10937_s21 = sshll.u32 %s12938_s18, 4  ;;  %s10938_s21 = int_to_ptr.vmem [resolvable:$true] %s10937_s21 }
0x2cef   :  { %v10637_v7 = vsel %vm94_vm0, %v14977_v37, 0.0  ;;  %s12909_s26 = scalar_lea.vmem %s10938_s21, 256  ;;  %p12914_p1 = scmp.lt.s32.totalorder %s10938_s21, %s10938_s21 }
0x2cf0   :  { %10638 = vadd.xlane.f32.xlu1 %v10637_v7  ;;  %v10634_v55 = vsel %vm94_vm0, %v14980_v36, 0.0  ;;  %12512 = vmatprep.subr.bf16.mxu0 %v12511_v48  ;;  %p12910_p0 = scmp.ne.s32.totalorder %s10938_s21, %s12909_s26  ;;  %p12915_p2 = scmp.lt.s32.totalorder %s12909_s26, %s12909_s26 }
0x2cf1   :  { %10635 = vadd.xlane.f32.xlu0 %v10634_v55  ;;  %12514 = vmatpush3.bf16.msra.mxu0 %v12511_v48 }
0x2cf2   :  { %p12916_p3 = por %p12915_p2, %p12914_p1 }
0x2cf4   :  { %p12917_p4 = pnand %p12916_p3, %p12910_p0 }
0x2d7d   :  { %v10639_v47 = vpop.xlane.xlu1 %10638 }
0x2d7e   :  { %v10641_v17 = vmul.f32 0.03125, %v10639_v47  ;;  %v10636_v51 = vpop.xlane.xlu0 %10635 }
0x2d7f   :  { %v10640_v27 = vmul.f32 0.03125, %v10636_v51 }
0x2d80   :  { %v14987_v34 = vsub.f32 %v14977_v37, %v10641_v17 }
0x2d81   :  { %v10642_v25 = vsub.f32 %v14980_v36, %v10640_v27  ;;  %v10794_v27 = vrot.slane %v14972_v9, %v13496_v15 }
0x2d82   :  { %v10645_v28 = vmul.f32 %v14987_v34, %v14987_v34 }
0x2d83   :  { %v10644_v8 = vmul.f32 %v10642_v25, %v10642_v25 }
0x2d84   :  { %v10649_v45 = vsel %vm94_vm0, %v10645_v28, 0.0 }
0x2d85   :  { %v10646_v43 = vsel %vm94_vm0, %v10644_v8, 0.0 }
0x2d86   :  { %10647 = vadd.xlane.f32.xlu0 %v10646_v43 }
0x2d8a   :  { %10650 = vadd.xlane.f32.xlu0 %v10649_v45 }
0x2e13   :  { %v10648_v18 = vpop.xlane.xlu0 %10647 }
0x2e14   :  { %v10652_v22 = vmul.f32 0.032258064, %v10648_v18 }
0x2e16   :  { %12867 = vrsqrt.f32 %v10652_v22  ;;  %vm10656_vm5 = vcmp.eq.f32.partialorder %v10652_v22, inf  ;;  %v10659_v26 = vand.u32 2147483648, %v10652_v22  ;;  %vm10658_vm6 = vcmp.eq.f32.partialorder %v10652_v22, 0.0 }
0x2e17   :  { %v10651_v30 = vpop.xlane.xlu0 %10650 }
0x2e18   :  { %v10653_v42 = vmul.f32 0.032258064, %v10651_v30 }
0x2e1a   :  { %12869 = vrsqrt.f32 %v10653_v42  ;;  %vm10663_vm7 = vcmp.eq.f32.partialorder %v10653_v42, inf  ;;  %v10666_v6 = vand.u32 2147483648, %v10653_v42  ;;  %vm10665_vm8 = vcmp.eq.f32.partialorder %v10653_v42, 0.0 }
0x2e20   :  { %v12868_v56 = vpop.eup %12867 }
0x2e21   :  { %v10655_v20 = vmul.f32 %v12868_v56, %v10652_v22 }
0x2e23   :  { %v10657_v63 = vsel %vm10656_vm5, %v10652_v22, %v10655_v20 }
0x2e24   :  { %v12870_v1 = vpop.eup %12869  ;;  %v10660_v58 = vsel %vm10658_vm6, %v10659_v26, %v10657_v63 }
0x2e25   :  { %v10668_v11 = vadd.f32 1e-06, %v10660_v58  ;;  %v10662_v2 = vmul.f32 %v12870_v1, %v10653_v42 }
0x2e27   :  { %12871 = vrcp.f32 %v10668_v11  ;;  %v10664_v5 = vsel %vm10663_vm7, %v10653_v42, %v10662_v2  ;;  %v10921_v11 = vrot.slane %v14781_v39, %v13493_v41 }
0x2e28   :  { %v10667_v57 = vsel %vm10665_vm8, %v10666_v6, %v10664_v5 }
0x2e29   :  { %v10669_v62 = vadd.f32 1e-06, %v10667_v57  ;;  %v10927_v57 = vrot.slane %v14781_v39, %v13496_v15 }
0x2e2b   :  { %12873 = vrcp.f32 %v10669_v62 }
0x2e31   :  { %v12872_v29 = vpop.eup %12871 }
0x2e32   :  { %v10672_v60 = vmul.f32 %v12872_v29, %v10642_v25 }
0x2e34   :  { %v10678_v35 = vmul.f32 %v10677_v19, %v10672_v60 }
0x2e35   :  { %v12874_v54 = vpop.eup %12873 }
0x2e36   :  { %v10673_v21 = vmul.f32 %v12874_v54, %v14987_v34  ;;  %v10684_v38 = vadd.f32 %v10683_v0, %v10678_v35 }
0x2e38   :  { %v10679_v50 = vmul.f32 %v10677_v19, %v10673_v21  ;;  %12285 = vmatprep.mubr.msk.f32.mxu1 %vm94_vm0, %v10684_v38 }
0x2e3a   :  { %v10685_v31 = vadd.f32 %v10683_v0, %v10679_v50 }
0x2e3c   :  { %12286 = vmatmul.mubr.msk.f32.vlgmr.msra.gmra.mrb[90].mxu1 %vm94_vm0, %v10685_v31 }
0x2f0f   :  { %v12287_v24 = vpop.f32.mrb[90].mxu1 }
0x2f10   :  { %v10786_v7 = vadd.f32 %v12287_v24, %v11208_v10  ;;  %v10780_v55 = vpop.f32.mrb[91].mxu1 }
0x2f11   :  { %v10781_v47 = vadd.f32 %v11208_v10, %v10780_v55 }
0x2f12   :  { %v10790_v51 = vmax.f32 %v10786_v7, 0.0 }
0x2f13   :  { %v10789_v17 = vmax.f32 %v10781_v47, 0.0 }
0x2f15   :  { %12304 = vmatprep.mubr.msk.f32.mxu0 %vm1946_vm11, %v10789_v17 }
0x2f16   :  { %12305 = vmatmul.mubr.msk.f32.vlgmr.msra.gmra.mrb[70].mxu0 %vm1946_vm11, %v10790_v51 }
0x2fe9   :  { %v12306_v34 = vpop.f32.mrb[70].mxu0 }
0x2fea   :  { %v10873_v25 = vadd.f32 %v12306_v34, %v10794_v27  ;;  %v10867_v8 = vpop.f32.mrb[71].mxu0 }
0x2feb   :  { %v10868_v43 = vadd.f32 %v10867_v8, %v10794_v27 }
0x2fec   :  { %v10877_v28 = vadd.f32 %v10873_v25, %v14977_v37 }
0x2fed   :  { %v10876_v45 = vadd.f32 %v10868_v43, %v14980_v36 }
0x2fee   :  { %v10881_v40 = vsel %vm94_vm0, %v10877_v28, 0.0 }
0x2fef   :  { %10882 = vadd.xlane.f32.xlu1 %v10881_v40  ;;  %v10878_v44 = vsel %vm94_vm0, %v10876_v45, 0.0 }
0x2ff0   :  { %10879 = vadd.xlane.f32.xlu0 %v10878_v44 }
0x307c   :  { %v10883_v23 = vpop.xlane.xlu1 %10882 }
0x307d   :  { %v10885_v59 = vmul.f32 0.03125, %v10883_v23  ;;  %v10880_v61 = vpop.xlane.xlu0 %10879 }
0x307e   :  { %v10884_v33 = vmul.f32 0.03125, %v10880_v61 }
0x307f   :  { %v10887_v16 = vsub.f32 %v10877_v28, %v10885_v59 }
0x3080   :  { %v10886_v9 = vsub.f32 %v10876_v45, %v10884_v33 }
0x3081   :  { %v10889_v14 = vmul.f32 %v10887_v16, %v10887_v16 }
0x3082   :  { %v10888_v12 = vmul.f32 %v10886_v9, %v10886_v9 }
0x3083   :  { %v10893_v4 = vsel %vm94_vm0, %v10889_v14, 0.0 }
0x3084   :  { %10894 = vadd.xlane.f32.xlu1 %v10893_v4  ;;  %v10890_v37 = vsel %vm94_vm0, %v10888_v12, 0.0 }
0x3085   :  { %10891 = vadd.xlane.f32.xlu0 %v10890_v37 }
0x3111   :  { %v10895_v36 = vpop.xlane.xlu1 %10894 }
0x3112   :  { %v10897_v52 = vmul.f32 0.032258064, %v10895_v36  ;;  %v10892_v3 = vpop.xlane.xlu0 %10891 }
0x3113   :  { %v10896_v49 = vmul.f32 0.032258064, %v10892_v3 }
0x3114   :  { %12875 = vrsqrt.f32 %v10897_v52  ;;  %vm10907_vm11 = vcmp.eq.f32.partialorder %v10897_v52, inf  ;;  %v10910_v22 = vand.u32 2147483648, %v10897_v52  ;;  %vm10909_vm9 = vcmp.eq.f32.partialorder %v10897_v52, 0.0 }
0x3115   :  { %12877 = vrsqrt.f32 %v10896_v49  ;;  %vm10900_vm10 = vcmp.eq.f32.partialorder %v10896_v49, inf  ;;  %v10903_v56 = vand.u32 2147483648, %v10896_v49  ;;  %vm10902_vm12 = vcmp.eq.f32.partialorder %v10896_v49, 0.0 }
0x311e   :  { %v12876_v13 = vpop.eup %12875 }
0x311f   :  { %v12878_v32 = vpop.eup %12877  ;;  %v10906_v18 = vmul.f32 %v12876_v13, %v10897_v52 }
0x3120   :  { %v10899_v30 = vmul.f32 %v12878_v32, %v10896_v49 }
0x3121   :  { %v10908_v42 = vsel %vm10907_vm11, %v10897_v52, %v10906_v18 }
0x3122   :  { %v10911_v20 = vsel %vm10909_vm9, %v10910_v22, %v10908_v42  ;;  %v10901_v26 = vsel %vm10900_vm10, %v10896_v49, %v10899_v30 }
0x3123   :  { %v10913_v63 = vadd.f32 1e-06, %v10911_v20  ;;  %v10904_v1 = vsel %vm10902_vm12, %v10903_v56, %v10901_v26 }
0x3124   :  { %v10912_v58 = vadd.f32 1e-06, %v10904_v1 }
0x3125   :  { %12879 = vrcp.f32 %v10913_v63 }
0x3126   :  { %12881 = vrcp.f32 %v10912_v58 }
0x312f   :  { %v12880_v2 = vpop.eup %12879 }
0x3130   :  { %v12882_v6 = vpop.eup %12881  ;;  %v10917_v5 = vmul.f32 %v12880_v2, %v10887_v16 }
0x3131   :  { %v10916_v62 = vmul.f32 %v12882_v6, %v10886_v9 }
0x3132   :  { %v10923_v19 = vmul.f32 %v10921_v11, %v10917_v5 }
0x3133   :  { %v10922_v29 = vmul.f32 %v10921_v11, %v10916_v62 }
0x3134   :  { %v10929_v60 = vadd.f32 %v10927_v57, %v10923_v19 }
0x3135   :  { %v10928_v0 = vadd.f32 %v10927_v57, %v10922_v29 }
0x3136   :  { %10931 = vst.msk [vmem:[#allocation2 + $0x8] sm:$0xff] %vm94_vm0, %v10929_v60 }
0x3137   :  { %10930 = vst.msk [vmem:[#allocation2] sm:$0xff] %vm94_vm0, %v10928_v0 }
0x3138   :  { %12920 = shalt.err (!%p12917_p4)
}
0x3139   :  { %s12921_s22 = scalar_lea.hbm %s15091_s23, 256 }
0x313a   :  { %p12922_p5 = scmp.ne.s32.totalorder %s15091_s23, %s12921_s22  ;;  %p12925_p6 = scmp.lt.u32.totalorder %s12921_s22, %s15091_s23 }
0x313c   :  { %p12927_p7 = pnand %p12925_p6, %p12922_p5 }
0x313e   :  { %12930 = shalt.err (!%p12927_p7)
}
0x313f   :  { %s12939_s19 = smov 128   ;;  %s12940_s15 = smov 8  }
0x3140   :  { %10943 = dma.vmem_to_hbm [thread:$0]  %s10938_s21, 256, %s15091_s23, [#allocation3], %s12939_s19, %s12939_s19, %s12940_s15  }
0x3141   :  { %12931 = dma.done.wait [#allocation3], 256  }
0x3142   :  { %12932 = vsyncadd [#allocation3], 4294967040 }
0x3143   :  { %10947 = vsyncpa [#allocation3], 1 }

</bundles_post_ra>
